<compile_context>
chip_gen: v6e
topology: v6e:2x2x1
jax: 0.10.0
libtpu: 0.0.40
codegen_flags: <defaults>
</compile_context>

<pallas_src>
import functools

import jax
import jax.numpy as jnp
from jax import lax
from jax.experimental import pallas as pl
from jax.experimental.pallas import tpu as pltpu

_BN_EPS = 1e-5
_STRIP = 128  # spatial rows per in-kernel strip (multiple of 8)


def _round_up(x, m):
    return (x + m - 1) // m * m


def _double_conv_kernel(x_ref, w1_ref, w2_ref, o_ref, h_ref, *, H, W):
    """One batch image: conv3x3(+BN)+ReLU -> conv3x3(+BN)+ReLU.

    x_ref : (P + 2*Wp, 3*Cin)  bf16  kw-concat, flattened, row-guarded input
    w1_ref: (3, 3*Cin, Cmid)   bf16  conv1 weights, kh-major, (kw, Cin) on K
    w2_ref: (3, 3*Cmid, Cout)  bf16  conv2 weights, kh-major, (kw, Cmid) on K
    o_ref : (P, Cout)          f32   conv2+ReLU on the padded grid (wrapper crops)
    h_ref : (P + 2*G2, Cmid)   bf16  VMEM scratch for the mid activation
    """
    Wp = W + 2
    Hp = H + 2
    P = Hp * Wp
    G2 = _round_up(Wp + 1, 8)  # aligned guard with slack (>= Wp+1, no exact fit)
    Cmid = w1_ref.shape[2]
    Cout = w2_ref.shape[2]

    # Guard rows must be zeroed EVERY grid step: the scratch persists across
    # steps (and is per-core on megacore), so never gate this on program_id.
    h_ref[pl.ds(0, G2), :] = jnp.zeros((G2, Cmid), jnp.bfloat16)
    h_ref[pl.ds(G2 + P, G2), :] = jnp.zeros((G2, Cmid), jnp.bfloat16)

    strips = [(s0, min(_STRIP, P - s0)) for s0 in range(0, P, _STRIP)]

    # ---- conv1 (+folded BN) + ReLU + interior mask -> h scratch (bf16) -----
    for s0, rows in strips:
        acc = jnp.dot(x_ref[pl.ds(s0, rows), :], w1_ref[0],
                      preferred_element_type=jnp.float32)
        acc += jnp.dot(x_ref[pl.ds(s0 + Wp, rows), :], w1_ref[1],
                       preferred_element_type=jnp.float32)
        acc += jnp.dot(x_ref[pl.ds(s0 + 2 * Wp, rows), :], w1_ref[2],
                       preferred_element_type=jnp.float32)

        # Interior mask (zero the padding ring so conv2 sees proper zeros).
        # r = p // Wp, c = p % Wp computed in f32 (exact for these ranges),
        # avoiding vector integer div/mod.
        p_f = lax.broadcasted_iota(jnp.int32, (rows, Cmid), 0).astype(
            jnp.float32) + float(s0)
        r_f = jnp.floor((p_f + 0.5) * (1.0 / Wp))
        c_f = p_f - r_f * Wp
        interior = ((r_f >= 1.0) & (r_f <= float(H)) &
                    (c_f >= 1.0) & (c_f <= float(W)))
        h = jnp.where(interior, jnp.maximum(acc, 0.0), 0.0)
        h_ref[pl.ds(G2 + s0, rows), :] = h.astype(jnp.bfloat16)

    # ---- conv2 (+folded BN) + ReLU -> lane-dense padded output -------------
    # For each kh row tap, lane-concat the three kw column shifts of h into a
    # (rows, 3*Cmid) LHS so each dot contracts K = 3*Cmid on the MXU.
    base = G2 - Wp - 1
    for s0, rows in strips:
        acc2 = None
        for kh in range(3):
            off = base + s0 + kh * Wp
            lhs = jnp.concatenate(
                [h_ref[pl.ds(off + kw, rows), :] for kw in range(3)], axis=-1)
            part = jnp.dot(lhs, w2_ref[kh],
                           preferred_element_type=jnp.float32)
            acc2 = part if acc2 is None else acc2 + part
        o_ref[pl.ds(s0, rows), :] = jnp.maximum(acc2, 0.0)


def double_conv_forward(x_nchw, w1, w2):
    """PyTorch-semantics DoubleConv forward (eval-mode BN, init statistics).

    x_nchw: (N, Cin, H, W) f32
    w1:     (Cmid, Cin, 3, 3) f32   (Conv2d weight, bias=False)
    w2:     (Cout, Cmid, 3, 3) f32
    returns (N, Cout, H, W) f32
    """
    N, Cin, H, W = x_nchw.shape
    Cmid = w1.shape[0]
    Cout = w2.shape[0]
    Hp, Wp = H + 2, W + 2
    P = Hp * Wp
    G2 = _round_up(Wp + 1, 8)
    Pg1 = P + 2 * Wp  # conv1 input rows incl. one full guard row top/bottom

    # Eval-mode BN (gamma=1, beta=0, mean=0, var=1) folded into the weights.
    s = (1.0 + _BN_EPS) ** -0.5

    # NHWC + ONE fused pad (conv padding ring + one extra ring) so that both
    # the kw column shifts and the kh row guards are plain slices of a single
    # padded tensor.  bf16 for the MXU operands.
    xh = jnp.transpose(x_nchw, (0, 2, 3, 1)).astype(jnp.bfloat16)
    xpp = jnp.pad(xh, ((0, 0), (2, 2), (2, 2), (0, 0)))      # (N, H+4, W+4, Cin)
    # kw-concat: lane block j holds the (conv-padded) image shifted by j-1 cols.
    x_cat = jnp.concatenate(
        [xpp[:, :, j:j + Wp, :] for j in range(3)], axis=-1)  # (N, H+4, Wp, 3*Cin)
    x_cat = x_cat.reshape(N, Pg1, 3 * Cin)

    # Weights -> (kh, kw*C, Cout_of_that_conv), BN scale folded, bf16.
    w1m = (jnp.transpose(w1, (2, 3, 1, 0)).reshape(3, 3 * Cin, Cmid) * s
           ).astype(jnp.bfloat16)
    w2m = (jnp.transpose(w2, (2, 3, 1, 0)).reshape(3, 3 * Cmid, Cout) * s
           ).astype(jnp.bfloat16)

    kernel = functools.partial(_double_conv_kernel, H=H, W=W)

    out_flat = pl.pallas_call(
        kernel,
        out_shape=jax.ShapeDtypeStruct((N, P, Cout), jnp.float32),
        grid_spec=pltpu.PrefetchScalarGridSpec(
            num_scalar_prefetch=0,
            grid=(N,),
            in_specs=[
                pl.BlockSpec((None, Pg1, 3 * Cin), lambda n: (n, 0, 0)),
                pl.BlockSpec((3, 3 * Cin, Cmid), lambda n: (0, 0, 0)),
                pl.BlockSpec((3, 3 * Cmid, Cout), lambda n: (0, 0, 0)),
            ],
            out_specs=pl.BlockSpec((None, P, Cout), lambda n: (n, 0, 0)),
            scratch_shapes=[pltpu.VMEM((P + 2 * G2, Cmid), jnp.bfloat16)],
        ),
        compiler_params=pltpu.CompilerParams(
            dimension_semantics=("parallel",),
            vmem_limit_bytes=64 * 1024 * 1024),
    )(x_cat, w1m, w2m)

    # Crop the padded grid to HxW and return NCHW like the PyTorch module.
    out = out_flat.reshape(N, Hp, Wp, Cout)[:, 1:H + 1, 1:W + 1, :]
    return jnp.transpose(out, (0, 3, 1, 2))


# ------------------------------------------------------------------------
# Pure-JAX reference (same bf16 operand rounding / f32 accumulation contract)
# ------------------------------------------------------------------------
def _ref_double_conv(x, w1, w2):
    s = (1.0 + _BN_EPS) ** -0.5
    xb = x.astype(jnp.bfloat16).astype(jnp.float32)
    w1b = (w1 * s).astype(jnp.bfloat16).astype(jnp.float32)
    w2b = (w2 * s).astype(jnp.bfloat16).astype(jnp.float32)
    dn = ("NCHW", "OIHW", "NCHW")
    y = lax.conv_general_dilated(xb, w1b, (1, 1), ((1, 1), (1, 1)),
                                 dimension_numbers=dn,
                                 precision=lax.Precision.HIGHEST)
    y = jnp.maximum(y, 0.0)
    y = y.astype(jnp.bfloat16).astype(jnp.float32)  # kernel feeds conv2 in bf16
    y2 = lax.conv_general_dilated(y, w2b, (1, 1), ((1, 1), (1, 1)),
                                  dimension_numbers=dn,
                                  precision=lax.Precision.HIGHEST)
    return jnp.maximum(y2, 0.0)


if __name__ == "__main__":
    key = jax.random.PRNGKey(0)
    k1, k2, kx = jax.random.split(key, 3)

    N, Cin, H, W = 2, 4, 16, 16
    Cmid = Cout = 32  # mid_channels defaults to out_channels

    x = jax.random.normal(kx, (N, Cin, H, W), jnp.float32)
    w1 = jax.random.normal(k1, (Cmid, Cin, 3, 3), jnp.float32) / (Cin * 9) ** 0.5
    w2 = jax.random.normal(k2, (Cout, Cmid, 3, 3), jnp.float32) / (Cmid * 9) ** 0.5

    fwd = jax.jit(double_conv_forward)
    out = jax.block_until_ready(fwd(x, w1, w2))

    assert out.shape == (N, Cout, H, W), out.shape
    assert bool(jnp.all(jnp.isfinite(out)))

    ref = jax.block_until_ready(_ref_double_conv(x, w1, w2))
    err = float(jnp.max(jnp.abs(out - ref)))
    assert err < 1e-2, f"max abs error vs reference: {err}"

    print("KERNEL_OK")
</pallas_src>

<mosaic_0001>
module attributes {stable_mosaic.version = 11 : i64} {
  func.func @_double_conv_kernel(%arg0: i32, %arg1: memref<1x360x12xbf16, #tpu.memory_space<vmem>>, %arg2: memref<3x12x32xbf16, #tpu.memory_space<vmem>>, %arg3: memref<3x96x32xbf16, #tpu.memory_space<vmem>>, %arg4: memref<1x324x32xf32, #tpu.memory_space<vmem>>, %arg5: memref<372x32xbf16, #tpu.memory_space<vmem>>) attributes {dimension_semantics = [#tpu.dimension_semantics<parallel>], iteration_bounds = array<i64: 2>, scalar_prefetch = 0 : i64, scratch_operands = 1 : i64, tpu.core_type = #tpu.core_type<tc>, window_params = [{transform_indices = @transform_0, window_bounds = array<i64: 1, 360, 12>}, {pipeline_mode = #tpu.pipeline_mode<synchronous>, transform_indices = @transform_1, window_bounds = array<i64: 3, 12, 32>}, {pipeline_mode = #tpu.pipeline_mode<synchronous>, transform_indices = @transform_2, window_bounds = array<i64: 3, 96, 32>}, {transform_indices = @transform_3, window_bounds = array<i64: 1, 324, 32>}]} {
    %cst = arith.constant 0.000000e+00 : bf16
    %0 = vector.broadcast %cst : bf16 to vector<24x32xbf16>
    %c0 = arith.constant 0 : index
    %c0_0 = arith.constant 0 : index
    %1 = vector.load %arg5[%c0, %c0_0] : memref<372x32xbf16, #tpu.memory_space<vmem>>, vector<24x32xbf16>
    tpu.vector_store %arg5[%c0, %c0_0], %0 {strides = array<i32>} : memref<372x32xbf16, #tpu.memory_space<vmem>>, vector<24x32xbf16>,
    %cst_1 = arith.constant 0.000000e+00 : bf16
    %2 = vector.broadcast %cst_1 : bf16 to vector<24x32xbf16>
    %c348 = arith.constant 348 : index
    %c0_2 = arith.constant 0 : index
    %3 = vector.load %arg5[%c348, %c0_2] : memref<372x32xbf16, #tpu.memory_space<vmem>>, vector<24x32xbf16>
    tpu.vector_store %arg5[%c348, %c0_2], %2 {strides = array<i32>} : memref<372x32xbf16, #tpu.memory_space<vmem>>, vector<24x32xbf16>,
    %c0_3 = arith.constant 0 : index
    %c0_4 = arith.constant 0 : index
    %c0_5 = arith.constant 0 : index
    %4 = vector.load %arg1[%c0_3, %c0_4, %c0_5] : memref<1x360x12xbf16, #tpu.memory_space<vmem>>, vector<1x128x12xbf16>
    %5 = vector.shape_cast %4 : vector<1x128x12xbf16> to vector<128x12xbf16>
    %c0_6 = arith.constant 0 : index
    %c0_7 = arith.constant 0 : index
    %c0_8 = arith.constant 0 : index
    %6 = vector.load %arg2[%c0_6, %c0_7, %c0_8] : memref<3x12x32xbf16, #tpu.memory_space<vmem>>, vector<1x12x32xbf16>
    %7 = vector.shape_cast %6 : vector<1x12x32xbf16> to vector<12x32xbf16>
    %cst_9 = arith.constant dense<0.000000e+00> : vector<128x32xf32>
    %8 = tpu.matmul %5, %7, %cst_9 {dimension_numbers = #tpu.dot_dimension_numbers<[1], [0], [0], [1], [0, 0, 1, 1], [], []>} : vector<128x12xbf16>, vector<12x32xbf16>, vector<128x32xf32> -> vector<128x32xf32>
    %c0_10 = arith.constant 0 : index
    %c18 = arith.constant 18 : index
    %c0_11 = arith.constant 0 : index
    %9 = vector.load %arg1[%c0_10, %c18, %c0_11] : memref<1x360x12xbf16, #tpu.memory_space<vmem>>, vector<1x128x12xbf16>
    %10 = vector.shape_cast %9 : vector<1x128x12xbf16> to vector<128x12xbf16>
    %c1 = arith.constant 1 : index
    %c0_12 = arith.constant 0 : index
    %c0_13 = arith.constant 0 : index
    %11 = vector.load %arg2[%c1, %c0_12, %c0_13] : memref<3x12x32xbf16, #tpu.memory_space<vmem>>, vector<1x12x32xbf16>
    %12 = vector.shape_cast %11 : vector<1x12x32xbf16> to vector<12x32xbf16>
    %cst_14 = arith.constant dense<0.000000e+00> : vector<128x32xf32>
    %13 = tpu.matmul %10, %12, %cst_14 {dimension_numbers = #tpu.dot_dimension_numbers<[1], [0], [0], [1], [0, 0, 1, 1], [], []>} : vector<128x12xbf16>, vector<12x32xbf16>, vector<128x32xf32> -> vector<128x32xf32>
    %14 = arith.addf %8, %13 : vector<128x32xf32>
    %c0_15 = arith.constant 0 : index
    %c36 = arith.constant 36 : index
    %c0_16 = arith.constant 0 : index
    %15 = vector.load %arg1[%c0_15, %c36, %c0_16] : memref<1x360x12xbf16, #tpu.memory_space<vmem>>, vector<1x128x12xbf16>
    %16 = vector.shape_cast %15 : vector<1x128x12xbf16> to vector<128x12xbf16>
    %c2 = arith.constant 2 : index
    %c0_17 = arith.constant 0 : index
    %c0_18 = arith.constant 0 : index
    %17 = vector.load %arg2[%c2, %c0_17, %c0_18] : memref<3x12x32xbf16, #tpu.memory_space<vmem>>, vector<1x12x32xbf16>
    %18 = vector.shape_cast %17 : vector<1x12x32xbf16> to vector<12x32xbf16>
    %cst_19 = arith.constant dense<0.000000e+00> : vector<128x32xf32>
    %19 = tpu.matmul %16, %18, %cst_19 {dimension_numbers = #tpu.dot_dimension_numbers<[1], [0], [0], [1], [0, 0, 1, 1], [], []>} : vector<128x12xbf16>, vector<12x32xbf16>, vector<128x32xf32> -> vector<128x32xf32>
    %20 = arith.addf %14, %19 : vector<128x32xf32>
    %21 = tpu.iota {dimensions = array<i32: 0>} : vector<128x32xi32>
    %22 = arith.sitofp %21 : vector<128x32xi32> to vector<128x32xf32>
    %cst_20 = arith.constant 0.000000e+00 : f32
    %23 = vector.broadcast %cst_20 : f32 to vector<128x32xf32>
    %24 = arith.addf %22, %23 : vector<128x32xf32>
    %cst_21 = arith.constant 5.000000e-01 : f32
    %25 = vector.broadcast %cst_21 : f32 to vector<128x32xf32>
    %26 = arith.addf %24, %25 : vector<128x32xf32>
    %cst_22 = arith.constant 0.055555556 : f32
    %27 = vector.broadcast %cst_22 : f32 to vector<128x32xf32>
    %28 = arith.mulf %26, %27 : vector<128x32xf32>
    %29 = math.floor %28 : vector<128x32xf32>
    %cst_23 = arith.constant 1.800000e+01 : f32
    %30 = vector.broadcast %cst_23 : f32 to vector<128x32xf32>
    %31 = arith.mulf %29, %30 : vector<128x32xf32>
    %32 = arith.subf %24, %31 : vector<128x32xf32>
    %cst_24 = arith.constant 1.000000e+00 : f32
    %33 = vector.broadcast %cst_24 : f32 to vector<128x32xf32>
    %34 = arith.cmpf oge, %29, %33 : vector<128x32xf32>
    %cst_25 = arith.constant 1.600000e+01 : f32
    %35 = vector.broadcast %cst_25 : f32 to vector<128x32xf32>
    %36 = arith.cmpf ole, %29, %35 : vector<128x32xf32>
    %37 = arith.andi %34, %36 : vector<128x32xi1>
    %cst_26 = arith.constant 1.000000e+00 : f32
    %38 = vector.broadcast %cst_26 : f32 to vector<128x32xf32>
    %39 = arith.cmpf oge, %32, %38 : vector<128x32xf32>
    %40 = arith.andi %37, %39 : vector<128x32xi1>
    %cst_27 = arith.constant 1.600000e+01 : f32
    %41 = vector.broadcast %cst_27 : f32 to vector<128x32xf32>
    %42 = arith.cmpf ole, %32, %41 : vector<128x32xf32>
    %43 = arith.andi %40, %42 : vector<128x32xi1>
    %cst_28 = arith.constant 0.000000e+00 : f32
    %44 = vector.broadcast %cst_28 : f32 to vector<128x32xf32>
    %45 = arith.maximumf %20, %44 : vector<128x32xf32>
    %cst_29 = arith.constant 0.000000e+00 : f32
    %46 = vector.broadcast %cst_29 : f32 to vector<128x32xf32>
    %47 = arith.select %43, %45, %46 : vector<128x32xi1>, vector<128x32xf32>
    %48 = arith.truncf %47 : vector<128x32xf32> to vector<128x32xbf16>
    %c24 = arith.constant 24 : index
    %c0_30 = arith.constant 0 : index
    %49 = vector.load %arg5[%c24, %c0_30] : memref<372x32xbf16, #tpu.memory_space<vmem>>, vector<128x32xbf16>
    tpu.vector_store %arg5[%c24, %c0_30], %48 {strides = array<i32>} : memref<372x32xbf16, #tpu.memory_space<vmem>>, vector<128x32xbf16>,
    %c0_31 = arith.constant 0 : index
    %c128 = arith.constant 128 : index
    %c0_32 = arith.constant 0 : index
    %50 = vector.load %arg1[%c0_31, %c128, %c0_32] : memref<1x360x12xbf16, #tpu.memory_space<vmem>>, vector<1x128x12xbf16>
    %51 = vector.shape_cast %50 : vector<1x128x12xbf16> to vector<128x12xbf16>
    %c0_33 = arith.constant 0 : index
    %c0_34 = arith.constant 0 : index
    %c0_35 = arith.constant 0 : index
    %52 = vector.load %arg2[%c0_33, %c0_34, %c0_35] : memref<3x12x32xbf16, #tpu.memory_space<vmem>>, vector<1x12x32xbf16>
    %53 = vector.shape_cast %52 : vector<1x12x32xbf16> to vector<12x32xbf16>
    %cst_36 = arith.constant dense<0.000000e+00> : vector<128x32xf32>
    %54 = tpu.matmul %51, %53, %cst_36 {dimension_numbers = #tpu.dot_dimension_numbers<[1], [0], [0], [1], [0, 0, 1, 1], [], []>} : vector<128x12xbf16>, vector<12x32xbf16>, vector<128x32xf32> -> vector<128x32xf32>
    %c0_37 = arith.constant 0 : index
    %c146 = arith.constant 146 : index
    %c0_38 = arith.constant 0 : index
    %55 = vector.load %arg1[%c0_37, %c146, %c0_38] : memref<1x360x12xbf16, #tpu.memory_space<vmem>>, vector<1x128x12xbf16>
    %56 = vector.shape_cast %55 : vector<1x128x12xbf16> to vector<128x12xbf16>
    %c1_39 = arith.constant 1 : index
    %c0_40 = arith.constant 0 : index
    %c0_41 = arith.constant 0 : index
    %57 = vector.load %arg2[%c1_39, %c0_40, %c0_41] : memref<3x12x32xbf16, #tpu.memory_space<vmem>>, vector<1x12x32xbf16>
    %58 = vector.shape_cast %57 : vector<1x12x32xbf16> to vector<12x32xbf16>
    %cst_42 = arith.constant dense<0.000000e+00> : vector<128x32xf32>
    %59 = tpu.matmul %56, %58, %cst_42 {dimension_numbers = #tpu.dot_dimension_numbers<[1], [0], [0], [1], [0, 0, 1, 1], [], []>} : vector<128x12xbf16>, vector<12x32xbf16>, vector<128x32xf32> -> vector<128x32xf32>
    %60 = arith.addf %54, %59 : vector<128x32xf32>
    %c0_43 = arith.constant 0 : index
    %c164 = arith.constant 164 : index
    %c0_44 = arith.constant 0 : index
    %61 = vector.load %arg1[%c0_43, %c164, %c0_44] : memref<1x360x12xbf16, #tpu.memory_space<vmem>>, vector<1x128x12xbf16>
    %62 = vector.shape_cast %61 : vector<1x128x12xbf16> to vector<128x12xbf16>
    %c2_45 = arith.constant 2 : index
    %c0_46 = arith.constant 0 : index
    %c0_47 = arith.constant 0 : index
    %63 = vector.load %arg2[%c2_45, %c0_46, %c0_47] : memref<3x12x32xbf16, #tpu.memory_space<vmem>>, vector<1x12x32xbf16>
    %64 = vector.shape_cast %63 : vector<1x12x32xbf16> to vector<12x32xbf16>
    %cst_48 = arith.constant dense<0.000000e+00> : vector<128x32xf32>
    %65 = tpu.matmul %62, %64, %cst_48 {dimension_numbers = #tpu.dot_dimension_numbers<[1], [0], [0], [1], [0, 0, 1, 1], [], []>} : vector<128x12xbf16>, vector<12x32xbf16>, vector<128x32xf32> -> vector<128x32xf32>
    %66 = arith.addf %60, %65 : vector<128x32xf32>
    %67 = tpu.iota {dimensions = array<i32: 0>} : vector<128x32xi32>
    %68 = arith.sitofp %67 : vector<128x32xi32> to vector<128x32xf32>
    %cst_49 = arith.constant 1.280000e+02 : f32
    %69 = vector.broadcast %cst_49 : f32 to vector<128x32xf32>
    %70 = arith.addf %68, %69 : vector<128x32xf32>
    %cst_50 = arith.constant 5.000000e-01 : f32
    %71 = vector.broadcast %cst_50 : f32 to vector<128x32xf32>
    %72 = arith.addf %70, %71 : vector<128x32xf32>
    %cst_51 = arith.constant 0.055555556 : f32
    %73 = vector.broadcast %cst_51 : f32 to vector<128x32xf32>
    %74 = arith.mulf %72, %73 : vector<128x32xf32>
    %75 = math.floor %74 : vector<128x32xf32>
    %cst_52 = arith.constant 1.800000e+01 : f32
    %76 = vector.broadcast %cst_52 : f32 to vector<128x32xf32>
    %77 = arith.mulf %75, %76 : vector<128x32xf32>
    %78 = arith.subf %70, %77 : vector<128x32xf32>
    %cst_53 = arith.constant 1.000000e+00 : f32
    %79 = vector.broadcast %cst_53 : f32 to vector<128x32xf32>
    %80 = arith.cmpf oge, %75, %79 : vector<128x32xf32>
    %cst_54 = arith.constant 1.600000e+01 : f32
    %81 = vector.broadcast %cst_54 : f32 to vector<128x32xf32>
    %82 = arith.cmpf ole, %75, %81 : vector<128x32xf32>
    %83 = arith.andi %80, %82 : vector<128x32xi1>
    %cst_55 = arith.constant 1.000000e+00 : f32
    %84 = vector.broadcast %cst_55 : f32 to vector<128x32xf32>
    %85 = arith.cmpf oge, %78, %84 : vector<128x32xf32>
    %86 = arith.andi %83, %85 : vector<128x32xi1>
    %cst_56 = arith.constant 1.600000e+01 : f32
    %87 = vector.broadcast %cst_56 : f32 to vector<128x32xf32>
    %88 = arith.cmpf ole, %78, %87 : vector<128x32xf32>
    %89 = arith.andi %86, %88 : vector<128x32xi1>
    %cst_57 = arith.constant 0.000000e+00 : f32
    %90 = vector.broadcast %cst_57 : f32 to vector<128x32xf32>
    %91 = arith.maximumf %66, %90 : vector<128x32xf32>
    %cst_58 = arith.constant 0.000000e+00 : f32
    %92 = vector.broadcast %cst_58 : f32 to vector<128x32xf32>
    %93 = arith.select %89, %91, %92 : vector<128x32xi1>, vector<128x32xf32>
    %94 = arith.truncf %93 : vector<128x32xf32> to vector<128x32xbf16>
    %c152 = arith.constant 152 : index
    %c0_59 = arith.constant 0 : index
    %95 = vector.load %arg5[%c152, %c0_59] : memref<372x32xbf16, #tpu.memory_space<vmem>>, vector<128x32xbf16>
    tpu.vector_store %arg5[%c152, %c0_59], %94 {strides = array<i32>} : memref<372x32xbf16, #tpu.memory_space<vmem>>, vector<128x32xbf16>,
    %c0_60 = arith.constant 0 : index
    %c256 = arith.constant 256 : index
    %c0_61 = arith.constant 0 : index
    %96 = vector.load %arg1[%c0_60, %c256, %c0_61] : memref<1x360x12xbf16, #tpu.memory_space<vmem>>, vector<1x68x12xbf16>
    %97 = vector.shape_cast %96 : vector<1x68x12xbf16> to vector<68x12xbf16>
    %c0_62 = arith.constant 0 : index
    %c0_63 = arith.constant 0 : index
    %c0_64 = arith.constant 0 : index
    %98 = vector.load %arg2[%c0_62, %c0_63, %c0_64] : memref<3x12x32xbf16, #tpu.memory_space<vmem>>, vector<1x12x32xbf16>
    %99 = vector.shape_cast %98 : vector<1x12x32xbf16> to vector<12x32xbf16>
    %cst_65 = arith.constant dense<0.000000e+00> : vector<68x32xf32>
    %100 = tpu.matmul %97, %99, %cst_65 {dimension_numbers = #tpu.dot_dimension_numbers<[1], [0], [0], [1], [0, 0, 1, 1], [], []>} : vector<68x12xbf16>, vector<12x32xbf16>, vector<68x32xf32> -> vector<68x32xf32>
    %c0_66 = arith.constant 0 : index
    %c274 = arith.constant 274 : index
    %c0_67 = arith.constant 0 : index
    %101 = vector.load %arg1[%c0_66, %c274, %c0_67] : memref<1x360x12xbf16, #tpu.memory_space<vmem>>, vector<1x68x12xbf16>
    %102 = vector.shape_cast %101 : vector<1x68x12xbf16> to vector<68x12xbf16>
    %c1_68 = arith.constant 1 : index
    %c0_69 = arith.constant 0 : index
    %c0_70 = arith.constant 0 : index
    %103 = vector.load %arg2[%c1_68, %c0_69, %c0_70] : memref<3x12x32xbf16, #tpu.memory_space<vmem>>, vector<1x12x32xbf16>
    %104 = vector.shape_cast %103 : vector<1x12x32xbf16> to vector<12x32xbf16>
    %cst_71 = arith.constant dense<0.000000e+00> : vector<68x32xf32>
    %105 = tpu.matmul %102, %104, %cst_71 {dimension_numbers = #tpu.dot_dimension_numbers<[1], [0], [0], [1], [0, 0, 1, 1], [], []>} : vector<68x12xbf16>, vector<12x32xbf16>, vector<68x32xf32> -> vector<68x32xf32>
    %106 = arith.addf %100, %105 : vector<68x32xf32>
    %c0_72 = arith.constant 0 : index
    %c292 = arith.constant 292 : index
    %c0_73 = arith.constant 0 : index
    %107 = vector.load %arg1[%c0_72, %c292, %c0_73] : memref<1x360x12xbf16, #tpu.memory_space<vmem>>, vector<1x68x12xbf16>
    %108 = vector.shape_cast %107 : vector<1x68x12xbf16> to vector<68x12xbf16>
    %c2_74 = arith.constant 2 : index
    %c0_75 = arith.constant 0 : index
    %c0_76 = arith.constant 0 : index
    %109 = vector.load %arg2[%c2_74, %c0_75, %c0_76] : memref<3x12x32xbf16, #tpu.memory_space<vmem>>, vector<1x12x32xbf16>
    %110 = vector.shape_cast %109 : vector<1x12x32xbf16> to vector<12x32xbf16>
    %cst_77 = arith.constant dense<0.000000e+00> : vector<68x32xf32>
    %111 = tpu.matmul %108, %110, %cst_77 {dimension_numbers = #tpu.dot_dimension_numbers<[1], [0], [0], [1], [0, 0, 1, 1], [], []>} : vector<68x12xbf16>, vector<12x32xbf16>, vector<68x32xf32> -> vector<68x32xf32>
    %112 = arith.addf %106, %111 : vector<68x32xf32>
    %113 = tpu.iota {dimensions = array<i32: 0>} : vector<68x32xi32>
    %114 = arith.sitofp %113 : vector<68x32xi32> to vector<68x32xf32>
    %cst_78 = arith.constant 2.560000e+02 : f32
    %115 = vector.broadcast %cst_78 : f32 to vector<68x32xf32>
    %116 = arith.addf %114, %115 : vector<68x32xf32>
    %cst_79 = arith.constant 5.000000e-01 : f32
    %117 = vector.broadcast %cst_79 : f32 to vector<68x32xf32>
    %118 = arith.addf %116, %117 : vector<68x32xf32>
    %cst_80 = arith.constant 0.055555556 : f32
    %119 = vector.broadcast %cst_80 : f32 to vector<68x32xf32>
    %120 = arith.mulf %118, %119 : vector<68x32xf32>
    %121 = math.floor %120 : vector<68x32xf32>
    %cst_81 = arith.constant 1.800000e+01 : f32
    %122 = vector.broadcast %cst_81 : f32 to vector<68x32xf32>
    %123 = arith.mulf %121, %122 : vector<68x32xf32>
    %124 = arith.subf %116, %123 : vector<68x32xf32>
    %cst_82 = arith.constant 1.000000e+00 : f32
    %125 = vector.broadcast %cst_82 : f32 to vector<68x32xf32>
    %126 = arith.cmpf oge, %121, %125 : vector<68x32xf32>
    %cst_83 = arith.constant 1.600000e+01 : f32
    %127 = vector.broadcast %cst_83 : f32 to vector<68x32xf32>
    %128 = arith.cmpf ole, %121, %127 : vector<68x32xf32>
    %129 = arith.andi %126, %128 : vector<68x32xi1>
    %cst_84 = arith.constant 1.000000e+00 : f32
    %130 = vector.broadcast %cst_84 : f32 to vector<68x32xf32>
    %131 = arith.cmpf oge, %124, %130 : vector<68x32xf32>
    %132 = arith.andi %129, %131 : vector<68x32xi1>
    %cst_85 = arith.constant 1.600000e+01 : f32
    %133 = vector.broadcast %cst_85 : f32 to vector<68x32xf32>
    %134 = arith.cmpf ole, %124, %133 : vector<68x32xf32>
    %135 = arith.andi %132, %134 : vector<68x32xi1>
    %cst_86 = arith.constant 0.000000e+00 : f32
    %136 = vector.broadcast %cst_86 : f32 to vector<68x32xf32>
    %137 = arith.maximumf %112, %136 : vector<68x32xf32>
    %cst_87 = arith.constant 0.000000e+00 : f32
    %138 = vector.broadcast %cst_87 : f32 to vector<68x32xf32>
    %139 = arith.select %135, %137, %138 : vector<68x32xi1>, vector<68x32xf32>
    %140 = arith.truncf %139 : vector<68x32xf32> to vector<68x32xbf16>
    %c280 = arith.constant 280 : index
    %c0_88 = arith.constant 0 : index
    %141 = vector.load %arg5[%c280, %c0_88] : memref<372x32xbf16, #tpu.memory_space<vmem>>, vector<68x32xbf16>
    tpu.vector_store %arg5[%c280, %c0_88], %140 {strides = array<i32>} : memref<372x32xbf16, #tpu.memory_space<vmem>>, vector<68x32xbf16>,
    %c5 = arith.constant 5 : index
    %c0_89 = arith.constant 0 : index
    %142 = vector.load %arg5[%c5, %c0_89] : memref<372x32xbf16, #tpu.memory_space<vmem>>, vector<128x32xbf16>
    %c6 = arith.constant 6 : index
    %c0_90 = arith.constant 0 : index
    %143 = vector.load %arg5[%c6, %c0_90] : memref<372x32xbf16, #tpu.memory_space<vmem>>, vector<128x32xbf16>
    %c7 = arith.constant 7 : index
    %c0_91 = arith.constant 0 : index
    %144 = vector.load %arg5[%c7, %c0_91] : memref<372x32xbf16, #tpu.memory_space<vmem>>, vector<128x32xbf16>
    %145 = tpu.concatenate %142, %143, %144 in 1 : vector<128x32xbf16>, vector<128x32xbf16>, vector<128x32xbf16> -> vector<128x96xbf16>
    %c0_92 = arith.constant 0 : index
    %c0_93 = arith.constant 0 : index
    %c0_94 = arith.constant 0 : index
    %146 = vector.load %arg3[%c0_92, %c0_93, %c0_94] : memref<3x96x32xbf16, #tpu.memory_space<vmem>>, vector<1x96x32xbf16>
    %147 = vector.shape_cast %146 : vector<1x96x32xbf16> to vector<96x32xbf16>
    %cst_95 = arith.constant dense<0.000000e+00> : vector<128x32xf32>
    %148 = tpu.matmul %145, %147, %cst_95 {dimension_numbers = #tpu.dot_dimension_numbers<[1], [0], [0], [1], [0, 0, 1, 1], [], []>} : vector<128x96xbf16>, vector<96x32xbf16>, vector<128x32xf32> -> vector<128x32xf32>
    %c23 = arith.constant 23 : index
    %c0_96 = arith.constant 0 : index
    %149 = vector.load %arg5[%c23, %c0_96] : memref<372x32xbf16, #tpu.memory_space<vmem>>, vector<128x32xbf16>
    %c24_97 = arith.constant 24 : index
    %c0_98 = arith.constant 0 : index
    %150 = vector.load %arg5[%c24_97, %c0_98] : memref<372x32xbf16, #tpu.memory_space<vmem>>, vector<128x32xbf16>
    %c25 = arith.constant 25 : index
    %c0_99 = arith.constant 0 : index
    %151 = vector.load %arg5[%c25, %c0_99] : memref<372x32xbf16, #tpu.memory_space<vmem>>, vector<128x32xbf16>
    %152 = tpu.concatenate %149, %150, %151 in 1 : vector<128x32xbf16>, vector<128x32xbf16>, vector<128x32xbf16> -> vector<128x96xbf16>
    %c1_100 = arith.constant 1 : index
    %c0_101 = arith.constant 0 : index
    %c0_102 = arith.constant 0 : index
    %153 = vector.load %arg3[%c1_100, %c0_101, %c0_102] : memref<3x96x32xbf16, #tpu.memory_space<vmem>>, vector<1x96x32xbf16>
    %154 = vector.shape_cast %153 : vector<1x96x32xbf16> to vector<96x32xbf16>
    %cst_103 = arith.constant dense<0.000000e+00> : vector<128x32xf32>
    %155 = tpu.matmul %152, %154, %cst_103 {dimension_numbers = #tpu.dot_dimension_numbers<[1], [0], [0], [1], [0, 0, 1, 1], [], []>} : vector<128x96xbf16>, vector<96x32xbf16>, vector<128x32xf32> -> vector<128x32xf32>
    %156 = arith.addf %148, %155 : vector<128x32xf32>
    %c41 = arith.constant 41 : index
    %c0_104 = arith.constant 0 : index
    %157 = vector.load %arg5[%c41, %c0_104] : memref<372x32xbf16, #tpu.memory_space<vmem>>, vector<128x32xbf16>
    %c42 = arith.constant 42 : index
    %c0_105 = arith.constant 0 : index
    %158 = vector.load %arg5[%c42, %c0_105] : memref<372x32xbf16, #tpu.memory_space<vmem>>, vector<128x32xbf16>
    %c43 = arith.constant 43 : index
    %c0_106 = arith.constant 0 : index
    %159 = vector.load %arg5[%c43, %c0_106] : memref<372x32xbf16, #tpu.memory_space<vmem>>, vector<128x32xbf16>
    %160 = tpu.concatenate %157, %158, %159 in 1 : vector<128x32xbf16>, vector<128x32xbf16>, vector<128x32xbf16> -> vector<128x96xbf16>
    %c2_107 = arith.constant 2 : index
    %c0_108 = arith.constant 0 : index
    %c0_109 = arith.constant 0 : index
    %161 = vector.load %arg3[%c2_107, %c0_108, %c0_109] : memref<3x96x32xbf16, #tpu.memory_space<vmem>>, vector<1x96x32xbf16>
    %162 = vector.shape_cast %161 : vector<1x96x32xbf16> to vector<96x32xbf16>
    %cst_110 = arith.constant dense<0.000000e+00> : vector<128x32xf32>
    %163 = tpu.matmul %160, %162, %cst_110 {dimension_numbers = #tpu.dot_dimension_numbers<[1], [0], [0], [1], [0, 0, 1, 1], [], []>} : vector<128x96xbf16>, vector<96x32xbf16>, vector<128x32xf32> -> vector<128x32xf32>
    %164 = arith.addf %156, %163 : vector<128x32xf32>
    %cst_111 = arith.constant 0.000000e+00 : f32
    %165 = vector.broadcast %cst_111 : f32 to vector<128x32xf32>
    %166 = arith.maximumf %164, %165 : vector<128x32xf32>
    %c0_112 = arith.constant 0 : index
    %c0_113 = arith.constant 0 : index
    %c0_114 = arith.constant 0 : index
    %167 = vector.load %arg4[%c0_112, %c0_113, %c0_114] : memref<1x324x32xf32, #tpu.memory_space<vmem>>, vector<1x128x32xf32>
    %168 = vector.shape_cast %167 : vector<1x128x32xf32> to vector<128x32xf32>
    %169 = vector.shape_cast %166 : vector<128x32xf32> to vector<1x128x32xf32>
    tpu.vector_store %arg4[%c0_112, %c0_113, %c0_114], %169 {strides = array<i32>} : memref<1x324x32xf32, #tpu.memory_space<vmem>>, vector<1x128x32xf32>,
    %c133 = arith.constant 133 : index
    %c0_115 = arith.constant 0 : index
    %170 = vector.load %arg5[%c133, %c0_115] : memref<372x32xbf16, #tpu.memory_space<vmem>>, vector<128x32xbf16>
    %c134 = arith.constant 134 : index
    %c0_116 = arith.constant 0 : index
    %171 = vector.load %arg5[%c134, %c0_116] : memref<372x32xbf16, #tpu.memory_space<vmem>>, vector<128x32xbf16>
    %c135 = arith.constant 135 : index
    %c0_117 = arith.constant 0 : index
    %172 = vector.load %arg5[%c135, %c0_117] : memref<372x32xbf16, #tpu.memory_space<vmem>>, vector<128x32xbf16>
    %173 = tpu.concatenate %170, %171, %172 in 1 : vector<128x32xbf16>, vector<128x32xbf16>, vector<128x32xbf16> -> vector<128x96xbf16>
    %c0_118 = arith.constant 0 : index
    %c0_119 = arith.constant 0 : index
    %c0_120 = arith.constant 0 : index
    %174 = vector.load %arg3[%c0_118, %c0_119, %c0_120] : memref<3x96x32xbf16, #tpu.memory_space<vmem>>, vector<1x96x32xbf16>
    %175 = vector.shape_cast %174 : vector<1x96x32xbf16> to vector<96x32xbf16>
    %cst_121 = arith.constant dense<0.000000e+00> : vector<128x32xf32>
    %176 = tpu.matmul %173, %175, %cst_121 {dimension_numbers = #tpu.dot_dimension_numbers<[1], [0], [0], [1], [0, 0, 1, 1], [], []>} : vector<128x96xbf16>, vector<96x32xbf16>, vector<128x32xf32> -> vector<128x32xf32>
    %c151 = arith.constant 151 : index
    %c0_122 = arith.constant 0 : index
    %177 = vector.load %arg5[%c151, %c0_122] : memref<372x32xbf16, #tpu.memory_space<vmem>>, vector<128x32xbf16>
    %c152_123 = arith.constant 152 : index
    %c0_124 = arith.constant 0 : index
    %178 = vector.load %arg5[%c152_123, %c0_124] : memref<372x32xbf16, #tpu.memory_space<vmem>>, vector<128x32xbf16>
    %c153 = arith.constant 153 : index
    %c0_125 = arith.constant 0 : index
    %179 = vector.load %arg5[%c153, %c0_125] : memref<372x32xbf16, #tpu.memory_space<vmem>>, vector<128x32xbf16>
    %180 = tpu.concatenate %177, %178, %179 in 1 : vector<128x32xbf16>, vector<128x32xbf16>, vector<128x32xbf16> -> vector<128x96xbf16>
    %c1_126 = arith.constant 1 : index
    %c0_127 = arith.constant 0 : index
    %c0_128 = arith.constant 0 : index
    %181 = vector.load %arg3[%c1_126, %c0_127, %c0_128] : memref<3x96x32xbf16, #tpu.memory_space<vmem>>, vector<1x96x32xbf16>
    %182 = vector.shape_cast %181 : vector<1x96x32xbf16> to vector<96x32xbf16>
    %cst_129 = arith.constant dense<0.000000e+00> : vector<128x32xf32>
    %183 = tpu.matmul %180, %182, %cst_129 {dimension_numbers = #tpu.dot_dimension_numbers<[1], [0], [0], [1], [0, 0, 1, 1], [], []>} : vector<128x96xbf16>, vector<96x32xbf16>, vector<128x32xf32> -> vector<128x32xf32>
    %184 = arith.addf %176, %183 : vector<128x32xf32>
    %c169 = arith.constant 169 : index
    %c0_130 = arith.constant 0 : index
    %185 = vector.load %arg5[%c169, %c0_130] : memref<372x32xbf16, #tpu.memory_space<vmem>>, vector<128x32xbf16>
    %c170 = arith.constant 170 : index
    %c0_131 = arith.constant 0 : index
    %186 = vector.load %arg5[%c170, %c0_131] : memref<372x32xbf16, #tpu.memory_space<vmem>>, vector<128x32xbf16>
    %c171 = arith.constant 171 : index
    %c0_132 = arith.constant 0 : index
    %187 = vector.load %arg5[%c171, %c0_132] : memref<372x32xbf16, #tpu.memory_space<vmem>>, vector<128x32xbf16>
    %188 = tpu.concatenate %185, %186, %187 in 1 : vector<128x32xbf16>, vector<128x32xbf16>, vector<128x32xbf16> -> vector<128x96xbf16>
    %c2_133 = arith.constant 2 : index
    %c0_134 = arith.constant 0 : index
    %c0_135 = arith.constant 0 : index
    %189 = vector.load %arg3[%c2_133, %c0_134, %c0_135] : memref<3x96x32xbf16, #tpu.memory_space<vmem>>, vector<1x96x32xbf16>
    %190 = vector.shape_cast %189 : vector<1x96x32xbf16> to vector<96x32xbf16>
    %cst_136 = arith.constant dense<0.000000e+00> : vector<128x32xf32>
    %191 = tpu.matmul %188, %190, %cst_136 {dimension_numbers = #tpu.dot_dimension_numbers<[1], [0], [0], [1], [0, 0, 1, 1], [], []>} : vector<128x96xbf16>, vector<96x32xbf16>, vector<128x32xf32> -> vector<128x32xf32>
    %192 = arith.addf %184, %191 : vector<128x32xf32>
    %cst_137 = arith.constant 0.000000e+00 : f32
    %193 = vector.broadcast %cst_137 : f32 to vector<128x32xf32>
    %194 = arith.maximumf %192, %193 : vector<128x32xf32>
    %c0_138 = arith.constant 0 : index
    %c128_139 = arith.constant 128 : index
    %c0_140 = arith.constant 0 : index
    %195 = vector.load %arg4[%c0_138, %c128_139, %c0_140] : memref<1x324x32xf32, #tpu.memory_space<vmem>>, vector<1x128x32xf32>
    %196 = vector.shape_cast %195 : vector<1x128x32xf32> to vector<128x32xf32>
    %197 = vector.shape_cast %194 : vector<128x32xf32> to vector<1x128x32xf32>
    tpu.vector_store %arg4[%c0_138, %c128_139, %c0_140], %197 {strides = array<i32>} : memref<1x324x32xf32, #tpu.memory_space<vmem>>, vector<1x128x32xf32>,
    %c261 = arith.constant 261 : index
    %c0_141 = arith.constant 0 : index
    %198 = vector.load %arg5[%c261, %c0_141] : memref<372x32xbf16, #tpu.memory_space<vmem>>, vector<68x32xbf16>
    %c262 = arith.constant 262 : index
    %c0_142 = arith.constant 0 : index
    %199 = vector.load %arg5[%c262, %c0_142] : memref<372x32xbf16, #tpu.memory_space<vmem>>, vector<68x32xbf16>
    %c263 = arith.constant 263 : index
    %c0_143 = arith.constant 0 : index
    %200 = vector.load %arg5[%c263, %c0_143] : memref<372x32xbf16, #tpu.memory_space<vmem>>, vector<68x32xbf16>
    %201 = tpu.concatenate %198, %199, %200 in 1 : vector<68x32xbf16>, vector<68x32xbf16>, vector<68x32xbf16> -> vector<68x96xbf16>
    %c0_144 = arith.constant 0 : index
    %c0_145 = arith.constant 0 : index
    %c0_146 = arith.constant 0 : index
    %202 = vector.load %arg3[%c0_144, %c0_145, %c0_146] : memref<3x96x32xbf16, #tpu.memory_space<vmem>>, vector<1x96x32xbf16>
    %203 = vector.shape_cast %202 : vector<1x96x32xbf16> to vector<96x32xbf16>
    %cst_147 = arith.constant dense<0.000000e+00> : vector<68x32xf32>
    %204 = tpu.matmul %201, %203, %cst_147 {dimension_numbers = #tpu.dot_dimension_numbers<[1], [0], [0], [1], [0, 0, 1, 1], [], []>} : vector<68x96xbf16>, vector<96x32xbf16>, vector<68x32xf32> -> vector<68x32xf32>
    %c279 = arith.constant 279 : index
    %c0_148 = arith.constant 0 : index
    %205 = vector.load %arg5[%c279, %c0_148] : memref<372x32xbf16, #tpu.memory_space<vmem>>, vector<68x32xbf16>
    %c280_149 = arith.constant 280 : index
    %c0_150 = arith.constant 0 : index
    %206 = vector.load %arg5[%c280_149, %c0_150] : memref<372x32xbf16, #tpu.memory_space<vmem>>, vector<68x32xbf16>
    %c281 = arith.constant 281 : index
    %c0_151 = arith.constant 0 : index
    %207 = vector.load %arg5[%c281, %c0_151] : memref<372x32xbf16, #tpu.memory_space<vmem>>, vector<68x32xbf16>
    %208 = tpu.concatenate %205, %206, %207 in 1 : vector<68x32xbf16>, vector<68x32xbf16>, vector<68x32xbf16> -> vector<68x96xbf16>
    %c1_152 = arith.constant 1 : index
    %c0_153 = arith.constant 0 : index
    %c0_154 = arith.constant 0 : index
    %209 = vector.load %arg3[%c1_152, %c0_153, %c0_154] : memref<3x96x32xbf16, #tpu.memory_space<vmem>>, vector<1x96x32xbf16>
    %210 = vector.shape_cast %209 : vector<1x96x32xbf16> to vector<96x32xbf16>
    %cst_155 = arith.constant dense<0.000000e+00> : vector<68x32xf32>
    %211 = tpu.matmul %208, %210, %cst_155 {dimension_numbers = #tpu.dot_dimension_numbers<[1], [0], [0], [1], [0, 0, 1, 1], [], []>} : vector<68x96xbf16>, vector<96x32xbf16>, vector<68x32xf32> -> vector<68x32xf32>
    %212 = arith.addf %204, %211 : vector<68x32xf32>
    %c297 = arith.constant 297 : index
    %c0_156 = arith.constant 0 : index
    %213 = vector.load %arg5[%c297, %c0_156] : memref<372x32xbf16, #tpu.memory_space<vmem>>, vector<68x32xbf16>
    %c298 = arith.constant 298 : index
    %c0_157 = arith.constant 0 : index
    %214 = vector.load %arg5[%c298, %c0_157] : memref<372x32xbf16, #tpu.memory_space<vmem>>, vector<68x32xbf16>
    %c299 = arith.constant 299 : index
    %c0_158 = arith.constant 0 : index
    %215 = vector.load %arg5[%c299, %c0_158] : memref<372x32xbf16, #tpu.memory_space<vmem>>, vector<68x32xbf16>
    %216 = tpu.concatenate %213, %214, %215 in 1 : vector<68x32xbf16>, vector<68x32xbf16>, vector<68x32xbf16> -> vector<68x96xbf16>
    %c2_159 = arith.constant 2 : index
    %c0_160 = arith.constant 0 : index
    %c0_161 = arith.constant 0 : index
    %217 = vector.load %arg3[%c2_159, %c0_160, %c0_161] : memref<3x96x32xbf16, #tpu.memory_space<vmem>>, vector<1x96x32xbf16>
    %218 = vector.shape_cast %217 : vector<1x96x32xbf16> to vector<96x32xbf16>
    %cst_162 = arith.constant dense<0.000000e+00> : vector<68x32xf32>
    %219 = tpu.matmul %216, %218, %cst_162 {dimension_numbers = #tpu.dot_dimension_numbers<[1], [0], [0], [1], [0, 0, 1, 1], [], []>} : vector<68x96xbf16>, vector<96x32xbf16>, vector<68x32xf32> -> vector<68x32xf32>
    %220 = arith.addf %212, %219 : vector<68x32xf32>
    %cst_163 = arith.constant 0.000000e+00 : f32
    %221 = vector.broadcast %cst_163 : f32 to vector<68x32xf32>
    %222 = arith.maximumf %220, %221 : vector<68x32xf32>
    %c0_164 = arith.constant 0 : index
    %c256_165 = arith.constant 256 : index
    %c0_166 = arith.constant 0 : index
    %223 = vector.load %arg4[%c0_164, %c256_165, %c0_166] : memref<1x324x32xf32, #tpu.memory_space<vmem>>, vector<1x68x32xf32>
    %224 = vector.shape_cast %223 : vector<1x68x32xf32> to vector<68x32xf32>
    %225 = vector.shape_cast %222 : vector<68x32xf32> to vector<1x68x32xf32>
    tpu.vector_store %arg4[%c0_164, %c256_165, %c0_166], %225 {strides = array<i32>} : memref<1x324x32xf32, #tpu.memory_space<vmem>>, vector<1x68x32xf32>,
    return
  }
  func.func @transform_0(%arg0: i32) -> (i32, i32, i32) {
    %c0_i32 = arith.constant 0 : i32
    %c0_i32_0 = arith.constant 0 : i32
    %c0_i32_1 = arith.constant 0 : i32
    return %arg0, %c0_i32, %c0_i32_0 : i32, i32, i32
  }
  func.func @transform_1(%arg0: i32) -> (i32, i32, i32) {
    %c0_i32 = arith.constant 0 : i32
    %c0_i32_0 = arith.constant 0 : i32
    %c0_i32_1 = arith.constant 0 : i32
    %c0_i32_2 = arith.constant 0 : i32
    return %c0_i32, %c0_i32_0, %c0_i32_1 : i32, i32, i32
  }
  func.func @transform_2(%arg0: i32) -> (i32, i32, i32) {
    %c0_i32 = arith.constant 0 : i32
    %c0_i32_0 = arith.constant 0 : i32
    %c0_i32_1 = arith.constant 0 : i32
    %c0_i32_2 = arith.constant 0 : i32
    return %c0_i32, %c0_i32_0, %c0_i32_1 : i32, i32, i32
  }
  func.func @transform_3(%arg0: i32) -> (i32, i32, i32) {
    %c0_i32 = arith.constant 0 : i32
    %c0_i32_0 = arith.constant 0 : i32
    %c0_i32_1 = arith.constant 0 : i32
    return %arg0, %c0_i32, %c0_i32_0 : i32, i32, i32
  }
}

</mosaic_0001>

<bundles_post_ra>
// kernel: double_conv_forward.1
= control target key start
LH: loop header
LB: loop body
LE: loop exit
PB: predicated region body
PF: predicated region fallthrough
CT: control target
= control target key end

     0   :  { %s7786_s12 = smov 0   ;;  %s11931_s0 = inlined_call_operand.vmem [shape: bf16[2,360,12], index: 0, kind: input, shape index: {}]   ;;  %s11932_s1 = inlined_call_operand.vmem [shape: bf16[3,12,32], index: 1, kind: input, shape index: {}]   ;;  %s11933_s2 = inlined_call_operand.vmem [shape: bf16[3,96,32], index: 2, kind: input, shape index: {}]   ;;  %s11934_s3 = inlined_call_operand.vmem [shape: f32[2,324,32], index: 3, kind: output, shape index: {}]  }
   0x1 LB: > { %s6377_s13 = sadd.s32 4294967295, %s7759_s12   ;;  %p6381_p0 = scmp.ge.s32.totalorder %s7759_s12, 1  ;;  %s7759_s12 = sphi %s7786_s12, %s13_s12  }
   0x2   : > { %p137_p1 = scmp.lt.s32.totalorder %s7759_s12, 3 }
   0x4   : > { %p138_p2 = pnand %p6381_p0, %p137_p1 }
   0x6   : > { %141 = sbr.rel (%p138_p2) target bundleno = 903 (0x387), region = 32 }
   0xb   : > { %v7536_v0 = vld [vmem:[%s11932_s1 + $0x8] sm:$0x3f]   ;;  %vm298_vm0 = vcmask 1045504   ;;  %p161_p3 = scmp.lt.s32.totalorder %s6377_s13, 1  ;;  %v7542_v2 = vld [vmem:[%s11932_s1 + $0x10] sm:$0x3f]  }
   0xc   : > { %7514 = vmatprep.subr.msk.bf16.mxu0 %vm298_vm0, %v7536_v0  ;;  %7515 = vmatprep.subr.msk.bf16.mxu1 %vm298_vm0, %v7536_v0  ;;  %v300_v1 = vsel %vm298_vm0, %v7536_v0, 0  ;;  %v7545_v3 = vld [vmem:[%s11932_s1] sm:$0x3f]   ;;  %vm11947_vm1 = vcmask 1046528   ;;  %vm273_vm2 = vcmask 97280   ;;  %v647_v11 = vsel %vm298_vm0, %v7542_v2, 0 }
   0xd   : > { %7075 = vmatpush3.bf16.msra.mxu0 %v300_v1  ;;  %7513 = vmatpush3.bf16.msra.mxu1 %v300_v1  ;;  %s12629_s13 = smov (!%p161_p3, %s6377_s13), 1  ;;  %v7566_v16 = vld [vmem:[%s11932_s1] sm:$0x3f]   ;;  %v437_v21 = vsel %vm298_vm0, %v7545_v3, 0  ;;  %v7555_v23 = vld [vmem:[%s11932_s1 + $0x8] sm:$0x3f]  }
   0xe   : > { %7517 = vmatprep.subr.msk.bf16.mxu0 %vm298_vm0, %v7542_v2  ;;  %s7521_s20 = smul.u32 180, %s12629_s13  ;;  %7516 = vmatprep.subr.msk.bf16.mxu1 %vm298_vm0, %v7545_v3  ;;  %v1229_v40 = vsel %vm298_vm0, %v7555_v23, 0  ;;  %v7572_v53 = vld [vmem:[%s11932_s1 + $0x10] sm:$0x3f]   ;;  %v1366_v56 = vsel %vm298_vm0, %v7566_v16, 0  ;;  %v11935_v61 = vmov 0.0  }
   0xf   : > { %vm11943_vm3 = vmmov 0   ;;  %vm11950_vm4 = vcmask 257024   ;;  %s7764_s9 = smov 64   ;;  %s7765_s10 = smov 32  }
  0x10   : > { %s7814_s23 = scalar_lea.vmem %s11931_s0, %s7521_s20  ;;  %s7522_s25 = smul.u32 328, %s12629_s13 }
  0x11   : > { %v185_v4 = vld [vmem:[%s7814_s23 + $0xc] sm:$0xf]  ;;  %v200_v5 = vld [vmem:[%s7814_s23 + $0x8] sm:$0xe]  ;;  %v7538_v6 = vld [vmem:[%s7814_s23 + $0x10] sm:$0xff]  }
  0x12   : > { %v6386_v7 = vcombine.low %v200_v5, %v185_v4  ;;  %v252_v8 = vrot.slane %v7538_v6, 1  ;;  %v7820_v9 = vld [vmem:[%s7814_s23 + $0x38] sm:$0xff]   ;;  %v7541_v10 = vld [vmem:[%s7814_s23 + $0x40] sm:$0xff]   ;;  %v7544_v19 = vld [vmem:[%s7814_s23 + $0x48] ss:$0 sps:$4 sm:$0x11]   ;;  %s11772_s28 = scalar_lea.vmem %s11934_s3, %s7522_s25 }
  0x13   : > { %v7543_v13 = vld [vmem:[%s7814_s23 + $0x18] sm:$0xff]   ;;  %v262_v14 = vrot.slane %v7820_v9, 1  ;;  %v264_v15 = vrot.slane %v7541_v10, 1  ;;  %v7546_v22 = vld [vmem:[%s7814_s23 + $0x20] sm:$0xff]   ;;  %v266_v25 = vrot.slane %v7544_v19, 1  ;;  %v7548_v28 = vld [vmem:[%s7814_s23 + $0x28] sm:$0xff]  }
  0x14   : > { %v251_v12 = vrot.slane %v6386_v7, 1  ;;  %v254_v18 = vrot.slane %v7543_v13, 1  ;;  %v7547_v26 = vld [vmem:[%s7814_s23] sm:$0xff]   ;;  %v256_v27 = vrot.slane %v7546_v22, 1  ;;  %v7549_v30 = vld [vmem:[%s7814_s23 + $0x30] sm:$0xff]   ;;  %v258_v32 = vrot.slane %v7548_v28, 1 }
  0x15   : > { %v265_v20 = vsel %vm11947_vm1, %v262_v14, %v264_v15  ;;  %v267_v29 = vsel %vm11947_vm1, %v264_v15, %v266_v25  ;;  %v184_v33 = vld [vmem:[%s7814_s23 + $0x8] sm:$0xf]  ;;  %v260_v34 = vrot.slane %v7549_v30, 1  ;;  %v7551_v36 = vld [vmem:[%s7814_s23 + $0x18] sm:$0xff]   ;;  %v7550_v39 = vld [vmem:[%s7814_s23 + $0x10] sm:$0xfc]  }
  0x16   : > { %v253_v17 = vsel %vm11947_vm1, %v251_v12, %v252_v8  ;;  %7088 = vmatprep.mubr.msk.bf16.mxu1 %vm273_vm2, %v265_v20  ;;  %v255_v24 = vsel %vm11947_vm1, %v252_v8, %v254_v18  ;;  %v257_v31 = vsel %vm11947_vm1, %v254_v18, %v256_v27  ;;  %v259_v35 = vsel %vm11947_vm1, %v256_v27, %v258_v32  ;;  %v7552_v44 = vld [vmem:[%s7814_s23 + $0x20] sm:$0xff]   ;;  %v7553_v46 = vld [vmem:[%s7814_s23 + $0x28] sm:$0xff]   ;;  %v7554_v49 = vld [vmem:[%s7814_s23 + $0x30] sm:$0xff]  }
  0x17   : > { %7076 = vmatprep.mubr.msk.bf16.mxu0 %vm273_vm2, %v253_v17  ;;  %7089 = vmatmul.mubr.msk.bf16.vlgmr.msra.gmra.mxu1 %vm273_vm2, %v267_v29  ;;  %v6405_v37 = vcombine.low %v184_v33, %v185_v4  ;;  %v261_v38 = vsel %vm11947_vm1, %v258_v32, %v260_v34  ;;  %v600_v41 = vrot.slane %v7550_v39, 2  ;;  %v601_v42 = vrot.slane %v7551_v36, 2  ;;  %v7871_v50 = vld [vmem:[%s7814_s23 + $0x4c] sm:$0xf]  ;;  %v1133_v52 = vld [vmem:[%s7814_s23 + $0x48] sm:$0xe] }
  0x18   : > { %7077 = vmatmul.mubr.msk.bf16.vlgmr.msra.gmra.mxu0 %vm273_vm2, %v255_v24  ;;  %7093 = vmatpush3.bf16.msra.mxu1 %v437_v21  ;;  %v263_v43 = vsel %vm11947_vm1, %v260_v34, %v262_v14  ;;  %v603_v47 = vrot.slane %v7552_v44, 2  ;;  %v605_v48 = vrot.slane %v7553_v46, 2  ;;  %v7556_v55 = vld [vmem:[%s7814_s23 + $0x38] sm:$0xff]   ;;  %v6453_v57 = vcombine.low %v1133_v52, %v7871_v50  ;;  %v7885_v58 = vld [vmem:[%s7814_s23 + $0x50] sm:$0xff]   ;;  %v7560_v1 = vld [vmem:[%s7814_s23 + $0x40] sm:$0xff]  }
  0x19   : > { %7111 = vmatpush3.bf16.msra.mxu0 %v647_v11  ;;  %7080 = vmatprep.mubr.msk.bf16.mxu0 %vm273_vm2, %v257_v31  ;;  %v602_v45 = vsel %vm298_vm0, %v600_v41, %v601_v42  ;;  %v607_v59 = vrot.slane %v7554_v49, 2  ;;  %v609_v60 = vrot.slane %v7556_v55, 2  ;;  %v1183_v63 = vrot.slane %v7885_v58, 1  ;;  %v7562_v3 = vld [vmem:[%s7814_s23 + $0x48] sm:$0xff]   ;;  %v7897_v4 = vld [vmem:[%s7814_s23 + $0x58] sm:$0xff]   ;;  %v7903_v7 = vld [vmem:[%s7814_s23 + $0x60] sm:$0xff]  }
  0x1a   : > { %7519 = vmatprep.subr.msk.bf16.mxu0 %vm298_vm0, %v7566_v16  ;;  %7094 = vmatprep.mubr.msk.bf16.mxu1 %vm273_vm2, %v7547_v26  ;;  %v604_v51 = vsel %vm298_vm0, %v601_v42, %v603_v47  ;;  %v606_v54 = vsel %vm298_vm0, %v603_v47, %v605_v48  ;;  %v1182_v62 = vrot.slane %v6453_v57, 1  ;;  %v7564_v5 = vld [vmem:[%s7814_s23 + $0x50] ss:$0 sps:$4 sm:$0x33]   ;;  %v611_v8 = vrot.slane %v7560_v1, 2  ;;  %v7919_v17 = vld [vmem:[%s7814_s23 + $0x78] sm:$0xff]  }
  0x1b   : > { %7518 = vmatprep.subr.msk.bf16.mxu1 %vm298_vm0, %v7555_v23  ;;  %v608_v0 = vsel %vm298_vm0, %v605_v48, %v607_v59  ;;  %v610_v2 = vsel %vm298_vm0, %v607_v59, %v609_v60  ;;  %v613_v10 = vrot.slane %v7562_v3, 2  ;;  %v1185_v11 = vrot.slane %v7897_v4, 1  ;;  %v7915_v14 = vld [vmem:[%s7814_s23 + $0x70] sm:$0xff]   ;;  %v7570_v18 = vld [vmem:[%s7814_s23 + $0x80] sm:$0xff]   ;;  %v7576_v27 = vld [vmem:[%s7814_s23 + $0x68] sm:$0xff]  }
  0x1c   : > { %v1187_v12 = vrot.slane %v7903_v7, 1  ;;  %v612_v15 = vsel %vm298_vm0, %v609_v60, %v611_v8  ;;  %v615_v16 = vrot.slane %v7564_v5, 2  ;;  %v7571_v19 = vld [vmem:[%s7814_s23 + $0x88] ss:$0 sps:$4 sm:$0x11]   ;;  %v1574_v21 = vsel %vm298_vm0, %v7572_v53, 0 }
  0x1d   : > { %v1186_v20 = vsel %vm11947_vm1, %v1183_v63, %v1185_v11  ;;  %v7575_v23 = vld [vmem:[%s7814_s23 + $0x60] sm:$0xff]   ;;  %v7573_v25 = vld [vmem:[%s7814_s23 + $0x50] sm:$0xfc]   ;;  %v1193_v29 = vrot.slane %v7919_v17, 1  ;;  %v1195_v34 = vrot.slane %v7570_v18, 1  ;;  %v1532_v39 = vrot.slane %v7576_v27, 2 }
  0x1e   : > { %v1188_v24 = vsel %vm11947_vm1, %v1185_v11, %v1187_v12  ;;  %v7568_v31 = vld [vmem:[%s7814_s23 + $0x40] sm:$0xff]   ;;  %v616_v33 = vsel %vm298_vm0, %v613_v10, %v615_v16  ;;  %v1527_v36 = vrot.slane %v7573_v25, 2  ;;  %v7976_v52 = vld [vmem:[%s7814_s23 + $0x8c] sm:$0xf]  ;;  %v7986_v57 = vld [vmem:[%s7814_s23 + $0x90] sm:$0xff]  }
  0x1f   : > { %7095 = vmatmul.mubr.msk.bf16.vlgmr.msra.gmra.mxu1 %vm273_vm2, %v6405_v37  ;;  %v7588_v32 = vld [vmem:[%s11932_s1] sm:$0x3f]   ;;  %v1196_v47 = vsel %vm11947_vm1, %v1193_v29, %v1195_v34  ;;  %v2050_v60 = vrot.slane %v7986_v57, 1  ;;  %v7584_v1 = vld [vmem:[%s7814_s23 + $0x88] sm:$0xff]   ;;  %v7589_v3 = vld [vmem:[%s11932_s1 + $0x10] sm:$0x3f]  }
  0x20   : > { %7081 = vmatmul.mubr.msk.bf16.gmra.mxu0 %vm273_vm2, %v259_v35  ;;  %7098 = vmatprep.mubr.msk.bf16.mxu1 %vm273_vm2, %v7538_v6  ;;  %v1184_v6 = vsel %vm11947_vm1, %v1182_v62, %v1183_v63  ;;  %v1197_v35 = vrot.slane %v7571_v19, 1  ;;  %v7582_v62 = vld [vmem:[%s7814_s23 + $0x80] sm:$0xff]   ;;  %v1540_v5 = vrot.slane %v7584_v1, 2  ;;  %v7585_v11 = vld [vmem:[%s7814_s23 + $0x90] ss:$0 sps:$4 sm:$0x33]  }
  0x21   : > { %7084 = vmatprep.mubr.msk.bf16.mxu0 %vm273_vm2, %v261_v38  ;;  %7129 = vmatpush3.bf16.msra.mxu1 %v1229_v40  ;;  %v1530_v38 = vrot.slane %v7575_v23, 2  ;;  %v1117_v40 = vld [vmem:[%s7814_s23 + $0x48] sm:$0xf]  ;;  %v7586_v16 = vld [vmem:[%s7814_s23 + $0xa0] sm:$0xff]   ;;  %v7592_v27 = vld [vmem:[%s7814_s23 + $0x98] sm:$0xff]  }
  0x22   : > { %7520 = vmatprep.subr.msk.bf16.mxu1 %vm298_vm0, %v7572_v53  ;;  %v1198_v48 = vsel %vm11947_vm1, %v1195_v34, %v1197_v35  ;;  %v2020_v53 = vld [vmem:[%s7814_s23 + $0x88] sm:$0xe]  ;;  %v7587_v19 = vld [vmem:[%s7814_s23 + $0xa8] ss:$0 sps:$4 sm:$0x77]  }
  0x23   : > { %v1533_v55 = vsel %vm298_vm0, %v1530_v38, %v1532_v39  ;;  %v6520_v59 = vcombine.low %v2020_v53, %v7976_v52  ;;  %v7595_v34 = vld [vmem:[%s7814_s23 + $0xa8] sm:$0xff]   ;;  %v7597_v35 = vld [vmem:[%s7814_s23 + $0xa0] ss:$0 sps:$4 sm:$0x33]  }
  0x27   : > { %7099 = vmatmul.mubr.msk.bf16.gmra.mxu1 %vm273_vm2, %v7543_v13  ;;  %v7912_v13 = vld [vmem:[%s7814_s23 + $0x68] sm:$0xff]  }
  0x28   : > { %7085 = vmatmul.mubr.msk.bf16.gmra.mxu0 %vm273_vm2, %v263_v43  ;;  %7102 = vmatprep.mubr.msk.bf16.mxu1 %vm273_vm2, %v7546_v22  ;;  %v7574_v22 = vld [vmem:[%s7814_s23 + $0x58] sm:$0xff]   ;;  %v1189_v26 = vrot.slane %v7912_v13, 1  ;;  %v2185_v43 = vsel %vm298_vm0, %v7588_v32, 0 }
  0x29   : > { %7112 = vmatprep.mubr.msk.bf16.mxu0 %vm273_vm2, %v602_v45  ;;  %v1528_v37 = vrot.slane %v7574_v22, 2  ;;  %v6472_v45 = vcombine.low %v1117_v40, %v7871_v50  ;;  %v7577_v50 = vld [vmem:[%s7814_s23 + $0x70] sm:$0xff]   ;;  %v2011_v22 = vld [vmem:[%s7814_s23 + $0x88] sm:$0xf] }
  0x2a   : > { %v1190_v41 = vsel %vm11947_vm1, %v1187_v12, %v1189_v26  ;;  %v6532_v25 = vcombine.low %v2011_v22, %v7976_v52 }
  0x2b   : > { %v1529_v49 = vsel %vm298_vm0, %v1527_v36, %v1528_v37  ;;  %v2298_v36 = vrot.slane %v7595_v34, 2 }
  0x2f   : > { %7103 = vmatmul.mubr.msk.bf16.gmra.mxu1 %vm273_vm2, %v7548_v28  ;;  %v1191_v28 = vrot.slane %v7915_v14, 1 }
  0x30   : > { %7113 = vmatmul.mubr.msk.bf16.vlgmr.msra.gmra.mxu0 %vm273_vm2, %v604_v51  ;;  %7106 = vmatprep.mubr.msk.bf16.mxu1 %vm273_vm2, %v7549_v30  ;;  %v7578_v30 = vld [vmem:[%s11932_s1 + $0x8] sm:$0x3f]   ;;  %v7581_v51 = vld [vmem:[%s7814_s23 + $0x78] sm:$0xff]  }
  0x31   : > { %7116 = vmatprep.mubr.msk.bf16.mxu0 %vm273_vm2, %v606_v54  ;;  %7147 = vmatpush3.bf16.msra.mxu0 %v1366_v56  ;;  %v2079_v42 = vsel %vm298_vm0, %v7578_v30, 0  ;;  %v1192_v44 = vsel %vm11947_vm1, %v1189_v26, %v1191_v28  ;;  %v1194_v46 = vsel %vm11947_vm1, %v1191_v28, %v1193_v29  ;;  %v1531_v54 = vsel %vm298_vm0, %v1528_v37, %v1530_v38  ;;  %v7591_v26 = vld [vmem:[%s7814_s23 + $0x90] sm:$0xfc]   ;;  %v7596_v38 = vld [vmem:[%s7814_s23 + $0xb0] ss:$0 sps:$4 sm:$0xff]  }
  0x32   : > { %7182 = vmatprep.subr.bf16.mxu0 %v11935_v61  ;;  %v1534_v56 = vrot.slane %v7577_v50, 2  ;;  %v2293_v28 = vrot.slane %v7591_v26, 2  ;;  %v2294_v29 = vrot.slane %v7592_v27, 2 }
  0x34   : > { %v1535_v63 = vsel %vm298_vm0, %v1532_v39, %v1534_v56  ;;  %v2295_v30 = vsel %vm298_vm0, %v2293_v28, %v2294_v29  ;;  %v2300_v39 = vrot.slane %v7596_v38, 2 }
  0x36   : > { %v2301_v40 = vsel %vm298_vm0, %v2298_v36, %v2300_v39 }
  0x37   : > { %7107 = vmatmul.mubr.msk.bf16.gmra.mxu1 %vm273_vm2, %v7820_v9  ;;  %v614_v9 = vsel %vm298_vm0, %v611_v8, %v613_v10  ;;  %v2323_v8 = vsel %vm298_vm0, %v7589_v3, 0 }
  0x38   : > { %7117 = vmatmul.mubr.msk.bf16.gmra.mxu0 %vm273_vm2, %v608_v0  ;;  %7130 = vmatprep.mubr.msk.bf16.mxu1 %vm273_vm2, %v1184_v6  ;;  %v2049_v0 = vrot.slane %v6520_v59, 1 }
  0x39   : > { %7120 = vmatprep.mubr.msk.bf16.mxu0 %vm273_vm2, %v610_v2 }
  0x3a   : > { %v2051_v6 = vsel %vm11947_vm1, %v2049_v0, %v2050_v60 }
  0x3f   : > { %7131 = vmatmul.mubr.msk.bf16.vlgmr.msra.gmra.mxu1 %vm273_vm2, %v1186_v20  ;;  %v7590_v20 = vld [vmem:[%s7814_s23 + $0x80] sm:$0xff]  }
  0x40   : > { %7121 = vmatmul.mubr.msk.bf16.gmra.mxu0 %vm273_vm2, %v612_v15  ;;  %7134 = vmatprep.mubr.msk.bf16.mxu1 %vm273_vm2, %v1188_v24  ;;  %v11937_v24 = vmov 0  }
  0x41   : > { %7124 = vmatprep.mubr.msk.bf16.mxu0 %vm273_vm2, %v614_v9  ;;  %7165 = vmatpush3.bf16.msra.mxu1 %v1574_v21  ;;  %v2054_v9 = vrot.slane %v7586_v16, 1  ;;  %v2056_v21 = vrot.slane %v7587_v19, 1  ;;  %173 = vst.msk [vmem:[#allocation2] sm:$0xf] %vm11950_vm4, %v11937_v24  ;;  %174 = vst.msk [vmem:[#allocation2 + $0x4] sm:$0xf] %vm11950_vm4, %v11937_v24 }
  0x42   : > { %7204 = vmatprep.subr.bf16.mxu1 %v11935_v61  ;;  %175 = vst.msk [vmem:[#allocation2 + $0x8] sm:$0xf] %vm11950_vm4, %v11937_v24  ;;  %178 = vst.msk [vmem:[#allocation2 + $0xb0] sm:$0xf] %vm11950_vm4, %v11937_v24 }
  0x43   : > { %v2057_v23 = vsel %vm11947_vm1, %v2054_v9, %v2056_v21  ;;  %179 = vst.msk [vmem:[#allocation2 + $0xb4] sm:$0xf] %vm11950_vm4, %v11937_v24 }
  0x47   : > { %7135 = vmatmul.mubr.msk.bf16.gmra.mxu1 %vm273_vm2, %v1190_v41  ;;  %v762_v41 = vlaneseq }
  0x48   : > { %7125 = vmatmul.mubr.msk.bf16.gmra.mxu0 %vm273_vm2, %v616_v33  ;;  %7138 = vmatprep.mubr.msk.bf16.mxu1 %vm273_vm2, %v1192_v44 }
  0x49   : > { %7148 = vmatprep.mubr.msk.bf16.mxu0 %vm273_vm2, %v7568_v31  ;;  %v7594_v31 = vld [vmem:[%s7814_s23 + $0xa0] sm:$0xff]  }
  0x4a   : > { %v2296_v32 = vrot.slane %v7594_v31, 2 }
  0x4c   : > { %v2297_v33 = vsel %vm298_vm0, %v2294_v29, %v2296_v32  ;;  %v2299_v37 = vsel %vm298_vm0, %v2296_v32, %v2298_v36 }
  0x4f   : > { %7139 = vmatmul.mubr.msk.bf16.gmra.mxu1 %vm273_vm2, %v1194_v46 }
  0x50   : > { %7149 = vmatmul.mubr.msk.bf16.vlgmr.msra.gmra.mxu0 %vm273_vm2, %v6472_v45  ;;  %7142 = vmatprep.mubr.msk.bf16.mxu1 %vm273_vm2, %v1196_v47 }
  0x51   : > { %7152 = vmatprep.mubr.msk.bf16.mxu0 %vm273_vm2, %v7885_v58  ;;  %7183 = vmatpush3.bf16.msra.mxu0 %v2079_v42  ;;  %v1536_v58 = vrot.slane %v7581_v51, 2  ;;  %v8087_v42 = vshrl.u32 %v762_v41, 7 }
  0x52   : > { %7226 = vmatprep.subr.bf16.mxu0 %v11935_v61 }
  0x53   : > { %v1537_v2 = vsel %vm298_vm0, %v1534_v56, %v1536_v58  ;;  %v766_v44 = vadd.s32 24, %v8087_v42  ;;  %v764_v45 = vadd.s32 8, %v8087_v42  ;;  %v769_v46 = vadd.s32 48, %v8087_v42 }
  0x54   : > { %v767_v47 = vadd.s32 32, %v8087_v42  ;;  %v768_v50 = vadd.s32 40, %v8087_v42  ;;  %v8099_v51 = vcvt.s32.f32 %v8087_v42  ;;  %v773_v53 = vadd.s32 80, %v8087_v42 }
  0x55   : > { %v8101_v52 = vcvt.s32.f32 %v766_v44  ;;  %v771_v56 = vadd.s32 64, %v8087_v42  ;;  %v772_v59 = vadd.s32 72, %v8087_v42  ;;  %v777_v34 = vadd.s32 112, %v8087_v42 }
  0x56   : > { %12022 = vst [vmem:[#allocation4_spill] sm:$0xff] %v8099_v51  ;;  %v811_v0 = vadd.f32 0.5, %v8099_v51  ;;  %v775_v41 = vadd.s32 96, %v8087_v42 }
  0x57   : > { %7143 = vmatmul.mubr.msk.bf16.gmra.mxu1 %vm273_vm2, %v1198_v48  ;;  %12023 = vst [vmem:[#allocation5_spill] sm:$0xff] %v8101_v52  ;;  %v814_v1 = vadd.f32 0.5, %v8101_v52 }
  0x58   : > { %7153 = vmatmul.mubr.msk.bf16.gmra.mxu0 %vm273_vm2, %v7897_v4  ;;  %7166 = vmatprep.mubr.msk.bf16.mxu1 %vm273_vm2, %v1529_v49  ;;  %v1538_v4 = vrot.slane %v7582_v62, 2  ;;  %v770_v49 = vadd.s32 56, %v8087_v42 }
  0x59   : > { %7156 = vmatprep.mubr.msk.bf16.mxu0 %vm273_vm2, %v7903_v7  ;;  %v7583_v7 = vld [vmem:[%s7814_s23 + $0x98] sm:$0xff]  }
  0x5a   : > { %v1539_v10 = vsel %vm298_vm0, %v1536_v58, %v1538_v4  ;;  %v1541_v12 = vsel %vm298_vm0, %v1538_v4, %v1540_v5  ;;  %v774_v58 = vadd.s32 88, %v8087_v42  ;;  %v8114_v62 = vcvt.s32.f32 %v770_v49 }
  0x5c   : > { %12027 = vst [vmem:[#allocation9_spill] sm:$0xff] %v8114_v62 }
  0x5f   : > { %7167 = vmatmul.mubr.msk.bf16.vlgmr.msra.gmra.mxu1 %vm273_vm2, %v1531_v54  ;;  %v8104_v54 = vcvt.s32.f32 %v764_v45 }
  0x60   : > { %7157 = vmatmul.mubr.msk.bf16.gmra.mxu0 %vm273_vm2, %v7912_v13  ;;  %7170 = vmatprep.mubr.msk.bf16.mxu1 %vm273_vm2, %v1533_v55  ;;  %v2052_v13 = vrot.slane %v7583_v7, 1  ;;  %v8106_v55 = vcvt.s32.f32 %v769_v46  ;;  %v778_v46 = vadd.s32 120, %v8087_v42 }
  0x61   : > { %7160 = vmatprep.mubr.msk.bf16.mxu0 %vm273_vm2, %v7915_v14  ;;  %7205 = vmatpush3.bf16.msra.mxu1 %v2185_v43  ;;  %v1542_v14 = vrot.slane %v7585_v11, 2  ;;  %v765_v43 = vadd.s32 16, %v8087_v42  ;;  %12024 = vst [vmem:[#allocation6_spill] sm:$0xff] %v8104_v54  ;;  %v812_v3 = vadd.f32 0.5, %v8104_v54  ;;  %v818_v11 = vadd.f32 0.5, %v8114_v62 }
  0x62   : > { %v2053_v15 = vsel %vm11947_vm1, %v2050_v60, %v2052_v13  ;;  %v2055_v18 = vsel %vm11947_vm1, %v2052_v13, %v2054_v9  ;;  %12025 = vst [vmem:[#allocation7_spill] sm:$0xff] %v8106_v55  ;;  %v817_v4 = vadd.f32 0.5, %v8106_v55  ;;  %v827_v13 = vmul.f32 0.055555556, %v811_v0 }
  0x63   : > { %v8094_v48 = vcvt.s32.f32 %v765_v43  ;;  %v828_v16 = vmul.f32 0.055555556, %v812_v3  ;;  %v834_v22 = vmul.f32 0.055555556, %v818_v11 }
  0x65   : > { %12021 = vst [vmem:[#allocation3_spill] sm:$0xff] %v8094_v48  ;;  %v813_v60 = vadd.f32 0.5, %v8094_v48  ;;  %v8143_v28 = vfloor.f32 %v828_v16  ;;  %v8151_v36 = vfloor.f32 %v834_v22  ;;  %v8215_v22 = vadd.f32 128.0, %v8094_v48 }
  0x67   : > { %7171 = vmatmul.mubr.msk.bf16.gmra.mxu1 %vm273_vm2, %v1535_v63  ;;  %v8116_v63 = vcvt.s32.f32 %v768_v50  ;;  %v860_v43 = vmul.f32 18.0, %v8143_v28  ;;  %vm892_vm15 = vcmp.ge.f32.partialorder %v8143_v28, 1.0 }
  0x68   : > { %7161 = vmatmul.mubr.msk.bf16.gmra.mxu0 %vm273_vm2, %v7919_v17  ;;  %7174 = vmatprep.mubr.msk.bf16.mxu1 %vm273_vm2, %v1537_v2  ;;  %v1543_v17 = vsel %vm298_vm0, %v1540_v5, %v1542_v14  ;;  %v8120_v2 = vcvt.s32.f32 %v773_v53  ;;  %v8124_v5 = vcvt.s32.f32 %v771_v56  ;;  %v830_v14 = vmul.f32 0.055555556, %v814_v1 }
  0x69   : > { %7184 = vmatprep.mubr.msk.bf16.mxu0 %vm11943_vm3, %v11935_v61  ;;  %12028 = vst [vmem:[#allocation10_spill] sm:$0xff] %v8116_v63  ;;  %v8170_v53 = vcvt.s32.f32 %v777_v34  ;;  %v8231_v34 = vadd.f32 128.0, %v8101_v52  ;;  %vm908_vm0 = vcmp.le.f32.partialorder %v8143_v28, 16.0 }
  0x6a   : > { %12029 = vst [vmem:[#allocation11_spill] sm:$0xff] %v8124_v5  ;;  %v819_v9 = vadd.f32 0.5, %v8124_v5  ;;  %v8141_v26 = vfloor.f32 %v830_v14 }
  0x6b   : > { %v825_v16 = vadd.f32 0.5, %v8170_v53 }
  0x6c   : > { %vm894_vm9 = vcmp.ge.f32.partialorder %v8141_v26, 1.0  ;;  %vm910_vm10 = vcmp.le.f32.partialorder %v8141_v26, 16.0 }
  0x6f   : > { %7175 = vmatmul.mubr.msk.bf16.gmra.mxu1 %vm273_vm2, %v1539_v10  ;;  %v829_v10 = vmul.f32 0.055555556, %v813_v60  ;;  %v776_v60 = vadd.s32 104, %v8087_v42 }
  0x70   : > { %7185 = vmatmul.mubr.msk.bf16.vlgmr.msra.gmra.mxu0 %vm273_vm2, %v2051_v6  ;;  %7178 = vmatprep.mubr.msk.bf16.mxu1 %vm273_vm2, %v1541_v12  ;;  %v816_v12 = vadd.f32 0.5, %v8116_v63 }
  0x71   : > { %7188 = vmatprep.mubr.msk.bf16.mxu0 %vm11943_vm3, %v11935_v61  ;;  %7227 = vmatpush3.bf16.msra.mxu0 %v2323_v8  ;;  %v8129_v8 = vcvt.s32.f32 %v772_v59 }
  0x77   : > { %7179 = vmatmul.mubr.msk.bf16.gmra.mxu1 %vm273_vm2, %v1543_v17  ;;  %v833_v17 = vmul.f32 0.055555556, %v817_v4  ;;  %v8185_v4 = vcvt.s32.f32 %v775_v41  ;;  %v8243_v41 = vadd.f32 128.0, %v8106_v55 }
  0x78   : > { %7189 = vmatmul.mubr.msk.bf16.gmra.mxu0 %vm273_vm2, %v2053_v15  ;;  %7206 = vmatprep.mubr.msk.bf16.mxu1 %vm11943_vm3, %v11935_v61  ;;  %v821_v15 = vadd.f32 0.5, %v8120_v2 }
  0x79   : > { %7192 = vmatprep.mubr.msk.bf16.mxu0 %vm11943_vm3, %v11935_v61  ;;  %v8145_v29 = vfloor.f32 %v833_v17 }
  0x7a   : > { %v837_v27 = vmul.f32 0.055555556, %v821_v15 }
  0x7b   : > { %v865_v44 = vmul.f32 18.0, %v8145_v29 }
  0x7f   : > { %7207 = vmatmul.mubr.msk.bf16.vlgmr.msra.gmra.mxu1 %vm273_vm2, %v7590_v20  ;;  %v820_v20 = vadd.f32 0.5, %v8129_v8 }
  0x80   : > { %7193 = vmatmul.mubr.msk.bf16.gmra.mxu0 %vm273_vm2, %v2055_v18  ;;  %7210 = vmatprep.mubr.msk.bf16.mxu1 %vm11943_vm3, %v11935_v61 }
  0x81   : > { %7196 = vmatprep.mubr.msk.bf16.mxu0 %vm11943_vm3, %v11935_v61 }
  0x87   : > { %7211 = vmatmul.mubr.msk.bf16.gmra.mxu1 %vm273_vm2, %v6532_v25  ;;  %v8139_v25 = vfloor.f32 %v827_v13 }
  0x88   : > { %7197 = vmatmul.mubr.msk.bf16.gmra.mxu0 %vm273_vm2, %v2057_v23  ;;  %7214 = vmatprep.mubr.msk.bf16.mxu1 %vm11943_vm3, %v11935_v61  ;;  %v832_v23 = vmul.f32 0.055555556, %v816_v12  ;;  %v8194_v12 = vcvt.s32.f32 %v778_v46 }
  0x89   : > { %7200 = vmatprep.mubr.msk.bf16.mxu0 %vm11943_vm3, %v11935_v61  ;;  %v859_v38 = vmul.f32 18.0, %v8139_v25  ;;  %vm891_vm7 = vcmp.ge.f32.partialorder %v8139_v25, 1.0  ;;  %vm907_vm8 = vcmp.le.f32.partialorder %v8139_v25, 16.0 }
  0x8b   : > { %v8179_v0 = vsub.f32 %v8099_v51, %v859_v38  ;;  %v826_v38 = vadd.f32 0.5, %v8194_v12 }
  0x8d   : > { %vm939_vm12 = vcmp.ge.f32.partialorder %v8179_v0, 1.0 }
  0x8f   : > { %7215 = vmatmul.mubr.msk.bf16.gmra.mxu1 %vm273_vm2, %v7986_v57  ;;  %v8109_v57 = vcvt.s32.f32 %v767_v47 }
  0x90   : > { %7201 = vmatmul.mubr.msk.bf16.gmra.mxu0 %vm273_vm2, %v2056_v21  ;;  %7218 = vmatprep.mubr.msk.bf16.mxu1 %vm11943_vm3, %v11935_v61  ;;  %v8137_v21 = vfloor.f32 %v829_v10  ;;  %v8191_v10 = vsub.f32 %v8106_v55, %v865_v44 }
  0x91   : > { %7228 = vmatprep.mubr.msk.bf16.mxu0 %vm11943_vm3, %v11935_v61  ;;  %12026 = vst [vmem:[#allocation8_spill] sm:$0xff] %v8109_v57  ;;  %v815_v6 = vadd.f32 0.5, %v8109_v57 }
  0x92   : > { %vm893_vm5 = vcmp.ge.f32.partialorder %v8137_v21, 1.0  ;;  %vm909_vm6 = vcmp.le.f32.partialorder %v8137_v21, 16.0 }
  0x93   : > { %v831_v18 = vmul.f32 0.055555556, %v815_v6  ;;  %v8188_v6 = vsub.f32 %v8104_v54, %v860_v43  ;;  %vm8322_vm4 = vmand %vm893_vm5, %vm909_vm6  ;;  %vm914_vm6 = vcmp.le.f32.partialorder %v8151_v36, 16.0 }
  0x95   : > { %v8147_v31 = vfloor.f32 %v831_v18  ;;  %v2588_v18 = vld [vmem:[#allocation2 + $0x4] sm:$0xf] }
  0x97   : > { %7219 = vmatmul.mubr.msk.bf16.gmra.mxu1 %vm273_vm2, %v7583_v7  ;;  %v8127_v7 = vcvt.s32.f32 %v774_v58  ;;  %v863_v47 = vmul.f32 18.0, %v8147_v31  ;;  %v866_v58 = vmul.f32 18.0, %v8151_v36  ;;  %vm911_vm1 = vcmp.le.f32.partialorder %v8147_v31, 16.0 }
  0x98   : > { %7229 = vmatmul.mubr.msk.bf16.vlgmr.msra.gmra.mxu0 %vm273_vm2, %v2295_v30  ;;  %7222 = vmatprep.mubr.msk.bf16.mxu1 %vm11943_vm3, %v11935_v61  ;;  %v835_v30 = vmul.f32 0.055555556, %v819_v9 }
  0x99   : > { %7232 = vmatprep.mubr.msk.bf16.mxu0 %vm11943_vm3, %v11935_v61  ;;  %v822_v19 = vadd.f32 0.5, %v8127_v7  ;;  %v8199_v13 = vsub.f32 %v8109_v57, %v863_v47  ;;  %v8207_v17 = vsub.f32 %v8114_v62, %v866_v58 }
  0x9a   : > { %v8162_v45 = vfloor.f32 %v835_v30 }
  0x9b   : > { %v838_v32 = vmul.f32 0.055555556, %v822_v19  ;;  %v2604_v19 = vld [vmem:[#allocation2] sm:$0x8] }
  0x9c   : > { %v867_v11 = vmul.f32 18.0, %v8162_v45  ;;  %v8256_v58 = vcombine.low %v2604_v19, %v2588_v18  ;;  %v1708_v18 = vadd.f32 0.5, %v8231_v34  ;;  %v8275_v19 = vadd.f32 128.0, %v8116_v63 }
  0x9d   : > { %v8166_v49 = vfloor.f32 %v838_v32  ;;  %v823_v32 = vadd.f32 0.5, %v8185_v4 }
  0x9e   : > { %12035 = vst [vmem:[#allocation17_spill] sm:$0xff] %v8256_v58 }
  0x9f   : > { %7223 = vmatmul.mubr.msk.bf16.gmra.mxu1 %vm273_vm2, %v7597_v35  ;;  %v861_v35 = vmul.f32 18.0, %v8137_v21  ;;  %v870_v14 = vmul.f32 18.0, %v8166_v49 }
  0xa0   : > { %7233 = vmatmul.mubr.msk.bf16.gmra.mxu0 %vm273_vm2, %v2297_v33  ;;  %v836_v33 = vmul.f32 0.055555556, %v820_v20  ;;  %v8212_v20 = vcvt.s32.f32 %v776_v60 }
  0xa1   : > { %7236 = vmatprep.mubr.msk.bf16.mxu0 %vm11943_vm3, %v11935_v61  ;;  %v8173_v56 = vsub.f32 %v8094_v48, %v861_v35  ;;  %v8236_v35 = vsub.f32 %v8124_v5, %v867_v11  ;;  %v8251_v46 = vsub.f32 %v8127_v7, %v870_v14  ;;  %v8262_v11 = vadd.f32 128.0, %v8109_v57 }
  0xa2   : > { %v8168_v50 = vfloor.f32 %v836_v33  ;;  %v8228_v33 = vadd.f32 128.0, %v8099_v51  ;;  %v824_v60 = vadd.f32 0.5, %v8212_v20  ;;  %v1711_v57 = vadd.f32 0.5, %v8243_v41 }
  0xa3   : > { %vm941_vm11 = vcmp.ge.f32.partialorder %v8173_v56, 1.0  ;;  %12033 = vst [vmem:[#allocation15_spill] sm:$0xff] %v8251_v46  ;;  %vm973_vm14 = vcmp.le.f32.partialorder %v8173_v56, 16.0 }
  0xa4   : > { %12030 = vst [vmem:[#allocation12_spill] sm:$0xff] %v8168_v50  ;;  %v868_v15 = vmul.f32 18.0, %v8168_v50  ;;  %v1727_v46 = vmul.f32 0.055555556, %v1711_v57  ;;  %v2654_v57 = vshrl.u32 %v8256_v58, 16  ;;  %vm8367_vm5 = vmand %vm8322_vm4, %vm941_vm11  ;;  %vm946_vm11 = vcmp.ge.f32.partialorder %v8207_v17, 1.0 }
  0xa6   : > { %v8254_v47 = vsub.f32 %v8129_v8, %v868_v15  ;;  %v839_v15 = vmul.f32 0.055555556, %v823_v32  ;;  %v8283_v32 = vadd.f32 128.0, %v8120_v2 }
  0xa8   : > { %7237 = vmatmul.mubr.msk.bf16.gmra.mxu0 %vm273_vm2, %v2299_v37  ;;  %v8153_v37 = vfloor.f32 %v832_v23  ;;  %12034 = vst [vmem:[#allocation16_spill] sm:$0xff] %v8254_v47  ;;  %12038 = vst [vmem:[#allocation20_spill] sm:$0xff] %v8283_v32 }
  0xa9   : > { %7240 = vmatprep.mubr.msk.bf16.mxu0 %vm11943_vm3, %v11935_v61 }
  0xaa   : > { %v864_v59 = vmul.f32 18.0, %v8153_v37 }
  0xac   : > { %v8210_v9 = vsub.f32 %v8116_v63, %v864_v59  ;;  %v841_v59 = vmul.f32 0.055555556, %v825_v16  ;;  %v1705_v16 = vadd.f32 0.5, %v8228_v33 }
  0xae   : > { %v1721_v63 = vmul.f32 0.055555556, %v1705_v16 }
  0xb0   : > { %7241 = vmatmul.mubr.msk.bf16.gmra.mxu0 %vm273_vm2, %v2301_v40  ;;  %v8157_v40 = vfloor.f32 %v837_v27 }
  0xb1   : > { %7244 = vmatprep.mubr.msk.bf16.mxu0 %vm11943_vm3, %v11935_v61  ;;  %v8265_v61 = vadd.f32 128.0, %v8114_v62  ;;  %v842_v62 = vmul.f32 0.055555556, %v826_v38  ;;  %v2656_v38 = vshll.u32 %v8256_v58, 16  ;;  %vm8335_vm3 = vmand %vm891_vm7, %vm907_vm8  ;;  %vm972_vm8 = vcmp.le.f32.partialorder %v8188_v6, 16.0 }
  0xb2   : > { %v869_v3 = vmul.f32 18.0, %v8157_v40  ;;  %vm8353_vm7 = vmand %vm894_vm9, %vm910_vm10  ;;  %vm977_vm9 = vcmp.le.f32.partialorder %v8191_v10, 16.0 }
  0xb3   : > { %vm8386_vm4 = vmand %vm8335_vm3, %vm939_vm12  ;;  %vm12084_vm3 = vcmp.ge.f32.partialorder %v8188_v6, 1.0 }
  0xb4   : > { %v8224_v30 = vsub.f32 %v8120_v2, %v869_v3  ;;  %v1707_v3 = vadd.f32 0.5, %v8215_v22  ;;  %v840_v2 = vmul.f32 0.055555556, %v824_v60  ;;  %v8311_v60 = vfloor.f32 %v842_v62 }
  0xb5   : > { %v2658_v62 = vrot.slane %v2656_v38, 1 }
  0xb6   : > { %12045 = vst [vmem:[#allocation27_spill] sm:$0xff] %v8311_v60 }
  0xb8   : > { %7245 = vmatmul.mubr.msk.bf16.gmra.mxu0 %vm273_vm2, %v2300_v39  ;;  %v862_v39 = vmul.f32 18.0, %v8141_v26  ;;  %vm895_vm2 = vcmp.ge.f32.partialorder %v8147_v31, 1.0  ;;  %v874_v26 = vmul.f32 18.0, %v8311_v60  ;;  %v8397_v60 = vadd.f32 128.0, %v8127_v7 }
  0xba   : > { %v8182_v1 = vsub.f32 %v8101_v52, %v862_v39  ;;  %v8240_v39 = vadd.f32 128.0, %v8104_v54  ;;  %v8292_v54 = vfloor.f32 %v841_v59  ;;  %v8306_v59 = vfloor.f32 %v839_v15 }
  0xbc   : > { %vm942_vm13 = vcmp.ge.f32.partialorder %v8182_v1, 1.0  ;;  %v1706_v55 = vadd.f32 0.5, %v8240_v39  ;;  %12041 = vst [vmem:[#allocation23_spill] sm:$0xff] %v8292_v54  ;;  %12044 = vst [vmem:[#allocation26_spill] sm:$0xff] %v8306_v59 }
  0xbd   : > { %vm8403_vm10 = vmand %vm8353_vm7, %vm942_vm13 }
  0xbe   : > { %vm8423_vm13 = vmand %vm8367_vm5, %vm973_vm14  ;;  %vm12073_vm14 = vcmp.le.f32.partialorder %v8145_v29, 16.0  ;;  %vm12074_vm5 = vcmp.ge.f32.partialorder %v8145_v29, 1.0 }
  0xbf   : > { %vm8431_vm7 = vmand %vm892_vm15, %vm908_vm0  ;;  %vm949_vm15 = vcmp.ge.f32.partialorder %v8224_v30, 1.0 }
  0xc0   : > { %vm8447_vm12 = vmand %vm12074_vm5, %vm12073_vm14  ;;  %vm12080_vm14 = vcmp.le.f32.partialorder %v8179_v0, 16.0  ;;  %v8609_v0 = vadd.f32 128.0, %v8212_v20 }
  0xc1   : > { %vm8469_vm5 = vmand %vm8386_vm4, %vm12080_vm14  ;;  %vm12090_vm14 = vcmp.ge.f32.partialorder %v8191_v10, 1.0 }
  0xc2   : > { %vm8487_vm4 = vmand %vm8431_vm7, %vm12084_vm3  ;;  %vm12087_vm3 = vcmp.le.f32.partialorder %v8182_v1, 16.0 }
  0xc3   : > { %vm8509_vm7 = vmand %vm8403_vm10, %vm12087_vm3  ;;  %v12128_v25 = vld [vmem:[#allocation23_spill] sm:$0xff] }
  0xc4   : > { %vm8517_vm0 = vmand %vm8447_vm12, %vm12090_vm14  ;;  %vm976_vm12 = vcmp.le.f32.partialorder %v8210_v9, 16.0 }
  0xc5   : > { %vm8538_vm10 = vmand %vm895_vm2, %vm911_vm1  ;;  %vm12095_vm1 = vcmp.ge.f32.partialorder %v8151_v36, 1.0 }
  0xc6   : > { %vm8556_vm2 = vmand %vm12095_vm1, %vm914_vm6 }
  0xc7   : > { %vm8570_vm6 = vmand %vm8487_vm4, %vm972_vm8  ;;  %vm12102_vm8 = vcmp.ge.f32.partialorder %v8199_v13, 1.0 }
  0xc8   : > { %vm8587_vm1 = vmand %vm8517_vm0, %vm977_vm9  ;;  %vm12124_vm0 = vcmp.le.f32.partialorder %v8157_v40, 16.0 }
  0xc9   : > { %vm8595_vm4 = vmand %vm8538_vm10, %vm12102_vm8  ;;  %vm12110_vm10 = vcmp.le.f32.partialorder %v8153_v37, 16.0  ;;  %vm12111_vm8 = vcmp.ge.f32.partialorder %v8153_v37, 1.0 }
  0xca   : > { %vm8617_vm9 = vmand %vm8556_vm2, %vm946_vm11  ;;  %vm12121_vm2 = vcmp.le.f32.partialorder %v8207_v17, 16.0  ;;  %vm12136_vm11 = vcmp.ge.f32.partialorder %v8162_v45, 1.0 }
  0xcb   : > { %vm8631_vm3 = vmand %vm12111_vm8, %vm12110_vm10  ;;  %vm12117_vm10 = vcmp.le.f32.partialorder %v8199_v13, 16.0 }
  0xcc   : > { %vm8650_vm8 = vmand %vm8595_vm4, %vm12117_vm10  ;;  %vm12125_vm4 = vcmp.ge.f32.partialorder %v8157_v40, 1.0 }
  0xcd   : > { %vm8669_vm10 = vmand %vm12125_vm4, %vm12124_vm0  ;;  %vm12134_vm4 = vcmask 257024  }
  0xd7   : > { %v8217_v23 = vpop.f32.mrf.mxu1 }
  0xd8   : > { %v8196_v42 = vpop.f32.mrf.mxu0  ;;  %12031 = vst [vmem:[#allocation13_spill] sm:$0xff] %v8217_v23  ;;  %v1712_v23 = vadd.f32 0.5, %v8265_v61 }
  0xd9   : > { %v8245_v43 = vpop.f32.mrf.mxu1 }
  0xda   : > { %v8219_v27 = vpop.f32.mrf.mxu0  ;;  %12032 = vst [vmem:[#allocation14_spill] sm:$0xff] %v8245_v43  ;;  %v1723_v43 = vmul.f32 0.055555556, %v1707_v3  ;;  %v1722_v3 = vmul.f32 0.055555556, %v1706_v55  ;;  %v873_v55 = vmul.f32 18.0, %v8292_v54 }
  0xdb   : > { %v8267_v14 = vpop.f32.mrf.mxu1  ;;  %v1728_v38 = vmul.f32 0.055555556, %v1712_v23 }
  0xdc   : > { %v8247_v44 = vpop.f32.mrf.mxu0  ;;  %12036 = vst [vmem:[#allocation18_spill] sm:$0xff] %v8267_v14  ;;  %v8296_v14 = vadd.f32 128.0, %v8124_v5  ;;  %v1710_v5 = vadd.f32 0.5, %v8275_v19 }
  0xdd   : > { %v8285_v52 = vpop.f32.mrf.mxu1  ;;  %v8413_v7 = vfloor.f32 %v1728_v38 }
  0xde   : > { %v8269_v24 = vpop.f32.mrf.mxu0  ;;  %12039 = vst [vmem:[#allocation21_spill] sm:$0xff] %v8285_v52  ;;  %12042 = vst [vmem:[#allocation24_spill] sm:$0xff] %v8296_v14  ;;  %v1709_v52 = vadd.f32 0.5, %v8262_v11  ;;  %v1713_v16 = vadd.f32 0.5, %v8296_v14  ;;  %v1726_v23 = vmul.f32 0.055555556, %v1710_v5 }
  0xdf   : > { %12037 = vst [vmem:[#allocation19_spill] sm:$0xff] %v8269_v24  ;;  %v8301_v51 = vpop.f32.mrf.mxu1  ;;  %v1715_v24 = vadd.f32 0.5, %v8283_v32  ;;  %12067 = vst [vmem:[#allocation37_spill] sm:$0xff] %v8413_v7 }
  0xe0   : > { %v8287_v48 = vpop.f32.mrf.mxu0  ;;  %v1725_v58 = vmul.f32 0.055555556, %v1709_v52  ;;  %v482_v28 = vadd.f32 %v8301_v51, %v8196_v42 }
  0xe1   : > { %12040 = vst [vmem:[#allocation22_spill] sm:$0xff] %v8287_v48  ;;  %v1724_v48 = vmul.f32 0.055555556, %v1708_v18  ;;  %v8314_v50 = vpop.f32.mrf.mxu1  ;;  %v8341_v18 = vfloor.f32 %v840_v2  ;;  %v871_v2 = vmul.f32 18.0, %v8306_v59  ;;  %v8374_v59 = vfloor.f32 %v1722_v3 }
  0xe2   : > { %v8303_v47 = vpop.f32.mrf.mxu0  ;;  %v8392_v3 = vsub.f32 %v8170_v53, %v873_v55 }
  0xe3   : > { %12043 = vst [vmem:[#allocation25_spill] sm:$0xff] %v8303_v47  ;;  %12051 = vst [vmem:[#allocation29_spill] sm:$0xff] %v8341_v18  ;;  %v8345_v54 = vpop.f32.mrf.mxu1  ;;  %v8361_v52 = vfloor.f32 %v1724_v48  ;;  %v1731_v48 = vmul.f32 0.055555556, %v1715_v24  ;;  %v1729_v24 = vmul.f32 0.055555556, %v1713_v16  ;;  %v8437_v38 = vsub.f32 %v8185_v4, %v871_v2 }
  0xe4   : > { %v8316_v47 = vpop.f32.mrf.mxu0  ;;  %12060 = vst [vmem:[#allocation34_spill] sm:$0xff] %v8374_v59  ;;  %v872_v55 = vmul.f32 18.0, %v8341_v18  ;;  %v8455_v2 = vsub.f32 %v8194_v12, %v874_v26 }
  0xe5   : > { %12046 = vst [vmem:[#allocation28_spill] sm:$0xff] %v8316_v47  ;;  %v8343_v47 = vfloor.f32 %v1723_v43  ;;  %v8359_v43 = vfloor.f32 %v1721_v63  ;;  %12057 = vst [vmem:[#allocation33_spill] sm:$0xff] %v8361_v52  ;;  %v8376_v63 = vfloor.f32 %v1727_v46  ;;  %v8378_v5 = vpop.f32.mrf.mxu1  ;;  %v8394_v46 = vor.u32 %v2658_v62, %v2654_v57 }
  0xe6   : > { %v8347_v14 = vpop.f32.mrf.mxu0  ;;  %v8411_v62 = vfloor.f32 %v1725_v58  ;;  %12077 = vst [vmem:[#allocation39_spill] sm:$0xff] %v8455_v2  ;;  %v8474_v26 = vfloor.f32 %v1729_v24  ;;  %v8494_v15 = vsub.f32 %v8212_v20, %v872_v55  ;;  %v1760_v24 = vmul.f32 18.0, %v8413_v7 }
  0xe7   : > { %12052 = vst [vmem:[#allocation30_spill] sm:$0xff] %v8343_v47  ;;  %12053 = vst [vmem:[#allocation31_spill] sm:$0xff] %v8347_v14  ;;  %v1755_v57 = vmul.f32 18.0, %v8343_v47  ;;  %v8415_v16 = vpop.f32.mrf.mxu1  ;;  %v1753_v56 = vmul.f32 18.0, %v8359_v43  ;;  %v1756_v14 = vmul.f32 18.0, %v8361_v52  ;;  %v8441_v47 = vfloor.f32 %v1726_v23 }
  0xe8   : > { %12056 = vst [vmem:[#allocation32_spill] sm:$0xff] %v8359_v43  ;;  %12061 = vst [vmem:[#allocation35_spill] sm:$0xff] %v8376_v63  ;;  %v8380_v32 = vpop.f32.mrf.mxu0  ;;  %v1754_v23 = vmul.f32 18.0, %v8374_v59  ;;  %v1759_v52 = vmul.f32 18.0, %v8376_v63  ;;  %v8459_v43 = vfloor.f32 %v1731_v48  ;;  %v1716_v63 = vadd.f32 0.5, %v8397_v60 }
  0xe9   : > { %12064 = vst [vmem:[#allocation36_spill] sm:$0xff] %v8394_v46  ;;  %v8461_v29 = vpop.f32.mrf.mxu1  ;;  %12083 = vst [vmem:[#allocation42_spill] sm:$0xff] %v8474_v26  ;;  %v8478_v48 = vadd.f32 128.0, %v8129_v8  ;;  %v8481_v59 = vadd.f32 128.0, %v8170_v53  ;;  %v8497_v8 = vsub.f32 %v8215_v22, %v1755_v57  ;;  %v1757_v53 = vmul.f32 18.0, %v8411_v62 }
  0xea   : > { %v8417_v46 = vpop.f32.mrf.mxu0  ;;  %12078 = vst [vmem:[#allocation40_spill] sm:$0xff] %v8459_v43  ;;  %v8523_v55 = vsub.f32 %v8228_v33, %v1753_v56  ;;  %v8526_v1 = vsub.f32 %v8231_v34, %v1756_v14  ;;  %v1758_v21 = vmul.f32 18.0, %v8441_v47  ;;  %v8530_v57 = vadd.f32 128.0, %v8185_v4 }
  0xeb   : > { %12068 = vst [vmem:[#allocation38_spill] sm:$0xff] %v8417_v46  ;;  %v8501_v2 = vpop.f32.mrf.mxu1  ;;  %v8544_v33 = vsub.f32 %v8240_v39, %v1754_v23  ;;  %v8547_v34 = vsub.f32 %v8243_v41, %v1759_v52  ;;  %v1763_v4 = vmul.f32 18.0, %v8459_v43  ;;  %v1761_v42 = vmul.f32 18.0, %v8474_v26 }
  0xec   : > { %v8463_v46 = vpop.f32.mrf.mxu0  ;;  %v1732_v39 = vmul.f32 0.055555556, %v1716_v63  ;;  %v1714_v41 = vadd.f32 0.5, %v8478_v48  ;;  %v1719_v52 = vadd.f32 0.5, %v8481_v59  ;;  %v474_v14 = vadd.f32 %v8314_v50, %v8219_v27 }
  0xed   : > { %12079 = vst [vmem:[#allocation41_spill] sm:$0xff] %v8463_v46  ;;  %v8550_v56 = vpop.f32.mrf.mxu1  ;;  %v8576_v63 = vsub.f32 %v8262_v11, %v1757_v53  ;;  %v8579_v26 = vsub.f32 %v8265_v61, %v1760_v24  ;;  %v8602_v61 = vsub.f32 %v8275_v19, %v1758_v21  ;;  %v1717_v10 = vadd.f32 0.5, %v8530_v57 }
  0xee   : > { %v8503_v58 = vpop.f32.mrf.mxu0  ;;  %v8606_v11 = vadd.f32 128.0, %v8194_v12  ;;  %v485_v7 = vadd.f32 %v8345_v54, %v8247_v44  ;;  %v12108_v12 = vld [vmem:[#allocation20_spill] sm:$0xff]  ;;  %v1730_v31 = vmul.f32 0.055555556, %v1714_v41 }
  0xef   : > { %v8581_v43 = vpop.f32.mrf.mxu1  ;;  %12105 = vst [vmem:[#allocation43_spill] sm:$0xff] %v8602_v61  ;;  %v8623_v22 = vsub.f32 %v12108_v12, %v1763_v4  ;;  %v12114_v44 = vld [vmem:[#allocation12_spill] sm:$0xff]  ;;  %v8640_v4 = vfloor.f32 %v1732_v39  ;;  %v1733_v27 = vmul.f32 0.055555556, %v1717_v10 }
  0xf0   : > { %v7114_v51 = vpop.f32.mrf.mxu0  ;;  %v1720_v17 = vadd.f32 0.5, %v8606_v11  ;;  %v12133_v10 = vld [vmem:[#allocation16_spill] sm:$0xff]  ;;  %v8703_v54 = vfloor.f32 %v1730_v31 }
  0xf1   : > { %v748_v23 = vadd.f32 %v7114_v51, %v482_v28  ;;  %12109 = vst [vmem:[#allocation20_spill] sm:$0xff] %v8623_v22  ;;  %v8625_v20 = vpop.f32.mrf.mxu1  ;;  %v12115_v28 = vld [vmem:[#allocation24_spill] sm:$0xff]  ;;  %v8732_v13 = vfloor.f32 %v1733_v27  ;;  %v12150_v27 = vld [vmem:[#allocation26_spill] sm:$0xff] }
  0xf2   : > { %v683_v50 = vpop.f32.mrf.mxu0  ;;  %v8638_v51 = vsub.f32 %v12115_v28, %v1761_v42  ;;  %v12120_v42 = vld [vmem:[#allocation15_spill] sm:$0xff] }
  0xf3   : > { %v1005_v53 = vmax.f32 %v748_v23, 0.0  ;;  %v746_v24 = vadd.f32 %v683_v50, %v474_v14  ;;  %v1735_v14 = vmul.f32 0.055555556, %v1719_v52  ;;  %v12116_v23 = vld [vmem:[#allocation19_spill] sm:$0xff]  ;;  %v8655_v41 = vpop.f32.mrf.mxu1  ;;  %12145 = vst [vmem:[#allocation24_spill] sm:$0xff] %v8732_v13 }
  0xf4   : > { %v7115_v21 = vpop.f32.mrf.mxu0  ;;  %v477_v50 = vadd.f32 %v8378_v5, %v12116_v23 }
  0xf5   : > { %v1021_v37 = vsel %vm8423_vm13, %v1005_v53, 0.0  ;;  %v1003_v12 = vmax.f32 %v746_v24, 0.0  ;;  %v749_v22 = vadd.f32 %v7115_v21, %v485_v7  ;;  %vm8661_vm13 = vmand %vm8617_vm9, %vm12121_vm2  ;;  %v1718_v7 = vadd.f32 0.5, %v8609_v0  ;;  %v12129_v53 = vld [vmem:[#allocation22_spill] sm:$0xff] }
  0xf6   : > { %v6846_v39 = vpack.c.bf16 %v1021_v37, %v1021_v37  ;;  %v686_v52 = vpop.f32.mrf.mxu0  ;;  %v498_v24 = vadd.f32 %v8415_v16, %v12129_v53  ;;  %vm12130_vm9 = vcmp.ge.f32.partialorder %v8210_v9, 1.0  ;;  %vm948_vm2 = vcmp.ge.f32.partialorder %v12133_v10, 1.0  ;;  %v8691_v37 = vpop.f32.mrf.mxu1 }
  0xf7   : > { %v1019_v19 = vsel %vm8469_vm5, %v1003_v12, 0.0  ;;  %v1006_v40 = vmax.f32 %v749_v22, 0.0  ;;  %v747_v21 = vadd.f32 %v686_v52, %v477_v50  ;;  %vm8685_vm0 = vmand %vm8631_vm3, %vm12130_vm9  ;;  %vm12135_vm5 = vcmp.le.f32.partialorder %v8162_v45, 16.0  ;;  %v12140_v12 = vld [vmem:[#allocation25_spill] sm:$0xff] }
  0xf8   : > { %1101 = vst.msk [vmem:[#allocation2 + $0x14] sm:$0xf] %vm12134_vm4, %v6846_v39  ;;  %v6844_v23 = vpack.c.bf16 %v1019_v19, %v1019_v19  ;;  %v7118_v16 = vpop.f32.mrf.mxu0  ;;  %vm8697_vm14 = vmand %vm12136_vm11, %vm12135_vm5  ;;  %vm982_vm3 = vcmp.le.f32.partialorder %v12120_v42, 16.0  ;;  %v1764_v22 = vmul.f32 18.0, %v8640_v4  ;;  %v8705_v50 = vfloor.f32 %v1735_v14  ;;  %v8721_v14 = vpop.f32.mrf.mxu1 }
  0xf9   : > { %v490_v39 = vadd.f32 %v8461_v29, %v12140_v12  ;;  %v1022_v52 = vsel %vm8509_vm7, %v1006_v40, 0.0  ;;  %v1004_v53 = vmax.f32 %v747_v21, 0.0  ;;  %v752_v45 = vadd.f32 %v7118_v16, %v498_v24  ;;  %vm8715_vm11 = vmand %vm8669_vm10, %vm949_vm15  ;;  %v12146_v21 = vld [vmem:[#allocation28_spill] sm:$0xff] }
  0xfa   : > { %12139 = vst [vmem:[#allocation12_spill] sm:$0xff] %v8705_v50  ;;  %1099 = vst.msk [vmem:[#allocation2 + $0xc] sm:$0xf] %vm12134_vm4, %v6844_v23  ;;  %v6847_v31 = vpack.c.bf16 %v1022_v52, %v1022_v52  ;;  %v699_v29 = vpop.f32.mrf.mxu0  ;;  %v1736_v24 = vmul.f32 0.055555556, %v1720_v17  ;;  %v501_v23 = vadd.f32 %v8501_v2, %v12146_v21  ;;  %vm12147_vm10 = vcmp.ge.f32.partialorder %v8236_v35, 1.0  ;;  %v521_v17 = vpop.f32.mrf.mxu1 }
  0xfb   : > { %vm8727_vm7 = vmand %vm8685_vm0, %vm976_vm12  ;;  %v1734_v40 = vmul.f32 0.055555556, %v1718_v7  ;;  %v1020_v16 = vsel %vm8570_vm6, %v1004_v53, 0.0  ;;  %v1009_v12 = vmax.f32 %v752_v45, 0.0  ;;  %v750_v9 = vadd.f32 %v699_v29, %v490_v39  ;;  %v12155_v53 = vld [vmem:[#allocation31_spill] sm:$0xff] }
  0xfc   : > { %vm8742_vm12 = vmand %vm8697_vm14, %vm12147_vm10  ;;  %1102 = vst.msk [vmem:[#allocation2 + $0x18] sm:$0xf] %vm12134_vm4, %v6847_v31  ;;  %v6845_v2 = vpack.c.bf16 %v1020_v16, %v1020_v16  ;;  %v7119_v36 = vpop.f32.mrf.mxu0  ;;  %vm12151_vm6 = vcmp.le.f32.partialorder %v8224_v30, 16.0  ;;  %v8759_v18 = vsub.f32 %v8397_v60, %v1764_v22  ;;  %v8762_v39 = vmul.f32 18.0, %v8703_v54  ;;  %v12160_v22 = vld [vmem:[#allocation27_spill] sm:$0xff]  ;;  %v7109_v6 = vpop.f32.mrf.mxu1 }
  0xfd   : > { %vm8753_vm15 = vmand %vm8715_vm11, %vm12151_vm6  ;;  %v8765_v52 = vmul.f32 18.0, %v8705_v50  ;;  %v493_v30 = vadd.f32 %v8550_v56, %v12155_v53  ;;  %v1025_v45 = vsel %vm8587_vm1, %v1009_v12, 0.0  ;;  %v1007_v19 = vmax.f32 %v750_v9, 0.0 }
  0xfe   : > { %12154 = vst [vmem:[#allocation19_spill] sm:$0xff] %v8759_v18  ;;  %v753_v31 = vadd.f32 %v7119_v36, %v501_v23  ;;  %vm12156_vm11 = vcmp.le.f32.partialorder %v8166_v49, 16.0  ;;  %vm12157_vm10 = vcmp.ge.f32.partialorder %v8166_v49, 1.0  ;;  %vm11989_vm6 = vsmask.f32 7424  ;;  %v702_v29 = vpop.f32.mrf.mxu0  ;;  %v12171_v36 = vld [vmem:[#allocation29_spill] sm:$0xff] }
  0xff   : > { %vm8775_vm4 = vmand %vm12157_vm10, %vm12156_vm11  ;;  %vm906_vm14 = vcmp.ge.f32.partialorder %v12160_v22, 1.0  ;;  %vm922_vm0 = vcmp.le.f32.partialorder %v12160_v22, 16.0  ;;  %vm12161_vm5 = vcmask 257024   ;;  %v6850_v56 = vpack.c.bf16 %v1025_v45, %v1025_v45 }
 0x100   : > { %1100 = vst.msk [vmem:[#allocation2 + $0x10] sm:$0xf] %vm12161_vm5, %v6845_v2  ;;  %vm12162_vm1 = vcmp.le.f32.partialorder %v8236_v35, 16.0  ;;  %v8792_v21 = vmul.f32 18.0, %v8732_v13  ;;  %v8794_v23 = vfloor.f32 %v1736_v24  ;;  %v8796_v16 = vfloor.f32 %v1734_v40  ;;  %v2589_v24 = vld [vmem:[#allocation2 + $0x8] sm:$0xf] }
 0x101   : > { %vm8786_vm9 = vmand %vm8742_vm12, %vm12162_vm1  ;;  %v514_v12 = vadd.f32 %v8581_v43, %v8380_v32  ;;  %v1023_v35 = vsel %vm8650_vm8, %v1007_v19, 0.0  ;;  %v1010_v9 = vmax.f32 %v753_v31, 0.0  ;;  %v751_v28 = vadd.f32 %v702_v29, %v493_v30  ;;  %v12172_v40 = vld [vmem:[#allocation38_spill] sm:$0xff]  ;;  %v12173_v43 = vld [vmem:[#allocation41_spill] sm:$0xff]  ;;  %v524_v30 = vpop.f32.mrf.mxu1 }
 0x102   : > { %12165 = vst [vmem:[#allocation15_spill] sm:$0xff] %v8794_v23  ;;  %12166 = vst [vmem:[#allocation23_spill] sm:$0xff] %v8796_v16  ;;  %vm12167_vm12 = vcmp.le.f32.partialorder %v12114_v44, 16.0  ;;  %vm12168_vm5 = vcmp.ge.f32.partialorder %v12114_v44, 1.0  ;;  %v506_v32 = vadd.f32 %v8625_v20, %v12172_v40  ;;  %v517_v61 = vadd.f32 %v8655_v41, %v12173_v43  ;;  %v7122_v44 = vpop.f32.mrf.mxu0  ;;  %v12178_v19 = vld [vmem:[#allocation39_spill] sm:$0xff]  ;;  %v12179_v31 = vld [vmem:[#allocation4_spill] sm:$0xff] }
 0x103   : > { %vm8806_vm10 = vmand %vm12168_vm5, %vm12167_vm12  ;;  %vm12174_vm8 = vcmask 257024   ;;  %v6848_v53 = vpack.c.bf16 %v1023_v35, %v1023_v35  ;;  %vm12175_vm12 = vcmp.ge.f32.partialorder %v12120_v42, 1.0  ;;  %v8827_v20 = vadd.f32 256.0, %v12179_v31  ;;  %v2590_v40 = vld [vmem:[#allocation2 + $0xc] sm:$0xf] }
 0x104   : > { %1105 = vst.msk [vmem:[#allocation2 + $0x24] sm:$0xf] %vm12174_vm8, %v6850_v56  ;;  %vm8821_vm5 = vmand %vm8775_vm4, %vm12175_vm12  ;;  %v509_v41 = vadd.f32 %v8691_v37, %v8503_v58  ;;  %v1026_v56 = vsel %vm8661_vm13, %v1010_v9, 0.0  ;;  %v1008_v29 = vmax.f32 %v751_v28, 0.0  ;;  %v756_v35 = vadd.f32 %v7122_v44, %v514_v12  ;;  %v12185_v43 = vld [vmem:[#allocation13_spill] sm:$0xff]  ;;  %v12186_v37 = vld [vmem:[#allocation14_spill] sm:$0xff]  ;;  %v8848_v9 = vpop.f32.mrf.mxu1  ;;  %v715_v28 = vpop.f32.mrf.mxu0 }
 0x105   : > { %12180 = vst [vmem:[#allocation22_spill] sm:$0xff] %v8827_v20  ;;  %vm12181_vm8 = vcmp.le.f32.partialorder %v12128_v25, 16.0  ;;  %vm12182_vm4 = vcmp.ge.f32.partialorder %v12128_v25, 1.0  ;;  %vm983_vm1 = vcmp.le.f32.partialorder %v8437_v38, 16.0  ;;  %vm12004_vm11 = vcmask 1042432  }
 0x106   : > { %vm8837_vm12 = vmand %vm12182_vm4, %vm12181_vm8  ;;  %v530_v58 = vadd.f32 %v8721_v14, %v12185_v43  ;;  %v8845_v5 = vadd.f32 %v521_v17, %v12186_v37  ;;  %vm12187_vm13 = vcmask 257024   ;;  %v6851_v12 = vpack.c.bf16 %v1026_v56, %v1026_v56  ;;  %v12191_v14 = vld [vmem:[#allocation18_spill] sm:$0xff]  ;;  %v8876_v37 = vpop.f32.mrf.mxu1  ;;  %v7123_v46 = vpop.f32.mrf.mxu0 }
 0x107   : > { %1103 = vst.msk [vmem:[#allocation2 + $0x1c] sm:$0xf] %vm12187_vm13, %v6848_v53  ;;  %vm8854_vm8 = vmand %vm8806_vm10, %vm948_vm2  ;;  %v8858_v44 = vcombine.low %v2589_v24, %v2590_v40  ;;  %vm952_vm4 = vcmp.ge.f32.partialorder %v8494_v15, 1.0  ;;  %v8862_v17 = vadd.f32 %v7109_v6, %v12191_v14  ;;  %v1024_v53 = vsel %vm8727_vm7, %v1008_v29, 0.0  ;;  %v2592_v24 = vld [vmem:[#allocation2 + $0x14] sm:$0xf] }
 0x108   : > { %v1013_v31 = vmax.f32 %v756_v35, 0.0  ;;  %v754_v56 = vadd.f32 %v715_v28, %v506_v32  ;;  %vm8870_vm2 = vmand %vm8821_vm5, %vm982_vm3  ;;  %v2593_v43 = vld [vmem:[#allocation2 + $0x18] sm:$0xf]  ;;  %1106 = vst.msk [vmem:[#allocation2 + $0x28] sm:$0xf] %vm12187_vm13, %v6851_v12  ;;  %v6849_v6 = vpack.c.bf16 %v1024_v53, %v1024_v53  ;;  %vm12194_vm7 = vcmp.ge.f32.partialorder %v8392_v3, 1.0  ;;  %v718_v7 = vpop.f32.mrf.mxu0 }
 0x109   : > { %12190 = vst [vmem:[#allocation16_spill] sm:$0xff] %v8858_v44  ;;  %vm8883_vm3 = vmand %vm8837_vm12, %vm12194_vm7  ;;  %v2661_v45 = vshll.u32 %v8858_v44, 16  ;;  %v8888_v29 = vcombine.low %v2592_v24, %v2593_v43  ;;  %v12197_v35 = vld [vmem:[#allocation21_spill] sm:$0xff]  ;;  %v757_v53 = vadd.f32 %v7123_v46, %v517_v61  ;;  %vm12198_vm5 = vcmp.le.f32.partialorder %v12133_v10, 16.0 }
 0x10a   : > { %v8891_v12 = vadd.f32 %v524_v30, %v12197_v35  ;;  %v1029_v28 = vsel %vm8753_vm15, %v1013_v31, 0.0  ;;  %v1011_v14 = vmax.f32 %v754_v56, 0.0  ;;  %vm8899_vm12 = vmand %vm8854_vm8, %vm12198_vm5  ;;  %v2591_v32 = vld [vmem:[#allocation2 + $0x10] sm:$0xf]  ;;  %vm984_vm13 = vcmp.le.f32.partialorder %v8494_v15, 16.0  ;;  %v8905_v35 = vpop.f32.mrf.mxu1 }
 0x10b   : > { %vm12201_vm7 = vcmask 257024   ;;  %v6854_v30 = vpack.c.bf16 %v1029_v28, %v1029_v28  ;;  %v12202_v31 = vrot.slane %v8858_v44, 1  ;;  %v12203_v61 = vld [vmem:[#allocation17_spill] sm:$0xff]  ;;  %vm12205_vm15 = vcmask 1046528  }
 0x10c   : > { %1104 = vst.msk [vmem:[#allocation2 + $0x20] sm:$0xf] %vm12201_vm7, %v6849_v6  ;;  %v12204_v56 = vrot.slane %v12203_v61, 1  ;;  %v2663_v25 = vrot.slane %v2661_v45, 1  ;;  %vm12206_vm8 = vcmp.le.f32.partialorder %v12150_v27, 16.0  ;;  %vm12207_vm5 = vcmp.ge.f32.partialorder %v12150_v27, 1.0  ;;  %v8936_v49 = vpop.f32.mrf.mxu1 }
 0x10d   : > { %vm8916_vm10 = vmand %vm12207_vm5, %vm12206_vm8  ;;  %v8920_v6 = vcombine.low %v2591_v32, %v2592_v24  ;;  %v1027_v28 = vsel %vm8786_vm9, %v1011_v14, 0.0  ;;  %v1014_v13 = vmax.f32 %v757_v53, 0.0  ;;  %v755_v50 = vadd.f32 %v718_v7, %v509_v41  ;;  %v7126_v14 = vpop.f32.mrf.mxu0  ;;  %v12215_v41 = vld [vmem:[#allocation36_spill] sm:$0xff] }
 0x10e   : > { %v2747_v10 = vsel %vm12205_vm15, %v12204_v56, %v12202_v31  ;;  %vm12211_vm7 = vcmp.le.f32.partialorder %v8392_v3, 16.0  ;;  %v8933_v45 = vcombine.low %v2590_v40, %v2591_v32  ;;  %vm12214_vm8 = vcmask 257024   ;;  %vm8944_vm9 = vmand %vm906_vm14, %vm922_vm0  ;;  %v2594_v61 = vld [vmem:[#allocation2 + $0x1c] sm:$0xf]  ;;  %v12237_v27 = vld [vmem:[#allocation32_spill] sm:$0xff] }
 0x10f   : > { %12210 = vst [vmem:[#allocation25_spill] sm:$0xff] %v8920_v6  ;;  %2762 = vrot.lane.b32.xlu1 %v2747_v10, %s7764_s9  ;;  %vm8929_vm15 = vmand %vm8883_vm3, %vm12211_vm7  ;;  %v6852_v24 = vpack.c.bf16 %v1027_v28, %v1027_v28  ;;  %v2664_v53 = vsel %vm11989_vm6, %v12215_v41, %v2663_v25  ;;  %v11990_v40 = vrot.slane %v8888_v29, 5  ;;  %v2665_v32 = vshrl.u32 %v8858_v44, 16  ;;  %v731_v2 = vpop.f32.mrf.mxu0 }
 0x110   : > { %1109 = vst.msk [vmem:[#allocation2 + $0x34] sm:$0xf] %vm12214_vm8, %v6854_v30  ;;  %v1030_v42 = vsel %vm8870_vm2, %v1014_v13, 0.0  ;;  %v1012_v30 = vmax.f32 %v755_v50, 0.0  ;;  %v760_v7 = vadd.f32 %v7126_v14, %v530_v58  ;;  %2724 = vrot.lane.b32.xlu0 %v2664_v53, %s7765_s10  ;;  %vm12218_vm3 = vcmp.ge.f32.partialorder %v8437_v38, 1.0  ;;  %v7626_v13 = vld [vmem:[%s11933_s2 + $0x58] sm:$0xff]   ;;  %vm12221_vm14 = vmmov %vm12214_vm8  ;;  %v8966_v58 = vpop.f32.mrf.mxu1 }
 0x111   : > { %vm8957_vm0 = vmand %vm8916_vm10, %vm12218_vm3  ;;  %v2946_v31 = vrot.slane %v8933_v45, 5  ;;  %1107 = vst.msk [vmem:[#allocation2 + $0x2c] sm:$0xf] %vm12221_vm14, %v6852_v24  ;;  %v6855_v50 = vpack.c.bf16 %v1030_v42, %v1030_v42  ;;  %v8968_v56 = vcombine.low %v2593_v43, %v2594_v61  ;;  %vm12222_vm2 = vcmp.le.f32.partialorder %v12171_v36, 16.0  ;;  %v12229_v53 = vld [vmem:[#allocation30_spill] sm:$0xff]  ;;  %7248 = vmatprep.subr.bf16.mxu1 %v7626_v13  ;;  %v7127_v42 = vpop.f32.mrf.mxu0 }
 0x112   : > { %vm12223_vm10 = vcmp.ge.f32.partialorder %v12171_v36, 1.0  ;;  %v2669_v46 = vshll.u32 %v8920_v6, 16  ;;  %v2748_v28 = vrot.slane %v8920_v6, 1  ;;  %v1028_v24 = vsel %vm8899_vm12, %v1012_v30, 0.0  ;;  %v9003_v3 = vpop.f32.mrf.mxu1  ;;  %7249 = vmatpush3.bf16.msra.mxu1 %v7626_v13 }
 0x113   : > { %vm8974_vm5 = vmand %vm12223_vm10, %vm12222_vm2  ;;  %v1017_v14 = vmax.f32 %v760_v7, 0.0  ;;  %v758_v41 = vadd.f32 %v731_v2, %v8845_v5  ;;  %2963 = vrot.lane.b32.xlu1 %v2946_v31, %s7764_s9  ;;  %vm12226_vm7 = vcmp.ge.f32.partialorder %v12178_v19, 1.0  ;;  %v2667_v43 = vor.u32 %v2665_v32, %v2663_v25 }
 0x114   : > { %vm8988_vm8 = vmand %vm8944_vm9, %vm12226_vm7  ;;  %vm1787_vm3 = vcmp.ge.f32.partialorder %v12229_v53, 1.0  ;;  %vm1803_vm14 = vcmp.le.f32.partialorder %v12229_v53, 16.0  ;;  %vm12230_vm12 = vcmask 257024   ;;  %v6853_v60 = vpack.c.bf16 %v1028_v24, %v1028_v24  ;;  %v9041_v10 = vpop.f32.mrf.mxu1  ;;  %v734_v24 = vpop.f32.mrf.mxu0 }
 0x115   : > { %1110 = vst.msk [vmem:[#allocation2 + $0x38] sm:$0xf] %vm12230_vm12, %v6855_v50  ;;  %vm8999_vm2 = vmand %vm8957_vm0, %vm983_vm1  ;;  %v2948_v25 = vsel %vm12004_vm11, %v2946_v31, %v11990_v40  ;;  %v9008_v32 = vrot.slane %v2669_v46, 1  ;;  %v12233_v30 = vrot.slane %v8858_v44, 1  ;;  %vm12234_vm9 = vcmask 1046528   ;;  %v9096_v44 = vld [vmem:[#allocation2 + $0x24] sm:$0xff]  }
 0x116   : > { %v1033_v7 = vsel %vm8929_vm15, %v1017_v14, 0.0  ;;  %v1015_v22 = vmax.f32 %v758_v41, 0.0  ;;  %v761_v50 = vadd.f32 %v7127_v42, %v8862_v17  ;;  %2965 = vrot.lane.b32.xlu0 %v2948_v25, %s7764_s9  ;;  %vm9023_vm1 = vmand %vm8974_vm5, %vm952_vm4  ;;  %v2854_v2 = vshrl.u32 %v8933_v45, 16  ;;  %v9028_v46 = vld [vmem:[#allocation2 + $0x20] sm:$0xf] }
 0x117   : > { %v2749_v38 = vsel %vm12234_vm9, %v12233_v30, %v2748_v28  ;;  %vm12005_vm0 = vsmask.f32 3328  ;;  %vm1785_vm15 = vcmp.ge.f32.partialorder %v12237_v27, 1.0  ;;  %vm1801_vm10 = vcmp.le.f32.partialorder %v12237_v27, 16.0  ;;  %vm12238_vm7 = vmmov %vm12230_vm12 }
 0x118   : > { %1108 = vst.msk [vmem:[#allocation2 + $0x30] sm:$0xf] %vm12238_vm7, %v6853_v60  ;;  %v6858_v17 = vpack.c.bf16 %v1033_v7, %v1033_v7  ;;  %vm12239_vm12 = vcmp.le.f32.partialorder %v12178_v19, 16.0  ;;  %v2672_v14 = vsel %vm11989_vm6, %v2667_v43, %v9008_v32  ;;  %v11993_v41 = vrot.slane %v8968_v56, 1  ;;  %v7628_v19 = vld [vmem:[%s11933_s2 + $0x50] sm:$0xff]   ;;  %v9066_v7 = vpop.f32.mrf.mxu1  ;;  %vm12246_vm6 = vmmov %vm12238_vm7 }
 0x119   : > { %vm9037_vm4 = vmand %vm8988_vm8, %vm12239_vm12  ;;  %v2857_v42 = vshll.u32 %v8933_v45, 16  ;;  %vm1835_vm5 = vcmp.ge.f32.partialorder %v8497_v8, 1.0  ;;  %v1031_v36 = vsel %vm8999_vm2, %v1015_v22, 0.0  ;;  %v1018_v60 = vmax.f32 %v761_v50, 0.0  ;;  %2726 = vrot.lane.b32.xlu1 %v2672_v14, %s7765_s10  ;;  %v12242_v43 = vld [vmem:[#allocation33_spill] sm:$0xff]  ;;  %7250 = vmatprep.subr.bf16.mxu1 %v7628_v19 }
 0x11a   : > { %v759_v25 = vadd.f32 %v734_v24, %v8891_v12  ;;  %v2856_v30 = vrot.slane %v2854_v2, 4  ;;  %vm1788_vm8 = vcmp.ge.f32.partialorder %v12242_v43, 1.0  ;;  %vm1804_vm9 = vcmp.le.f32.partialorder %v12242_v43, 16.0  ;;  %1113 = vst.msk [vmem:[#allocation2 + $0x44] sm:$0xf] %vm12238_vm7, %v6858_v17  ;;  %vm9062_vm12 = vmand %vm9023_vm1, %vm984_vm13  ;;  %v9068_v12 = vpop.f32.mrf.mxu0  ;;  %v9074_v17 = vld [vmem:[#allocation2 + $0x1c] sm:$0xff]   ;;  %2764 = vrot.lane.b32.xlu0 %v2749_v38, %s7764_s9  ;;  %7251 = vmatpush3.bf16.msra.mxu1 %v7628_v19  ;;  %v9086_v13 = vpop.f32.mrf.mxu1 }
 0x11b   : > { %v6856_v45 = vpack.c.bf16 %v1031_v36, %v1031_v36  ;;  %v2859_v22 = vrot.slane %v2857_v42, 5  ;;  %v9071_v50 = vcombine.low %v2594_v61, %v9028_v46  ;;  %v2862_v2 = vshrl.u32 %v8888_v29, 16  ;;  %v3493_v14 = vld [vmem:[#allocation2 + $0x18] sm:$0xf]  ;;  %v7632_v19 = vld [vmem:[%s11933_s2 + $0x48] sm:$0xff]   ;;  %vm12251_vm1 = vmmov %vm12238_vm7 }
 0x11c   : > { %vm1833_vm2 = vcmp.ge.f32.partialorder %v8523_v55, 1.0  ;;  %v1034_v15 = vsel %vm9037_vm4, %v1018_v60, 0.0  ;;  %v1016_v31 = vmax.f32 %v759_v25, 0.0  ;;  %v2865_v24 = vshll.u32 %v8888_v29, 16  ;;  %v12245_v61 = vld [vmem:[#allocation34_spill] sm:$0xff]  ;;  %v9088_v60 = vpop.f32.mrf.mxu0  ;;  %v9112_v18 = vpop.f32.mrf.mxu1  ;;  %7252 = vmatprep.subr.bf16.mxu1 %v7632_v19  ;;  %vm12253_vm7 = vmmov %vm12251_vm1 }
 0x11d   : > { %vm1867_vm13 = vcmp.le.f32.partialorder %v8497_v8, 16.0  ;;  %v2415_v42 = vadd.f32 0.5, %v8827_v20  ;;  %1111 = vst.msk [vmem:[#allocation2 + $0x3c] sm:$0xf] %vm12246_vm6, %v6856_v45  ;;  %v6859_v36 = vpack.c.bf16 %v1034_v15, %v1034_v15  ;;  %vm12247_vm4 = vcmask 1046528   ;;  %12252 = vst [vmem:[#allocation26_spill] sm:$0xff] %v9112_v18 }
 0x11e   : > { %v2751_v38 = vsel %vm12247_vm4, %v2748_v28, %v11993_v41  ;;  %v2864_v40 = vrot.slane %v2862_v2, 4  ;;  %v1032_v45 = vsel %vm9062_vm12, %v1016_v31, 0.0  ;;  %v2860_v15 = vor.u32 %v2859_v22, %v2856_v30  ;;  %v12248_v28 = vld [vmem:[#allocation35_spill] sm:$0xff]  ;;  %v12249_v2 = vld [vmem:[#allocation6_spill] sm:$0xff]  ;;  %v9114_v5 = vpop.f32.mrf.mxu0  ;;  %7253 = vmatpush3.bf16.msra.mxu1 %v7632_v19  ;;  %v12259_v19 = vld [vmem:[#allocation37_spill] sm:$0xff] }
 0x11f   : > { %2766 = vrot.lane.b32.xlu1 %v2751_v38, %s7764_s9  ;;  %v2867_v20 = vrot.slane %v2865_v24, 5  ;;  %vm1865_vm6 = vcmp.le.f32.partialorder %v8523_v55, 16.0  ;;  %v9109_v41 = vadd.f32 256.0, %v12249_v2  ;;  %1114 = vst.msk [vmem:[#allocation2 + $0x48] sm:$0xf] %vm12251_vm1, %v6859_v36  ;;  %v6857_v25 = vpack.c.bf16 %v1032_v45, %v1032_v45  ;;  %vm9193_vm1 = vmand %vm1785_vm15, %vm1801_vm10 }
 0x120   : > { %v3509_v30 = vld [vmem:[#allocation2 + $0x14] sm:$0xe]  ;;  %v9120_v22 = vsub.f32 %v8478_v48, %v8762_v39  ;;  %v9123_v24 = vmul.f32 18.0, %v8794_v23  ;;  %2924 = vrot.lane.b32.xlu0 %v2860_v15, %s7765_s10  ;;  %v2677_v36 = vshll.u32 %v8968_v56, 16  ;;  %v1766_v45 = vmul.f32 18.0, %v8796_v16  ;;  %v9136_v39 = vpop.f32.mrf.mxu1  ;;  %v9138_v2 = vpop.f32.mrf.mxu0  ;;  %vm9227_vm10 = vmand %vm1788_vm8, %vm1804_vm9 }
 0x121   : > { %12250 = vst [vmem:[#allocation28_spill] sm:$0xff] %v9109_v41  ;;  %v9127_v38 = vcombine.low %v3509_v30, %v3493_v14  ;;  %v9133_v48 = vmul.f32 0.055555556, %v2415_v42  ;;  %1112 = vst.msk [vmem:[#allocation2 + $0x40] sm:$0xf] %vm12253_vm7, %v6857_v25  ;;  %v12255_v14 = vrot.slane %v9071_v50, 5  ;;  %v9145_v23 = vor.u32 %v2867_v20, %v2864_v40 }
 0x122   : > { %12254 = vst [vmem:[#allocation31_spill] sm:$0xff] %v9136_v39  ;;  %v12256_v30 = vrot.slane %v8888_v29, 5  ;;  %v3565_v42 = vshll.u32 %v9074_v17, 16  ;;  %vm9153_vm7 = vmand %vm1787_vm3, %vm1803_vm14  ;;  %vm1839_vm4 = vcmp.ge.f32.partialorder %v8547_v34, 1.0  ;;  %v7634_v29 = vld [vmem:[%s11933_s2 + $0x40] sm:$0xff]   ;;  %v2673_v20 = vshrl.u32 %v8920_v6, 16  ;;  %v9177_v18 = vpop.f32.mrf.mxu0 }
 0x123   : > { %v2597_v40 = vld [vmem:[#allocation2 + $0x28] sm:$0xf]  ;;  %vm1866_vm12 = vcmp.le.f32.partialorder %v8544_v33, 16.0  ;;  %v9168_v53 = vsub.f32 %v8481_v59, %v8765_v52  ;;  %v2869_v6 = vsel %vm12005_vm0, %v2860_v15, %v9145_v23  ;;  %v12263_v16 = vrot.slane %v9096_v44, 1  ;;  %7254 = vmatprep.subr.bf16.mxu1 %v7634_v29 }
 0x124   : > { %v2950_v31 = vsel %vm12004_vm11, %v12256_v30, %v12255_v14  ;;  %v9172_v14 = vsub.f32 %v8530_v57, %v8792_v21  ;;  %v2416_v30 = vadd.f32 0.5, %v9109_v41  ;;  %v12264_v39 = vrot.slane %v9074_v17, 1  ;;  %v2596_v21 = vld [vmem:[#allocation2 + $0x24] sm:$0xf]  ;;  %2926 = vrot.lane.b32.xlu0 %v2869_v6, %s7765_s10  ;;  %7255 = vmatpush3.bf16.msra.mxu1 %v7634_v29 }
 0x125   : > { %2967 = vrot.lane.b32.xlu1 %v2950_v31, %s7764_s9  ;;  %12260 = vst [vmem:[#allocation27_spill] sm:$0xff] %v9168_v53  ;;  %v9175_v31 = vpop.f32.mrf.mxu1  ;;  %vm12265_vm14 = vcmask 1046528   ;;  %v9186_v52 = vrot.slane %v2677_v36, 1  ;;  %v3560_v57 = vshll.u32 %v9127_v38, 16  ;;  %vm1837_vm3 = vcmp.ge.f32.partialorder %v8576_v63, 1.0 }
 0x126   : > { %12261 = vst [vmem:[#allocation29_spill] sm:$0xff] %v9172_v14  ;;  %12262 = vst [vmem:[#allocation38_spill] sm:$0xff] %v9175_v31  ;;  %v3652_v59 = vsel %vm12265_vm14, %v12264_v39, %v12263_v16  ;;  %v2675_v16 = vor.u32 %v2673_v20, %v9008_v32  ;;  %v9209_v27 = vcombine.low %v9028_v46, %v2596_v21  ;;  %v2871_v36 = vshrl.u32 %v9071_v50, 16  ;;  %v9216_v32 = vpop.f32.mrf.mxu0  ;;  %v9219_v31 = vld [vmem:[#allocation2 + $0x2c] sm:$0xf] }
 0x127   : > { %vm9204_vm14 = vmand %vm9153_vm7, %vm1835_vm5  ;;  %v2874_v39 = vshll.u32 %v9071_v50, 16  ;;  %v9214_v6 = vpop.f32.mrf.mxu1  ;;  %v3558_v25 = vshrl.u32 %v9127_v38, 16  ;;  %v3562_v20 = vrot.slane %v3560_v57, 1  ;;  %v3567_v14 = vrot.slane %v3565_v42, 1 }
 0x128   : > { %12270 = vst [vmem:[#allocation41_spill] sm:$0xff] %v9214_v6  ;;  %v9221_v53 = vcombine.low %v2596_v21, %v2597_v40  ;;  %vm9237_vm7 = vmand %vm9193_vm1, %vm1833_vm2  ;;  %v2873_v29 = vrot.slane %v2871_v36, 4  ;;  %v9246_v43 = vsub.f32 %v8606_v11, %v9123_v24  ;;  %v7155_v21 = vpop.f32.mrf.mxu0  ;;  %vm12275_vm2 = vsmask.f32 7424 }
 0x129   : > { %3667 = vrot.lane.b32.xlu1 %v3652_v59, %s7764_s9  ;;  %v2876_v57 = vrot.slane %v2874_v39, 5  ;;  %v9249_v59 = vsub.f32 %v8609_v0, %v1766_v45  ;;  %v9251_v41 = vpop.f32.mrf.mxu1  ;;  %v2680_v36 = vsel %vm12275_vm2, %v2675_v16, %v9186_v52  ;;  %v3563_v39 = vor.u32 %v3562_v20, %v3558_v25  ;;  %vm9259_vm1 = vmand %vm9204_vm14, %vm1867_vm13  ;;  %v12282_v0 = vld [vmem:[#allocation40_spill] sm:$0xff]  ;;  %v7635_v45 = vld [vmem:[%s11933_s2 + $0x38] sm:$0xff]  }
 0x12a   : > { %vm12278_vm8 = vcmp.le.f32.partialorder %v12245_v61, 16.0  ;;  %vm12279_vm9 = vcmp.ge.f32.partialorder %v12245_v61, 1.0  ;;  %vm1811_vm2 = vcmp.le.f32.partialorder %v12282_v0, 16.0  ;;  %v9274_v8 = vfloor.f32 %v9133_v48  ;;  %2728 = vrot.lane.b32.xlu0 %v2680_v36, %s7765_s10  ;;  %v12294_v25 = vld [vmem:[#allocation43_spill] sm:$0xff]  ;;  %7256 = vmatprep.subr.bf16.mxu1 %v7635_v45  ;;  %v12352_v20 = vld [vmem:[#allocation26_spill] sm:$0xff] }
 0x12b   : > { %vm9267_vm15 = vmand %vm12279_vm9, %vm12278_vm8  ;;  %v9276_v24 = vmul.f32 0.055555556, %v2416_v30  ;;  %v1411_v61 = vadd.f32 %v9068_v12, %v8848_v9  ;;  %v9285_v16 = vcombine.low %v2597_v40, %v9219_v31  ;;  %vm12284_vm13 = vcmp.ge.f32.partialorder %v8526_v1, 1.0  ;;  %v9298_v9 = vpop.f32.mrf.mxu1  ;;  %v1421_v12 = vpop.f32.mrf.mxu0  ;;  %7257 = vmatpush3.bf16.msra.mxu1 %v7635_v45 }
 0x12c   : > { %vm9291_vm14 = vmand %vm9227_vm10, %vm12284_vm13  ;;  %v3569_v30 = vshrl.u32 %v9074_v17, 16  ;;  %v3573_v15 = vshll.u32 %v9096_v44, 16  ;;  %vm12287_vm9 = vsmask.f32 7424  ;;  %v9310_v46 = vor.u32 %v2876_v57, %v2873_v29  ;;  %v2599_v29 = vld [vmem:[#allocation2 + $0x30] sm:$0xf] }
 0x12d   : > { %12283 = vst [vmem:[#allocation39_spill] sm:$0xff] %v9276_v24  ;;  %v3568_v40 = vsel %vm12287_vm9, %v3563_v39, %v3567_v14  ;;  %vm9306_vm10 = vmand %vm9237_vm7, %vm1865_vm6  ;;  %vm12290_vm13 = vcmp.le.f32.partialorder %v12248_v28, 16.0  ;;  %vm12291_vm8 = vcmp.ge.f32.partialorder %v12248_v28, 1.0  ;;  %v2685_v39 = vshll.u32 %v9209_v27, 16  ;;  %v12298_v24 = vld [vmem:[#allocation42_spill] sm:$0xff] }
 0x12e   : > { %vm9316_vm5 = vmand %vm12291_vm8, %vm12290_vm13  ;;  %v1403_v55 = vadd.f32 %v9088_v60, %v8876_v37  ;;  %v9326_v42 = vadd.f32 %v9114_v5, %v8905_v35  ;;  %3627 = vrot.lane.b32.xlu1 %v3568_v40, %s7765_s10  ;;  %v3648_v28 = vrot.slane %v9127_v38, 1  ;;  %vm12295_vm6 = vcmp.ge.f32.partialorder %v8544_v33, 1.0  ;;  %v9348_v60 = vpop.f32.mrf.mxu1  ;;  %v7158_v5 = vpop.f32.mrf.mxu0 }
 0x12f   : > { %vm9334_vm7 = vmand %vm9267_vm15, %vm12295_vm6  ;;  %v3571_v57 = vor.u32 %v3569_v30, %v3567_v14  ;;  %v9342_v37 = vadd.f32 %v9138_v2, %v8936_v49  ;;  %v9346_v35 = vadd.f32 %v9177_v18, %v8966_v58  ;;  %v12299_v38 = vrot.slane %v9221_v53, 5  ;;  %v7637_v2 = vld [vmem:[%s11933_s2 + $0x88] sm:$0xff]   ;;  %v7641_v49 = vld [vmem:[%s11933_s2 + $0x78] sm:$0xff]  }
 0x130   : > { %v12300_v11 = vrot.slane %v9071_v50, 5  ;;  %vm12301_vm15 = vcmp.le.f32.partialorder %v8526_v1, 16.0  ;;  %v2752_v18 = vrot.slane %v9209_v27, 1  ;;  %vm12304_vm8 = vcmp.le.f32.partialorder %v8411_v62, 16.0  ;;  %v12308_v50 = vld [vmem:[#allocation20_spill] sm:$0xff]  ;;  %v7636_v1 = vld [vmem:[%s11933_s2 + $0x30] sm:$0xff]   ;;  %7304 = vmatprep.subr.bf16.mxu0 %v7637_v2 }
 0x131   : > { %vm9359_vm6 = vmand %vm9291_vm14, %vm12301_vm15  ;;  %vm12305_vm13 = vcmp.ge.f32.partialorder %v8411_v62, 1.0  ;;  %v9381_v48 = vadd.f32 %v9216_v32, %v9003_v3  ;;  %v9384_v62 = vadd.f32 %v7155_v21, %v9041_v10  ;;  %v12309_v30 = vrot.slane %v9074_v17, 1  ;;  %v7168_v3 = vpop.f32.mrf.mxu1  ;;  %v9401_v10 = vpop.f32.mrf.mxu0  ;;  %7258 = vmatprep.subr.bf16.mxu1 %v7636_v1  ;;  %7305 = vmatpush3.bf16.msra.mxu0 %v7637_v2  ;;  %v12370_v32 = vld [vmem:[#allocation38_spill] sm:$0xff] }
 0x132   : > { %v2952_v14 = vsel %vm12004_vm11, %v12300_v11, %v12299_v38  ;;  %vm9368_vm9 = vmand %vm12305_vm13, %vm12304_vm8  ;;  %vm1843_vm11 = vcmp.ge.f32.partialorder %v12308_v50, 1.0  ;;  %vm12310_vm14 = vcmask 1046528   ;;  %v9390_v40 = vrot.slane %v3573_v15, 1  ;;  %v12322_v11 = vld [vmem:[#allocation3_spill] sm:$0xff]  ;;  %7259 = vmatpush3.bf16.msra.mxu1 %v7636_v1 }
 0x133   : > { %2969 = vrot.lane.b32.xlu0 %v2952_v14, %s7764_s9  ;;  %v3650_v45 = vsel %vm12310_vm14, %v3648_v28, %v12309_v30  ;;  %vm9396_vm8 = vmand %vm9316_vm5, %vm1839_vm4  ;;  %v2878_v17 = vsel %vm12005_vm0, %v9145_v23, %v9310_v46  ;;  %v12006_v21 = vrot.slane %v9285_v16, 1  ;;  %v2681_v15 = vshrl.u32 %v8968_v56, 16 }
 0x134   : > { %vm9410_vm15 = vmand %vm9334_vm7, %vm1866_vm12  ;;  %v2687_v36 = vrot.slane %v2685_v39, 1  ;;  %vm12315_vm4 = vcmp.le.f32.partialorder %v12259_v19, 16.0  ;;  %vm12316_vm5 = vcmp.ge.f32.partialorder %v12259_v19, 1.0  ;;  %v9426_v33 = vadd.f32 %v1421_v12, %v9066_v7  ;;  %2928 = vrot.lane.b32.xlu1 %v2878_v17, %s7765_s10  ;;  %v9443_v12 = vpop.f32.mrf.mxu0 }
 0x135   : > { %vm9420_vm14 = vmand %vm12316_vm5, %vm12315_vm4  ;;  %v1675_v23 = vadd.f32 %v7168_v3, %v1411_v61  ;;  %vm12319_vm12 = vsmask.f32 7424  ;;  %v9441_v7 = vadd.f32 256.0, %v12322_v11  ;;  %v1610_v61 = vpop.f32.mrf.mxu1  ;;  %vm12324_vm5 = vcmask 1046528  }
 0x136   : > { %v3576_v39 = vsel %vm12319_vm12, %v3571_v57, %v9390_v40  ;;  %vm9435_vm7 = vmand %vm9368_vm9, %vm1837_vm3  ;;  %v12323_v57 = vrot.slane %v8968_v56, 1  ;;  %vm12325_vm12 = vcmp.le.f32.partialorder %v8547_v34, 16.0  ;;  %v2683_v30 = vor.u32 %v2681_v15, %v9186_v52  ;;  %v9476_v2 = vpop.f32.mrf.mxu0 }
 0x137   : > { %vm9452_vm3 = vmand %vm9396_vm8, %vm12325_vm12  ;;  %v2693_v3 = vshll.u32 %v9285_v16, 16  ;;  %v2880_v17 = vshrl.u32 %v9221_v53, 16  ;;  %v1899_v11 = vmax.f32 %v1675_v23, 0.0  ;;  %v1673_v34 = vadd.f32 %v1610_v61, %v1403_v55  ;;  %3665 = vrot.lane.b32.xlu0 %v3650_v45, %s7764_s9  ;;  %v7169_v55 = vpop.f32.mrf.mxu1  ;;  %v2600_v61 = vld [vmem:[#allocation2 + $0x34] sm:$0xf]  ;;  %v12393_v23 = vld [vmem:[#allocation41_spill] sm:$0xff] }
 0x138   : > { %v2753_v14 = vsel %vm12324_vm5, %v12323_v57, %v2752_v18  ;;  %v2689_v38 = vshrl.u32 %v9209_v27, 16  ;;  %vm12328_vm8 = vcmp.ge.f32.partialorder %v8579_v26, 1.0  ;;  %v2883_v15 = vshll.u32 %v9221_v53, 16  ;;  %3629 = vrot.lane.b32.xlu1 %v3576_v39, %s7765_s10  ;;  %v2601_v57 = vld [vmem:[#allocation2 + $0x38] sm:$0xf] }
 0x139   : > { %vm9467_vm5 = vmand %vm9420_vm14, %vm12328_vm8  ;;  %v9474_v1 = vadd.f32 %v7158_v5, %v9086_v13  ;;  %vm12331_vm9 = vcmask 1046528   ;;  %vm12332_vm4 = vsmask.f32 7424  ;;  %vm12333_vm14 = vcmp.le.f32.partialorder %v8576_v63, 16.0  ;;  %v9530_v39 = vld [vmem:[#allocation2 + $0x3c] sm:$0xf] }
 0x13a   : > { %v2755_v45 = vsel %vm12331_vm9, %v2752_v18, %v12006_v21  ;;  %v9482_v28 = vsel %vm12332_vm4, %v2683_v30, %v2687_v36  ;;  %vm9488_vm8 = vmand %vm9435_vm7, %vm12333_vm14  ;;  %vm12336_vm12 = vcmp.le.f32.partialorder %v8441_v47, 16.0  ;;  %vm12337_vm0 = vcmp.ge.f32.partialorder %v8441_v47, 1.0  ;;  %v12343_v30 = vld [vmem:[#allocation19_spill] sm:$0xff] }
 0x13b   : > { %vm9496_vm13 = vmand %vm12337_vm0, %vm12336_vm12  ;;  %v9501_v5 = vcombine.low %v9219_v31, %v2599_v29  ;;  %vm1794_vm4 = vcmp.ge.f32.partialorder %v8703_v54, 1.0  ;;  %vm1810_vm9 = vcmp.le.f32.partialorder %v8703_v54, 16.0  ;;  %v1915_v63 = vsel %vm9259_vm1, %v1899_v11, 0.0  ;;  %v1613_v11 = vpop.f32.mrf.mxu1  ;;  %2768 = vrot.lane.b32.xlu0 %v2753_v14, %s7764_s9 }
 0x13c   : > { %v1897_v18 = vmax.f32 %v1673_v34, 0.0  ;;  %v1676_v19 = vadd.f32 %v7169_v55, %v9326_v42  ;;  %v2691_v47 = vor.u32 %v2689_v38, %v2687_v36  ;;  %vm12340_vm0 = vcmp.ge.f32.partialorder %v12282_v0, 1.0  ;;  %v9518_v34 = vpop.f32.mrf.mxu0  ;;  %v9534_v55 = vld [vmem:[#allocation2 + $0x2c] sm:$0xff]   ;;  %2770 = vrot.lane.b32.xlu1 %v2755_v45, %s7764_s9 }
 0x13d   : > { %vm9513_vm7 = vmand %vm12340_vm0, %vm1811_vm2  ;;  %vm1844_vm12 = vcmp.ge.f32.partialorder %v12343_v30, 1.0  ;;  %v6862_v6 = vpack.c.bf16 %v1915_v63, %v1915_v63  ;;  %v9520_v42 = vrot.slane %v2693_v3, 1  ;;  %vm12344_vm1 = vcmp.le.f32.partialorder %v8579_v26, 16.0  ;;  %v12347_v63 = vld [vmem:[#allocation12_spill] sm:$0xff]  ;;  %v7172_v14 = vpop.f32.mrf.mxu1 }
 0x13e   : > { %vm9526_vm14 = vmand %vm9467_vm5, %vm12344_vm1  ;;  %v2882_v36 = vrot.slane %v2880_v17, 4  ;;  %v9532_v38 = vcombine.low %v2599_v29, %v2600_v61  ;;  %v7639_v26 = vld [vmem:[%s11933_s2 + $0x80] sm:$0xff]   ;;  %v1913_v3 = vsel %vm9306_vm10, %v1897_v18, 0.0  ;;  %v1900_v52 = vmax.f32 %v1676_v19, 0.0  ;;  %v9559_v19 = vpop.f32.mrf.mxu0 }
 0x13f   : > { %v1674_v17 = vadd.f32 %v1613_v11, %v9342_v37  ;;  %v2885_v29 = vrot.slane %v2883_v15, 5  ;;  %vm12348_vm5 = vcmp.ge.f32.partialorder %v12294_v25, 1.0  ;;  %vm12351_vm0 = vcmask 257024   ;;  %7306 = vmatprep.subr.bf16.mxu0 %v7639_v26  ;;  %vm9581_vm2 = vmand %vm9513_vm7, %vm1843_vm11  ;;  %2730 = vrot.lane.b32.xlu0 %v9482_v28, %s7765_s10 }
 0x140   : > { %vm9549_vm1 = vmand %vm9496_vm13, %vm12348_vm5  ;;  %1995 = vst.msk [vmem:[#allocation2 + $0x54] sm:$0xf] %vm12351_vm0, %v6862_v6  ;;  %v9557_v18 = vadd.f32 %v9401_v10, %v12352_v20  ;;  %v6860_v37 = vpack.c.bf16 %v1913_v3, %v1913_v3  ;;  %v2953_v15 = vrot.slane %v9501_v5, 5  ;;  %v9562_v11 = vcombine.low %v2600_v61, %v2601_v57  ;;  %v12359_v20 = vld [vmem:[#allocation27_spill] sm:$0xff]  ;;  %7307 = vmatpush3.bf16.msra.mxu0 %v7639_v26 }
 0x141   : > { %vm12353_vm10 = vcmp.le.f32.partialorder %v12298_v24, 16.0  ;;  %vm12354_vm13 = vcmp.ge.f32.partialorder %v12298_v24, 1.0  ;;  %vm1876_vm0 = vcmp.le.f32.partialorder %v12343_v30, 16.0  ;;  %v1916_v10 = vsel %vm9359_vm6, %v1900_v52, 0.0  ;;  %v9597_v52 = vpop.f32.mrf.mxu0  ;;  %7308 = vmatprep.subr.bf16.mxu0 %v7641_v49 }
 0x142   : > { %vm9568_vm5 = vmand %vm12354_vm13, %vm12353_vm10  ;;  %v1898_v6 = vmax.f32 %v1674_v17, 0.0  ;;  %v1679_v61 = vadd.f32 %v7172_v14, %v9346_v35  ;;  %v9586_v3 = vcombine.low %v2601_v57, %v9530_v39  ;;  %vm12360_vm6 = vcmask 257024   ;;  %v12361_v35 = vld [vmem:[#allocation31_spill] sm:$0xff]  ;;  %v1626_v17 = vpop.f32.mrf.mxu1 }
 0x143   : > { %1993 = vst.msk [vmem:[#allocation2 + $0x4c] sm:$0xf] %vm12360_vm6, %v6860_v37  ;;  %v9595_v45 = vadd.f32 %v9443_v12, %v12361_v35  ;;  %v6863_v31 = vpack.c.bf16 %v1916_v10, %v1916_v10  ;;  %vm12362_vm11 = vsmask.f32 7424  ;;  %vm12363_vm7 = vcmp.le.f32.partialorder %v12294_v25, 16.0  ;;  %v9614_v12 = vld [vmem:[%s11933_s2 + $0x70] sm:$0xff]   ;;  %vm12382_vm10 = vmmov %vm12360_vm6 }
 0x144   : > { %v2696_v57 = vsel %vm12362_vm11, %v2691_v47, %v9520_v42  ;;  %vm9605_vm13 = vmand %vm9549_vm1, %vm12363_vm7  ;;  %v3653_v37 = vrot.slane %v9534_v55, 1  ;;  %v1914_v47 = vsel %vm9410_vm15, %v1898_v6, 0.0  ;;  %v1903_v14 = vmax.f32 %v1679_v61, 0.0  ;;  %v12369_v35 = vld [vmem:[#allocation24_spill] sm:$0xff]  ;;  %7309 = vmatpush3.bf16.msra.mxu0 %v7641_v49 }
 0x145   : > { %v1677_v25 = vadd.f32 %v1626_v17, %v9381_v48  ;;  %v9621_v21 = vor.u32 %v2885_v29, %v2882_v36  ;;  %vm12366_vm1 = vcmp.ge.f32.partialorder %v8638_v51, 1.0  ;;  %1996 = vst.msk [vmem:[#allocation2 + $0x58] sm:$0xf] %vm12360_vm6, %v6863_v31  ;;  %v9636_v48 = vadd.f32 %v9476_v2, %v12370_v32  ;;  %v9638_v36 = vpop.f32.mrf.mxu0  ;;  %v7173_v29 = vpop.f32.mrf.mxu1  ;;  %v9652_v2 = vld [vmem:[#allocation2 + $0x34] sm:$0xff]   ;;  %2732 = vrot.lane.b32.xlu1 %v2696_v57, %s7765_s10  ;;  %v12381_v32 = vld [vmem:[#allocation15_spill] sm:$0xff] }
 0x146   : > { %vm9627_vm11 = vmand %vm9568_vm5, %vm12366_vm1  ;;  %v6861_v28 = vpack.c.bf16 %v1914_v47, %v1914_v47  ;;  %v12371_v13 = vrot.slane %v9221_v53, 5  ;;  %vm12372_vm5 = vcmask 1042432   ;;  %vm12373_vm1 = vcmp.le.f32.partialorder %v12308_v50, 16.0  ;;  %7310 = vmatprep.subr.bf16.mxu0 %v9614_v12 }
 0x147   : > { %vm9647_vm7 = vmand %vm9581_vm2, %vm12373_vm1  ;;  %v2955_v31 = vrot.slane %v9562_v11, 5  ;;  %v1919_v17 = vsel %vm9452_vm3, %v1903_v14, 0.0  ;;  %v1901_v53 = vmax.f32 %v1677_v25, 0.0  ;;  %v1680_v50 = vadd.f32 %v7173_v29, %v9384_v62  ;;  %v9673_v58 = vpop.f32.mrf.mxu0  ;;  %v1629_v57 = vpop.f32.mrf.mxu1  ;;  %v12389_v25 = vld [vmem:[#allocation29_spill] sm:$0xff] }
 0x148   : > { %v2954_v6 = vsel %vm12372_vm5, %v12371_v13, %v2953_v15  ;;  %vm12376_vm2 = vsmask.f32 3328  ;;  %vm12377_vm5 = vcmp.le.f32.partialorder %v8640_v4, 16.0  ;;  %vm12378_vm1 = vcmp.ge.f32.partialorder %v8640_v4, 1.0  ;;  %1994 = vst.msk [vmem:[#allocation2 + $0x50] sm:$0xf] %vm12382_vm10, %v6861_v28  ;;  %7311 = vmatpush3.bf16.msra.mxu0 %v9614_v12 }
 0x149   : > { %v2887_v24 = vsel %vm12376_vm2, %v9310_v46, %v9621_v21  ;;  %vm9666_vm15 = vmand %vm12378_vm1, %vm12377_vm5  ;;  %vm1816_vm3 = vcmp.le.f32.partialorder %v12381_v32, 16.0  ;;  %v6866_v62 = vpack.c.bf16 %v1919_v17, %v1919_v17  ;;  %vm12383_vm2 = vcmask 1042432   ;;  %2971 = vrot.lane.b32.xlu1 %v2954_v6, %s7764_s9 }
 0x14a   : > { %v2956_v46 = vsel %vm12383_vm2, %v2953_v15, %v2955_v31  ;;  %vm12384_vm5 = vcmp.le.f32.partialorder %v8638_v51, 16.0  ;;  %v12387_v49 = vrot.slane %v9096_v44, 1  ;;  %vm12388_vm10 = vcmask 1046528   ;;  %v7645_v51 = vld [vmem:[%s11933_s2 + $0x68] sm:$0xff]   ;;  %2930 = vrot.lane.b32.xlu0 %v2887_v24, %s7765_s10  ;;  %v7176_v24 = vpop.f32.mrf.mxu1 }
 0x14b   : > { %vm9682_vm1 = vmand %vm9627_vm11, %vm12384_vm5  ;;  %vm1845_vm6 = vcmp.ge.f32.partialorder %v12389_v25, 1.0  ;;  %v2889_v28 = vshrl.u32 %v9501_v5, 16  ;;  %v1917_v15 = vsel %vm9488_vm8, %v1901_v53, 0.0  ;;  %v1904_v10 = vmax.f32 %v1680_v50, 0.0  ;;  %v7186_v50 = vpop.f32.mrf.mxu0  ;;  %7312 = vmatprep.subr.bf16.mxu0 %v7645_v51 }
 0x14c   : > { %v3654_v14 = vsel %vm12388_vm10, %v12387_v49, %v3653_v37  ;;  %v1678_v29 = vadd.f32 %v1629_v57, %v9426_v33  ;;  %vm9705_vm11 = vmand %vm1794_vm4, %vm1810_vm9  ;;  %v2892_v17 = vshll.u32 %v9501_v5, 16  ;;  %v12392_v49 = vld [vmem:[#allocation23_spill] sm:$0xff]  ;;  %v9714_v53 = vadd.f32 %v9518_v34, %v12393_v23  ;;  %7313 = vmatpush3.bf16.msra.mxu0 %v7645_v51 }
 0x14d   : > { %vm1798_vm2 = vcmp.ge.f32.partialorder %v12392_v49, 1.0  ;;  %vm1814_vm5 = vcmp.le.f32.partialorder %v12392_v49, 16.0  ;;  %vm12394_vm8 = vcmask 257024   ;;  %v6864_v33 = vpack.c.bf16 %v1917_v15, %v1917_v15  ;;  %vm9721_vm4 = vmand %vm9666_vm15, %vm1844_vm12  ;;  %v9748_v6 = vpop.f32.mrf.mxu0  ;;  %3669 = vrot.lane.b32.xlu1 %v3654_v14, %s7764_s9  ;;  %v2832_v49 = vld [vmem:[#allocation2 + $0x44] sm:$0xf] }
 0x14e   : > { %1999 = vst.msk [vmem:[#allocation2 + $0x64] sm:$0xf] %vm12394_vm8, %v6866_v62  ;;  %v2756_v5 = vrot.slane %v9532_v38, 1  ;;  %v3655_v57 = vrot.slane %v9652_v2, 1  ;;  %vm1848_vm9 = vcmp.ge.f32.partialorder %v9246_v43, 1.0  ;;  %v1920_v34 = vsel %vm9526_vm14, %v1904_v10, 0.0  ;;  %vm12401_vm14 = vmmov %vm12394_vm8  ;;  %2973 = vrot.lane.b32.xlu0 %v2956_v46, %s7764_s9 }
 0x14f   : > { %v1902_v62 = vmax.f32 %v1678_v29, 0.0  ;;  %v1683_v15 = vadd.f32 %v7176_v24, %v9474_v1  ;;  %vm12397_vm10 = vcmp.le.f32.partialorder %v12347_v63, 16.0  ;;  %vm12398_vm12 = vcmp.ge.f32.partialorder %v12347_v63, 1.0  ;;  %1997 = vst.msk [vmem:[#allocation2 + $0x5c] sm:$0xf] %vm12401_vm14, %v6864_v33  ;;  %v1642_v63 = vpop.f32.mrf.mxu1 }
 0x150   : > { %vm9736_vm15 = vmand %vm12398_vm12, %vm12397_vm10  ;;  %v3581_v23 = vshll.u32 %v9534_v55, 16  ;;  %v9745_v0 = vadd.f32 %v9559_v19, %v9251_v41  ;;  %v6867_v1 = vpack.c.bf16 %v1920_v34, %v1920_v34  ;;  %vm12402_vm10 = vcmp.ge.f32.partialorder %v9120_v22, 1.0 }
 0x151   : > { %vm9754_vm12 = vmand %vm9705_vm11, %vm12402_vm10  ;;  %v3577_v12 = vshrl.u32 %v9096_v44, 16  ;;  %v2891_v29 = vrot.slane %v2889_v28, 4  ;;  %vm1846_vm8 = vcmp.ge.f32.partialorder %v9249_v59, 1.0  ;;  %v1918_v41 = vsel %vm9605_vm13, %v1902_v62, 0.0  ;;  %v7187_v28 = vpop.f32.mrf.mxu0  ;;  %v7177_v50 = vpop.f32.mrf.mxu1 }
 0x152   : > { %v1907_v19 = vmax.f32 %v1683_v15, 0.0  ;;  %v1681_v33 = vadd.f32 %v1642_v63, %v9557_v18  ;;  %vm9768_vm11 = vmand %vm9721_vm4, %vm1876_vm0  ;;  %v2894_v44 = vrot.slane %v2892_v17, 5  ;;  %vm1880_vm14 = vcmp.le.f32.partialorder %v9246_v43, 16.0 }
 0x153   : > { %vm12407_vm10 = vcmask 257024   ;;  %v6865_v26 = vpack.c.bf16 %v1918_v41, %v1918_v41  ;;  %v12408_v18 = vrot.slane %v9285_v16, 1  ;;  %vm12409_vm13 = vcmask 1046528   ;;  %v1645_v14 = vpop.f32.mrf.mxu1 }
 0x154   : > { %2000 = vst.msk [vmem:[#allocation2 + $0x68] sm:$0xf] %vm12407_vm10, %v6867_v1  ;;  %vm12410_vm0 = vmmov %vm12409_vm13  ;;  %vm12411_vm4 = vcmp.ge.f32.partialorder %v12359_v20, 1.0  ;;  %v3579_v24 = vor.u32 %v3577_v12, %v9390_v40  ;;  %v1923_v54 = vsel %vm9647_vm7, %v1907_v19, 0.0  ;;  %v1905_v34 = vmax.f32 %v1681_v33, 0.0 }
 0x155   : > { %v2757_v30 = vsel %vm12409_vm13, %v12408_v18, %v2756_v5  ;;  %v3656_v46 = vsel %vm12410_vm0, %v3653_v37, %v3655_v57  ;;  %vm9788_vm10 = vmand %vm9736_vm15, %vm12411_vm4  ;;  %v1684_v62 = vadd.f32 %v7177_v50, %v9595_v45  ;;  %vm12414_vm13 = vcmp.le.f32.partialorder %v9120_v22, 16.0  ;;  %v9815_v45 = vpop.f32.mrf.mxu0  ;;  %v7180_v63 = vpop.f32.mrf.mxu1  ;;  %v2833_v33 = vld [vmem:[#allocation2 + $0x48] sm:$0xf] }
 0x156   : > { %vm9801_vm0 = vmand %vm9754_vm12, %vm12414_vm13  ;;  %v9805_v15 = vrot.slane %v3581_v23, 1  ;;  %v1462_v40 = vadd.f32 %v9597_v52, %v9298_v9  ;;  %v9812_v61 = vadd.f32 %v9638_v36, %v9348_v60  ;;  %vm12417_vm7 = vcmask 257024   ;;  %v7646_v60 = vld [vmem:[%s11933_s2 + $0x60] sm:$0xff]   ;;  %2772 = vrot.lane.b32.xlu0 %v2757_v30, %s7764_s9  ;;  %3671 = vrot.lane.b32.xlu1 %v3656_v46, %s7764_s9 }
 0x157   : > { %1998 = vst.msk [vmem:[#allocation2 + $0x60] sm:$0xf] %vm12417_vm7, %v6865_v26  ;;  %v6870_v22 = vpack.c.bf16 %v1923_v54, %v1923_v54  ;;  %vm12418_vm12 = vcmp.le.f32.partialorder %v12369_v35, 16.0  ;;  %vm12419_vm4 = vcmp.ge.f32.partialorder %v12369_v35, 1.0  ;;  %v2701_v9 = vshll.u32 %v9532_v38, 16  ;;  %v7190_v4 = vpop.f32.mrf.mxu0  ;;  %7314 = vmatprep.subr.bf16.mxu0 %v7646_v60  ;;  %v1658_v26 = vpop.f32.mrf.mxu1 }
 0x158   : > { %vm9821_vm13 = vmand %vm12419_vm4, %vm12418_vm12  ;;  %v1921_v52 = vsel %vm9682_vm1, %v1905_v34, 0.0  ;;  %v1908_v36 = vmax.f32 %v1684_v62, 0.0  ;;  %v1682_v51 = vadd.f32 %v1645_v14, %v9636_v48  ;;  %vm12422_vm7 = vcmp.le.f32.partialorder %v12359_v20, 16.0  ;;  %7315 = vmatpush3.bf16.msra.mxu0 %v7646_v60  ;;  %v2605_v4 = vld [vmem:[#allocation2 + $0x40] sm:$0xf] }
 0x159   : > { %vm9837_vm12 = vmand %vm9788_vm10, %vm12422_vm7  ;;  %v9841_v23 = vor.u32 %v2894_v44, %v2891_v29  ;;  %vm12425_vm4 = vcmask 257024   ;;  %v6868_v1 = vpack.c.bf16 %v1921_v52, %v1921_v52  ;;  %vm12426_vm1 = vcmp.ge.f32.partialorder %v12381_v32, 1.0  ;;  %v9870_v44 = vpop.f32.mrf.mxu0 }
 0x15a   : > { %2003 = vst.msk [vmem:[#allocation2 + $0x74] sm:$0xf] %vm12425_vm4, %v6870_v22  ;;  %vm9848_vm15 = vmand %vm12426_vm1, %vm1816_vm3  ;;  %v2697_v20 = vshrl.u32 %v9285_v16, 16  ;;  %v2898_v10 = vshrl.u32 %v9562_v11, 16  ;;  %v2901_v12 = vshll.u32 %v9562_v11, 16  ;;  %v1924_v29 = vsel %vm9768_vm11, %v1908_v36, 0.0 }
 0x15b   : > { %v1906_v41 = vmax.f32 %v1682_v51, 0.0  ;;  %v1687_v19 = vadd.f32 %v7180_v63, %v9714_v53  ;;  %vm12429_vm3 = vsmask.f32 7424  ;;  %vm9865_vm10 = vmand %vm9821_vm13, %vm1845_vm6  ;;  %v6871_v13 = vpack.c.bf16 %v1924_v29, %v1924_v29  ;;  %v7191_v54 = vpop.f32.mrf.mxu0 }
 0x15c   : > { %v3584_v32 = vsel %vm12429_vm3, %v3579_v24, %v9805_v15  ;;  %vm12432_vm7 = vmmov %vm12425_vm4  ;;  %v2699_v53 = vor.u32 %v2697_v20, %v9520_v42  ;;  %v2703_v28 = vrot.slane %v2701_v9, 1  ;;  %v2758_v18 = vrot.slane %v9586_v3, 1 }
 0x15d   : > { %2001 = vst.msk [vmem:[#allocation2 + $0x6c] sm:$0xf] %vm12432_vm7, %v6868_v1  ;;  %vm9877_vm11 = vmand %vm1798_vm2, %vm1814_vm5  ;;  %v1922_v30 = vsel %vm9801_vm0, %v1906_v41, 0.0  ;;  %v1911_v46 = vmax.f32 %v1687_v19, 0.0  ;;  %3631 = vrot.lane.b32.xlu0 %v3584_v32, %s7765_s10  ;;  %v1685_v17 = vadd.f32 %v1658_v26, %v9745_v0  ;;  %vm12435_vm6 = vsmask.f32 3328  ;;  %v9920_v52 = vpop.f32.mrf.mxu0 }
 0x15e   : > { %v2896_v42 = vsel %vm12435_vm6, %v9621_v21, %v9841_v23  ;;  %vm9893_vm2 = vmand %vm9848_vm15, %vm1848_vm9  ;;  %v6869_v24 = vpack.c.bf16 %v1922_v30, %v1922_v30  ;;  %vm12439_vm0 = vcmp.le.f32.partialorder %v12389_v25, 16.0  ;;  %v7181_v21 = vpop.f32.mrf.mxu1  ;;  %v2900_v34 = vrot.slane %v2898_v10, 4 }
 0x15f   : > { %vm12438_vm5 = vmmov %vm12425_vm4  ;;  %v2903_v62 = vrot.slane %v2901_v12, 5  ;;  %v2709_v37 = vshll.u32 %v9586_v3, 16  ;;  %v1927_v22 = vsel %vm9837_vm12, %v1911_v46, 0.0  ;;  %v1909_v14 = vmax.f32 %v1685_v17, 0.0  ;;  %2932 = vrot.lane.b32.xlu1 %v2896_v42, %s7765_s10  ;;  %v7194_v12 = vpop.f32.mrf.mxu0 }
 0x160   : > { %2004 = vst.msk [vmem:[#allocation2 + $0x78] sm:$0xf] %vm12438_vm5, %v6871_v13  ;;  %vm9902_vm13 = vmand %vm9865_vm10, %vm12439_vm0  ;;  %v1688_v47 = vadd.f32 %v7181_v21, %v1462_v40  ;;  %v2417_v9 = vadd.f32 0.5, %v9441_v7  ;;  %v6874_v60 = vpack.c.bf16 %v1927_v22, %v1927_v22  ;;  %v1661_v51 = vpop.f32.mrf.mxu1  ;;  %v2705_v1 = vshrl.u32 %v9532_v38, 16 }
 0x161   : > { %vm9914_vm9 = vmand %vm9877_vm11, %vm1846_vm8  ;;  %vm12448_vm8 = vcmask 1046528   ;;  %v1925_v43 = vsel %vm9902_vm13, %v1909_v14, 0.0  ;;  %v1686_v48 = vadd.f32 %v1661_v51, %v9812_v61  ;;  %v3585_v20 = vshrl.u32 %v9534_v55, 16 }
 0x162   : > { %vm12444_vm15 = vmmov %vm12425_vm4  ;;  %v2759_v35 = vsel %vm12448_vm8, %v2756_v5, %v2758_v18  ;;  %v1912_v63 = vmax.f32 %v1688_v47, 0.0  ;;  %v6872_v10 = vpack.c.bf16 %v1925_v43, %v1925_v43  ;;  %vm12450_vm1 = vcmp.le.f32.partialorder %v9249_v59, 16.0  ;;  %v9956_v19 = vpop.f32.mrf.mxu1 }
 0x163   : > { %2002 = vst.msk [vmem:[#allocation2 + $0x70] sm:$0xf] %vm12444_vm15, %v6869_v24  ;;  %vm9926_vm12 = vmand %vm9893_vm2, %vm1880_vm14  ;;  %v9951_v29 = vor.u32 %v2903_v62, %v2900_v34  ;;  %v9953_v41 = vrot.slane %v2709_v37, 1  ;;  %v3589_v61 = vshll.u32 %v9652_v2, 16  ;;  %v1910_v32 = vmax.f32 %v1686_v48, 0.0  ;;  %2774 = vrot.lane.b32.xlu1 %v2759_v35, %s7764_s9  ;;  %v12455_v24 = vld [vmem:[#allocation39_spill] sm:$0xff] }
 0x164   : > { %vm12447_vm4 = vmmov %vm12429_vm3  ;;  %v1928_v55 = vsel %vm9926_vm12, %v1912_v63, 0.0  ;;  %v2707_v59 = vor.u32 %v2705_v1, %v2703_v28  ;;  %v2442_v13 = vmul.f32 18.0, %v9274_v8  ;;  %v3587_v30 = vor.u32 %v3585_v20, %v9805_v15  ;;  %v7208_v17 = vpop.f32.mrf.mxu1  ;;  %v9986_v37 = vld [vmem:[#allocation2 + $0x3c] sm:$0xff]  }
 0x165   : > { %v2704_v36 = vsel %vm12447_vm4, %v2699_v53, %v2703_v28  ;;  %vm12449_vm14 = vmmov %vm12438_vm5  ;;  %v6875_v26 = vpack.c.bf16 %v1928_v55, %v1928_v55  ;;  %v9963_v53 = vpop.f32.mrf.mxu0  ;;  %v9970_v46 = vcombine.low %v9530_v39, %v2605_v4  ;;  %v6572_v42 = vcombine.low %v2605_v4, %v2605_v4  ;;  %v10010_v20 = vld [vmem:[#allocation2 + $0x40] ss:$0 sps:$4 sm:$0x77]   ;;  %v12463_v55 = vld [vmem:[#allocation28_spill] sm:$0xff] }
 0x166   : > { %2734 = vrot.lane.b32.xlu0 %v2704_v36, %s7765_s10  ;;  %2007 = vst.msk [vmem:[#allocation2 + $0x84] sm:$0xf] %vm12449_vm14, %v6874_v60  ;;  %vm9947_vm3 = vmand %vm9914_vm9, %vm12450_vm1  ;;  %v9976_v54 = vfloor.f32 %v12455_v24  ;;  %v2426_v0 = vmul.f32 0.055555556, %v2417_v9  ;;  %v3591_v15 = vrot.slane %v3589_v61, 1  ;;  %v9981_v34 = vcombine.low %v2832_v49, %v2833_v33  ;;  %v9983_v62 = vpop.f32.mrf.mxu1  ;;  %v12460_v60 = vld [vmem:[#allocation22_spill] sm:$0xff] }
 0x167   : > { %vm12453_vm10 = vmmov %vm12438_vm5  ;;  %v1926_v28 = vsel %vm9947_vm3, %v1910_v32, 0.0  ;;  %v7195_v21 = vpop.f32.mrf.mxu0  ;;  %v2957_v47 = vrot.slane %v9970_v46, 5  ;;  %v2760_v9 = vrot.slane %v6572_v42, 1  ;;  %v9995_v40 = vsub.f32 %v12460_v60, %v2442_v13 }
 0x168   : > { %2005 = vst.msk [vmem:[#allocation2 + $0x7c] sm:$0xf] %vm12453_vm10, %v6872_v10  ;;  %vm12454_vm7 = vmmov %vm12435_vm6  ;;  %v7209_v25 = vpop.f32.mrf.mxu1  ;;  %v2959_v51 = vrot.slane %v9981_v34, 5  ;;  %v2443_v35 = vmul.f32 18.0, %v9976_v54  ;;  %v10001_v4 = vfloor.f32 %v2426_v0  ;;  %v3597_v43 = vshll.u32 %v9986_v37, 16 }
 0x169   : > { %v2905_v50 = vsel %vm12454_vm7, %v9841_v23, %v9951_v29  ;;  %vm12456_vm11 = vmmov %vm12438_vm5  ;;  %v6873_v23 = vpack.c.bf16 %v1926_v28, %v1926_v28  ;;  %v9989_v22 = vpop.f32.mrf.mxu0  ;;  %vm12461_vm0 = vcmask 1042432   ;;  %vm2460_vm13 = vcmp.ge.f32.partialorder %v9274_v8, 1.0 }
 0x16a   : > { %2934 = vrot.lane.b32.xlu0 %v2905_v50, %s7765_s10  ;;  %2008 = vst.msk [vmem:[#allocation2 + $0x88] sm:$0xf] %vm12456_vm11, %v6875_v26  ;;  %vm12457_vm6 = vmmov %vm12447_vm4  ;;  %v9999_v1 = vpop.f32.mrf.mxu1  ;;  %v2960_v48 = vsel %vm12461_vm0, %v2957_v47, %v2959_v51  ;;  %vm2469_vm9 = vcmp.le.f32.partialorder %v9274_v8, 16.0  ;;  %vm2487_vm15 = vcmp.ge.f32.partialorder %v9995_v40, 1.0  ;;  %v3657_v61 = vrot.slane %v9986_v37, 1  ;;  %v10028_v50 = vld [vmem:[#allocation2 + $0x44] sm:$0xff]  }
 0x16b   : > { %v2712_v39 = vsel %vm12457_vm6, %v2707_v59, %v9953_v41  ;;  %vm12458_vm2 = vmmov %vm12438_vm5  ;;  %v7198_v36 = vpop.f32.mrf.mxu0  ;;  %v10021_v32 = vsub.f32 %v12463_v55, %v2443_v35  ;;  %v2444_v59 = vmul.f32 18.0, %v10001_v4  ;;  %v3593_v13 = vshrl.u32 %v9652_v2, 16  ;;  %v10059_v2 = vld [vmem:[#allocation2] sm:$0xc] }
 0x16c   : > { %2736 = vrot.lane.b32.xlu1 %v2712_v39, %s7765_s10  ;;  %2006 = vst.msk [vmem:[#allocation2 + $0x80] sm:$0xf] %vm12458_vm2, %v6873_v23  ;;  %vm12459_vm5 = vmmov %vm12447_vm4  ;;  %v7212_v10 = vpop.f32.mrf.mxu1  ;;  %v3599_v26 = vrot.slane %v3597_v43, 1  ;;  %vm2505_vm4 = vcmp.le.f32.partialorder %v9995_v40, 16.0  ;;  %vm2461_vm8 = vcmp.ge.f32.partialorder %v9976_v54, 1.0  ;;  %vm12464_vm14 = vcmask 1046528  }
 0x16d   : > { %v3592_v14 = vsel %vm12459_vm5, %v3587_v30, %v3591_v15  ;;  %v10005_v63 = vpop.f32.mrf.mxu0  ;;  %vm12462_vm12 = vmmov %vm12461_vm0  ;;  %v2717_v30 = vshll.u32 %v10010_v20, 16  ;;  %v2907_v17 = vshrl.u32 %v9970_v46, 16  ;;  %v2910_v28 = vshll.u32 %v9970_v46, 16  ;;  %v10070_v36 = vld [vmem:[#allocation2 + $0x54] ss:$0 sps:$4 sm:$0x11]  }
 0x16e   : > { %3633 = vrot.lane.b32.xlu0 %v3592_v14, %s7765_s10  ;;  %v2958_v5 = vsel %vm12462_vm12, %v2955_v31, %v2957_v47  ;;  %v10024_v33 = vpop.f32.mrf.mxu1  ;;  %v2761_v31 = vsel %vm12464_vm14, %v2758_v18, %v2760_v9  ;;  %v3595_v49 = vor.u32 %v3593_v13, %v3591_v15  ;;  %v2916_v24 = vshrl.u32 %v9981_v34, 16  ;;  %vm12465_vm3 = vmmov %vm12464_vm14  ;;  %v7618_v8 = vld [vmem:[#allocation2 + $0x4c] ss:$0 sps:$4 sm:$0x11]  }
 0x16f   : > { %v7199_v12 = vpop.f32.mrf.mxu0  ;;  %v2919_v0 = vshll.u32 %v9981_v34, 16  ;;  %vm2470_vm1 = vcmp.le.f32.partialorder %v9976_v54, 16.0  ;;  %v3658_v18 = vsel %vm12465_vm3, %v3655_v57, %v3657_v61  ;;  %v2713_v21 = vshrl.u32 %v9586_v3, 16  ;;  %vm12466_vm7 = vmmov %vm12459_vm5  ;;  %v4001_v54 = vld [vmem:[#allocation2 + $0x50] sm:$0xf] }
 0x170   : > { %2778 = vrot.lane.b32.xlu1 %v2760_v9, %s7764_s9  ;;  %v7213_v42 = vpop.f32.mrf.mxu1  ;;  %vm2488_vm10 = vcmp.ge.f32.partialorder %v10021_v32, 1.0  ;;  %v10050_v46 = vsub.f32 %v9441_v7, %v2444_v59  ;;  %v3600_v15 = vsel %vm12466_vm7, %v3595_v49, %v3599_v26  ;;  %v3659_v14 = vrot.slane %v10028_v50, 1  ;;  %vm10065_vm2 = vmand %vm2460_vm13, %vm2469_vm9  ;;  %v4014_v59 = vld [vmem:[#allocation2 + $0x40] sm:$0x8]  ;;  %v10116_v7 = vld [vmem:[#allocation2 + $0x54] sm:$0xf] }
 0x171   : > { %v10032_v11 = vpop.f32.mrf.mxu0  ;;  %vm2506_vm11 = vcmp.le.f32.partialorder %v10021_v32, 16.0  ;;  %vm2462_vm6 = vcmp.ge.f32.partialorder %v10001_v4, 1.0  ;;  %v2715_v47 = vor.u32 %v2713_v21, %v9953_v41  ;;  %v2719_v25 = vrot.slane %v2717_v30, 1  ;;  %vm12469_vm0 = vmmov %vm12465_vm3  ;;  %v10099_v30 = vld [vmem:[#allocation2 + $0x4] sm:$0xf] }
 0x172   : > { %2977 = vrot.lane.b32.xlu0 %v2960_v48, %s7764_s9  ;;  %v10052_v39 = vpop.f32.mrf.mxu1  ;;  %v2909_v9 = vrot.slane %v2907_v17, 4  ;;  %v2912_v60 = vrot.slane %v2910_v28, 5  ;;  %v2222_v43 = vadd.f32 %v9956_v19, %v9673_v58  ;;  %v2918_v48 = vrot.slane %v2916_v24, 4  ;;  %vm10089_vm9 = vmand %vm10065_vm2, %vm2487_vm15  ;;  %v3998_v24 = vld [vmem:[#allocation2 + $0x44] sm:$0xf] }
 0x173   : > { %v7202_v23 = vpop.f32.mrf.mxu0  ;;  %v2921_v10 = vrot.slane %v2919_v0, 5  ;;  %vm2471_vm5 = vcmp.le.f32.partialorder %v10001_v4, 16.0  ;;  %v3660_v41 = vsel %vm12469_vm0, %v3657_v61, %v3659_v14  ;;  %vm2489_vm13 = vcmp.ge.f32.partialorder %v10050_v46, 1.0  ;;  %v10097_v61 = vld [vmem:[#allocation2 + $0x54] ss:$0 sps:$4 sm:$0x33]   ;;  %vm12472_vm15 = vmmov %vm12466_vm7 }
 0x174   : > { %2975 = vrot.lane.b32.xlu1 %v2958_v5, %s7764_s9  ;;  %v7216_v35 = vpop.f32.mrf.mxu1  ;;  %v3601_v5 = vshrl.u32 %v9986_v37, 16  ;;  %v3605_v55 = vshll.u32 %v10028_v50, 16  ;;  %v2225_v19 = vadd.f32 %v9983_v62, %v9748_v6  ;;  %v2721_v37 = vshrl.u32 %v10010_v20, 16  ;;  %vm10108_vm14 = vmand %vm2461_vm8, %vm2470_vm1  ;;  %v3999_v0 = vld [vmem:[#allocation2 + $0x48] sm:$0xf] }
 0x175   : > { %v2150_v57 = vpop.f32.mrf.mxu0  ;;  %vm2507_vm12 = vcmp.le.f32.partialorder %v10050_v46, 16.0  ;;  %v6562_v17 = vcombine.low %v10059_v2, %v10099_v30  ;;  %v2720_v42 = vsel %vm12472_vm15, %v2715_v47, %v2719_v25  ;;  %v2913_v62 = vor.u32 %v2912_v60, %v2909_v9  ;;  %vm10122_vm8 = vmand %vm10089_vm9, %vm2505_vm4 }
 0x176   : > { %2776 = vrot.lane.b32.xlu0 %v2761_v31, %s7764_s9  ;;  %v10082_v13 = vpop.f32.mrf.mxu1  ;;  %v4000_v31 = vld [vmem:[#allocation2 + $0x4c] sm:$0xf]  ;;  %v3603_v20 = vor.u32 %v3601_v5, %v3599_v26  ;;  %v3625_v49 = vshrl.u32 %v10070_v36, 16  ;;  %v2922_v21 = vor.u32 %v2921_v10, %v2918_v48  ;;  %v2961_v57 = vrot.slane %v7618_v8, 5  ;;  %vm10141_vm4 = vmand %vm10108_vm14, %vm2488_vm10 }
 0x177   : > { %v7203_v12 = vpop.f32.mrf.mxu0  ;;  %v10126_v9 = vrot.slane %v3605_v55, 1  ;;  %v10128_v60 = vcombine.low %v3999_v0, %v4000_v31  ;;  %v10130_v35 = vcombine.low %v4014_v59, %v3998_v24  ;;  %v2723_v48 = vor.u32 %v2721_v37, %v2719_v25  ;;  %v12479_v8 = vld [vmem:[#allocation5_spill] sm:$0xff]  ;;  %vm10154_vm3 = vmand %vm2462_vm6, %vm2471_vm5 }
 0x178   : > { %3673 = vrot.lane.b32.xlu1 %v3658_v18, %s7764_s9  ;;  %v7217_v23 = vpop.f32.mrf.mxu1  ;;  %v3663_v10 = vrot.slane %v10097_v61, 1  ;;  %v10147_v12 = vadd.f32 256.0, %v12479_v8  ;;  %vm12480_vm1 = vsmask.f32 3328  ;;  %vm12483_vm10 = vmmov %vm12466_vm7  ;;  %v10163_v58 = vcombine.low %v4001_v54, %v10116_v7  ;;  %v10190_v24 = vld [vmem:[#allocation2 + $0x4c] sm:$0xff]  }
 0x179   : > { %v2359_v28 = vpop.f32.mrf.mxu0  ;;  %v2923_v5 = vsel %vm12480_vm1, %v2913_v62, %v2922_v21  ;;  %v3608_v59 = vsel %vm12483_vm10, %v3603_v20, %v10126_v9  ;;  %vm12484_vm7 = vmmov %vm12480_vm1  ;;  %vm12486_vm6 = vcmask 1042432   ;;  %vm12492_vm5 = vcmask 257024   ;;  %v10284_v61 = vld [vmem:[#allocation2 + $0x5c] sm:$0xf] }
 0x17a   : > { %3635 = vrot.lane.b32.xlu0 %v3600_v15, %s7765_s10  ;;  %v2397_v18 = vadd.f32 %v2359_v28, %v2222_v43  ;;  %v2230_v15 = vadd.f32 %v9999_v1, %v9815_v45  ;;  %v10132_v45 = vcombine.low %v4000_v31, %v4001_v54  ;;  %v10134_v1 = vpop.f32.mrf.mxu1  ;;  %v2914_v25 = vsel %vm12484_vm7, %v9951_v29, %v2913_v62  ;;  %v10177_v29 = vld [vmem:[%s11933_s2 + $0x28] sm:$0xff]   ;;  %vm10183_vm2 = vmand %vm10141_vm4, %vm2506_vm11 }
 0x17b   : > { %v7230_v47 = vpop.f32.mrf.mxu0  ;;  %12485 = vst [vmem:[#allocation4_spill] sm:$0xff] %v10163_v58  ;;  %v10171_v4 = vsel %vm12486_vm6, %v2959_v51, %v2961_v57  ;;  %v4154_v51 = vrot.slane %v10130_v35, 1  ;;  %v4155_v62 = vrot.slane %v10128_v60, 1  ;;  %vm10199_vm11 = vmand %vm10154_vm3, %vm2489_vm13  ;;  %v12491_v57 = vld [vmem:[#allocation8_spill] sm:$0xff]  ;;  %7276 = vmatprep.subr.bf16.mxu1 %v10177_v29  ;;  %v4157_v40 = vrot.slane %v10163_v58, 1 }
 0x17c   : > { %3675 = vrot.lane.b32.xlu1 %v3660_v41, %s7764_s9  ;;  %v2523_v43 = vmax.f32 %v2397_v18, 0.0  ;;  %v7220_v37 = vpop.f32.mrf.mxu1  ;;  %v4351_v20 = vrot.slane %v10132_v45, 5  ;;  %v4063_v18 = vshrl.u32 %v10130_v35, 16  ;;  %v10205_v54 = vadd.f32 256.0, %v12491_v57  ;;  %vm10222_vm0 = vmand %vm10199_vm11, %vm2507_vm12 }
 0x17d   : > { %v2362_v41 = vpop.f32.mrf.mxu0  ;;  %v4065_v47 = vshll.u32 %v10130_v35, 16  ;;  %vm12495_vm13 = vcmask 1046528   ;;  %vm12496_vm14 = vmmov %vm12492_vm5  ;;  %v3613_v46 = vshll.u32 %v10190_v24, 16 }
 0x17e   : > { %2738 = vrot.lane.b32.xlu0 %v2720_v42, %s7765_s10  ;;  %v2532_v31 = vsel %vm10122_vm8, %v2523_v43, 0.0  ;;  %v2398_v28 = vadd.f32 %v2362_v41, %v2225_v19  ;;  %v2418_v42 = vadd.f32 0.5, %v10147_v12  ;;  %v10192_v0 = vpop.f32.mrf.mxu1  ;;  %v4070_v43 = vshll.u32 %v10128_v60, 16  ;;  %vm12500_vm1 = vmmov %vm12492_vm5 }
 0x17f   : > { %v6876_v6 = vpack.c.bf16 %v2532_v31, %v2532_v31  ;;  %v7231_v34 = vpop.f32.mrf.mxu0  ;;  %v2419_v37 = vadd.f32 0.5, %v10205_v54  ;;  %vm12501_vm3 = vmmov %vm12495_vm13 }
 0x180   : > { %2940 = vrot.lane.b32.xlu1 %v2922_v21, %s7765_s10  ;;  %v2524_v23 = vmax.f32 %v2398_v28, 0.0  ;;  %v2427_v21 = vmul.f32 0.055555556, %v2418_v42  ;;  %v7221_v8 = vpop.f32.mrf.mxu1  ;;  %v4074_v34 = vshrl.u32 %v10128_v60, 16 }
 0x181   : > { %2578 = vst.msk [vmem:[#allocation2 + $0x8c] sm:$0xf] %vm12492_vm5, %v6876_v6  ;;  %v2367_v26 = vpop.f32.mrf.mxu0  ;;  %v2428_v32 = vmul.f32 0.055555556, %v2419_v37 }
 0x182   : > { %2938 = vrot.lane.b32.xlu0 %v2923_v5, %s7765_s10  ;;  %v2533_v41 = vsel %vm10183_vm2, %v2524_v23, 0.0  ;;  %v2399_v5 = vadd.f32 %v2367_v26, %v2230_v15  ;;  %v2436_v55 = vfloor.f32 %v2427_v21  ;;  %v3609_v15 = vshrl.u32 %v10028_v50, 16  ;;  %vm12502_vm2 = vmmov %vm12501_vm3 }
 0x183   : > { %v6877_v31 = vpack.c.bf16 %v2533_v41, %v2533_v41  ;;  %v7234_v42 = vpop.f32.mrf.mxu0  ;;  %v2238_v23 = vadd.f32 %v10052_v39, %v9920_v52  ;;  %v12499_v41 = vld [vmem:[#allocation10_spill] sm:$0xff]  ;;  %v4067_v52 = vrot.slane %v4065_v47, 1  ;;  %v4072_v39 = vrot.slane %v4070_v43, 1 }
 0x184   : > { %2740 = vrot.lane.b32.xlu1 %v2723_v48, %s7765_s10  ;;  %v2233_v48 = vadd.f32 %v10024_v33, %v9870_v44  ;;  %v4156_v44 = vsel %vm12495_vm13, %v4154_v51, %v4155_v62  ;;  %v3661_v33 = vrot.slane %v10190_v24, 1  ;;  %v2525_v6 = vmax.f32 %v2399_v5, 0.0 }
 0x185   : > { %v2445_v19 = vmul.f32 18.0, %v2436_v55  ;;  %vm2463_vm9 = vcmp.ge.f32.partialorder %v2436_v55, 1.0  ;;  %vm2472_vm15 = vcmp.le.f32.partialorder %v2436_v55, 16.0  ;;  %2579 = vst.msk [vmem:[#allocation2 + $0x90] sm:$0xf] %vm12496_vm14, %v6877_v31  ;;  %v2370_v51 = vpop.f32.mrf.mxu0  ;;  %v2411_v5 = vadd.f32 256.0, %v12499_v41 }
 0x186   : > { %3637 = vrot.lane.b32.xlu0 %v3608_v59, %s7765_s10  ;;  %v10229_v59 = vpop.f32.mrf.mxu1  ;;  %v2534_v57 = vsel %vm10222_vm0, %v2525_v6, 0.0  ;;  %vm10243_vm12 = vmand %vm2463_vm9, %vm2472_vm15  ;;  %v2437_v31 = vfloor.f32 %v2428_v32  ;;  %v3662_v6 = vsel %vm12502_vm2, %v3659_v14, %v3661_v33  ;;  %v3611_v32 = vor.u32 %v3609_v15, %v10126_v9  ;;  %v4003_v15 = vld [vmem:[#allocation2 + $0x58] sm:$0xf] }
 0x187   : > { %v2454_v26 = vsub.f32 %v10147_v12, %v2445_v19  ;;  %v6878_v55 = vpack.c.bf16 %v2534_v57, %v2534_v57  ;;  %v7235_v37 = vpop.f32.mrf.mxu0  ;;  %v2420_v12 = vadd.f32 0.5, %v2411_v5  ;;  %vm12505_vm0 = vmmov %vm12502_vm2 }
 0x188   : > { %2936 = vrot.lane.b32.xlu1 %v2914_v25, %s7765_s10  ;;  %v7224_v21 = vpop.f32.mrf.mxu1  ;;  %v2400_v25 = vadd.f32 %v2370_v51, %v2233_v48  ;;  %v4158_v48 = vsel %vm12501_vm3, %v4155_v62, %v4157_v40  ;;  %v2446_v43 = vmul.f32 18.0, %v2437_v31  ;;  %vm2464_vm7 = vcmp.ge.f32.partialorder %v2437_v31, 1.0  ;;  %vm12507_vm15 = vmmov %vm12500_vm1 }
 0x189   : > { %vm2490_vm8 = vcmp.ge.f32.partialorder %v2454_v26, 1.0  ;;  %vm2508_vm4 = vcmp.le.f32.partialorder %v2454_v26, 16.0  ;;  %2580 = vst.msk [vmem:[#allocation2 + $0x94] sm:$0xf] %vm12500_vm1, %v6878_v55  ;;  %v2375_v47 = vpop.f32.mrf.mxu0  ;;  %vm2473_vm6 = vcmp.le.f32.partialorder %v2437_v31, 16.0  ;;  %v2241_v62 = vadd.f32 %v10082_v13, %v9963_v53  ;;  %vm12513_vm2 = vmmov %vm12507_vm15 }
 0x18a   : > { %3643 = vrot.lane.b32.xlu0 %v3625_v49, %s7765_s10  ;;  %v2256_v28 = vpop.f32.mrf.mxu1  ;;  %v2526_v49 = vmax.f32 %v2400_v25, 0.0  ;;  %vm2499_vm10 = vmand %vm10243_vm12, %vm2490_vm8  ;;  %v2401_v19 = vadd.f32 %v2375_v47, %v2238_v23  ;;  %v2429_v51 = vmul.f32 0.055555556, %v2420_v12  ;;  %v10265_v21 = vrot.slane %v3613_v46, 1  ;;  %v12506_v46 = vld [vmem:[#allocation7_spill] sm:$0xff] }
 0x18b   : > { %vm2517_vm11 = vmand %vm2499_vm10, %vm2508_vm4  ;;  %v2455_v25 = vsub.f32 %v10205_v54, %v2446_v43  ;;  %v7238_v50 = vpop.f32.mrf.mxu0  ;;  %v10276_v14 = vsel %vm12505_vm0, %v3661_v33, %v3663_v10  ;;  %v2412_v23 = vadd.f32 256.0, %v12506_v46  ;;  %vm12508_vm4 = vsmask.f32 7424  ;;  %v4005_v46 = vld [vmem:[#allocation2 + $0x60] sm:$0xf] }
 0x18c   : > { %3681 = vrot.lane.b32.xlu1 %v3663_v10, %s7764_s9  ;;  %v7225_v42 = vpop.f32.mrf.mxu1  ;;  %v2535_v57 = vsel %vm2517_vm11, %v2526_v49, 0.0  ;;  %vm10268_vm5 = vmand %vm2464_vm7, %vm2473_vm6  ;;  %v2527_v13 = vmax.f32 %v2401_v19, 0.0  ;;  %v2438_v9 = vfloor.f32 %v2429_v51  ;;  %v10292_v33 = vcombine.low %v10116_v7, %v4003_v15  ;;  %v10345_v31 = vld [vmem:[#allocation2 + $0x8] sm:$0x8] }
 0x18d   : > { %v6879_v53 = vpack.c.bf16 %v2535_v57, %v2535_v57  ;;  %vm2491_vm13 = vcmp.ge.f32.partialorder %v2455_v25, 1.0  ;;  %vm2509_vm9 = vcmp.le.f32.partialorder %v2455_v25, 16.0  ;;  %v2378_v54 = vpop.f32.mrf.mxu0  ;;  %v2421_v41 = vadd.f32 0.5, %v2412_v23  ;;  %vm12512_vm10 = vmmov %vm12508_vm4 }
 0x18e   : > { %2979 = vrot.lane.b32.xlu0 %v10171_v4, %s7764_s9  ;;  %v4068_v4 = vor.u32 %v4067_v52, %v4063_v18  ;;  %vm2500_vm14 = vmand %vm10268_vm5, %vm2491_vm13  ;;  %v2402_v10 = vadd.f32 %v2378_v54, %v2241_v62  ;;  %v2447_v35 = vmul.f32 18.0, %v2438_v9  ;;  %vm2465_vm12 = vcmp.ge.f32.partialorder %v2438_v9, 1.0 }
 0x18f   : > { %2581 = vst.msk [vmem:[#allocation2 + $0x98] sm:$0xf] %vm12507_vm15, %v6879_v53  ;;  %vm2474_vm8 = vcmp.le.f32.partialorder %v2438_v9, 16.0  ;;  %vm2518_vm1 = vmand %vm2500_vm14, %vm2509_vm9  ;;  %v7239_v8 = vpop.f32.mrf.mxu0  ;;  %v4076_v55 = vor.u32 %v4074_v34, %v4072_v39  ;;  %v2246_v28 = vadd.f32 %v10134_v1, %v9989_v22  ;;  %v10304_v7 = vcombine.low %v4003_v15, %v10284_v61 }
 0x190   : > { %4171 = vrot.lane.b32.xlu1 %v4156_v44, %s7764_s9  ;;  %v4073_v18 = vsel %vm12508_vm4, %v4068_v4, %v4072_v39  ;;  %v4078_v44 = vshll.u32 %v10163_v58, 16  ;;  %v2536_v52 = vsel %vm2518_vm1, %v2527_v13, 0.0  ;;  %v2456_v37 = vsub.f32 %v2411_v5, %v2447_v35  ;;  %vm10297_vm3 = vmand %vm2465_vm12, %vm2474_vm8  ;;  %v4006_v13 = vld [vmem:[#allocation2 + $0x64] sm:$0xf] }
 0x191   : > { %12511 = vst [vmem:[#allocation13_spill] sm:$0xff] %v10304_v7  ;;  %v6880_v49 = vpack.c.bf16 %v2536_v52, %v2536_v52  ;;  %v2528_v12 = vmax.f32 %v2402_v10, 0.0  ;;  %v2383_v47 = vpop.f32.mrf.mxu0  ;;  %v2430_v43 = vmul.f32 0.055555556, %v2421_v41  ;;  %v3616_v34 = vsel %vm12512_vm10, %v3611_v32, %v10265_v21  ;;  %vm12516_vm15 = vmmov %vm12513_vm2  ;;  %v12517_v41 = vld [vmem:[#allocation9_spill] sm:$0xff] }
 0x192   : > { %4368 = vrot.lane.b32.xlu0 %v4351_v20, %s7764_s9  ;;  %v4260_v5 = vshrl.u32 %v10132_v45, 16  ;;  %vm2492_vm7 = vcmp.ge.f32.partialorder %v2456_v37, 1.0  ;;  %vm2510_vm6 = vcmp.le.f32.partialorder %v2456_v37, 16.0  ;;  %v4263_v39 = vshll.u32 %v10132_v45, 16  ;;  %vm12518_vm14 = vmmov %vm12508_vm4 }
 0x193   : > { %v4268_v22 = vshrl.u32 %v10292_v33, 16  ;;  %v4271_v1 = vshll.u32 %v10292_v33, 16  ;;  %2582 = vst.msk [vmem:[#allocation2 + $0x9c] sm:$0xf] %vm12513_vm2, %v6880_v49  ;;  %vm2501_vm11 = vmand %vm10297_vm3, %vm2492_vm7  ;;  %v2439_v42 = vfloor.f32 %v2430_v43  ;;  %v4080_v19 = vrot.slane %v4078_v44, 1 }
 0x194   : > { %4133 = vrot.lane.b32.xlu1 %v4073_v18, %s7765_s10  ;;  %v4352_v62 = vrot.slane %v10292_v33, 5  ;;  %v3617_v51 = vshrl.u32 %v10190_v24, 16  ;;  %vm2519_vm5 = vmand %vm2501_vm11, %vm2510_vm6  ;;  %v2403_v32 = vadd.f32 %v2383_v47, %v2246_v28  ;;  %v4262_v50 = vrot.slane %v4260_v5, 4  ;;  %v10327_v24 = vld [vmem:[%s11933_s2 + $0x28] sm:$0xff]   ;;  %v10349_v28 = vpop.permute.xlu1 %2762  ;;  %v4894_v5 = vld [vmem:[#allocation2 + $0x58] sm:$0xf] }
 0x195   : > { %v2537_v57 = vsel %vm2519_vm5, %v2528_v12, 0.0  ;;  %v2448_v25 = vmul.f32 18.0, %v2439_v42  ;;  %vm2466_vm0 = vcmp.ge.f32.partialorder %v2439_v42, 1.0  ;;  %vm2475_vm13 = vcmp.le.f32.partialorder %v2439_v42, 16.0  ;;  %7360 = vmatprep.subr.bf16.mxu0 %v10327_v24  ;;  %v10367_v42 = vpop.permute.xlu0 %2724  ;;  %vm12522_vm7 = vmmov %vm12518_vm14 }
 0x196   : > { %4173 = vrot.lane.b32.xlu0 %v4158_v48, %s7764_s9  ;;  %v7242_v48 = vpop.f32.mrf.mxu0  ;;  %v3621_v53 = vshll.u32 %v10070_v36, 16  ;;  %v6881_v9 = vpack.c.bf16 %v2537_v57, %v2537_v57  ;;  %v4265_v4 = vrot.slane %v4263_v39, 5  ;;  %v4270_v15 = vrot.slane %v4268_v22, 4  ;;  %vm10330_vm9 = vmand %vm2466_vm0, %vm2475_vm13  ;;  %v4910_v39 = vld [vmem:[#allocation2 + $0x54] sm:$0xe] }
 0x197   : > { %v4273_v54 = vrot.slane %v4271_v1, 5  ;;  %v2457_v10 = vsub.f32 %v2412_v23, %v2448_v25  ;;  %v4159_v18 = vrot.slane %v10304_v7, 1  ;;  %v4086_v44 = vshll.u32 %v10304_v7, 16  ;;  %v10381_v25 = vld [vmem:[#allocation2 + $0x5c] sm:$0xff]   ;;  %vm12523_vm6 = vmmov %vm12522_vm7 }
 0x198   : > { %3677 = vrot.lane.b32.xlu1 %v3662_v6, %s7764_s9  ;;  %v10319_v26 = vpop.f32.mrf.mxu0  ;;  %v4082_v6 = vshrl.u32 %v10163_v58, 16  ;;  %2583 = vst.msk [vmem:[#allocation2 + $0xa0] sm:$0xf] %vm12516_vm15, %v6881_v9  ;;  %v2529_v8 = vmax.f32 %v2403_v32, 0.0  ;;  %v10340_v52 = vadd.f32 256.0, %v12517_v41  ;;  %v4081_v23 = vsel %vm12518_vm14, %v4076_v55, %v4080_v19  ;;  %vm12525_vm11 = vmmov %vm12516_vm15 }
 0x199   : > { %v3619_v37 = vor.u32 %v3617_v51, %v10265_v21  ;;  %vm2493_vm12 = vcmp.ge.f32.partialorder %v2457_v10, 1.0  ;;  %vm2511_vm8 = vcmp.le.f32.partialorder %v2457_v10, 16.0  ;;  %v3623_v49 = vrot.slane %v3621_v53, 1  ;;  %v10397_v35 = vpop.permute.xlu0 %2965 }
 0x19a   : > { %3639 = vrot.lane.b32.xlu0 %v3616_v34, %s7765_s10  ;;  %v7243_v36 = vpop.f32.mrf.mxu0  ;;  %v4084_v12 = vor.u32 %v4082_v6, %v4080_v19  ;;  %v10352_v47 = vcombine.low %v4005_v46, %v4006_v13  ;;  %vm2502_vm4 = vmand %vm10330_vm9, %vm2493_vm12  ;;  %v2422_v55 = vadd.f32 0.5, %v10340_v52  ;;  %vm12520_vm1 = vcmask 1042432   ;;  %v10369_v19 = vld [vmem:[#allocation2 + $0xc] sm:$0xf]  ;;  %v10383_v6 = vpop.permute.xlu1 %2963 }
 0x19b   : > { %v4353_v21 = vsel %vm12520_vm1, %v4351_v20, %v4352_v62  ;;  %v4266_v43 = vor.u32 %v4265_v4, %v4262_v50  ;;  %v10362_v34 = vor.u32 %v4273_v54, %v4270_v15  ;;  %vm2520_vm3 = vmand %vm2502_vm4, %vm2511_vm8  ;;  %v2249_v22 = vadd.f32 %v10192_v0, %v10005_v63  ;;  %v4007_v20 = vld [vmem:[#allocation2 + $0x68] sm:$0xf] }
 0x19c   : > { %3679 = vrot.lane.b32.xlu1 %v10276_v14, %s7764_s9  ;;  %v10347_v14 = vpop.f32.mrf.mxu0  ;;  %12519 = vst [vmem:[#allocation14_spill] sm:$0xff] %v10352_v47  ;;  %v4088_v48 = vrot.slane %v4086_v44, 1  ;;  %v6573_v45 = vcombine.low %v10345_v31, %v10369_v19  ;;  %v2538_v51 = vsel %vm2520_vm3, %v2529_v8, 0.0  ;;  %v2431_v32 = vmul.f32 0.055555556, %v2422_v55  ;;  %v10399_v36 = vld [vmem:[#allocation2 + $0x64] sm:$0xff]  }
 0x19d   : > { %vm12521_vm10 = vcmask 1046528   ;;  %v6678_v0 = vcombine.low %v10284_v61, %v4005_v46  ;;  %v10379_v57 = vcombine.low %v4006_v13, %v4007_v20  ;;  %v6882_v50 = vpack.c.bf16 %v2538_v51, %v2538_v51 }
 0x19e   : > { %4135 = vrot.lane.b32.xlu0 %v4081_v23, %s7765_s10  ;;  %v7246_v1 = vpop.f32.mrf.mxu0  ;;  %v4160_v63 = vsel %vm12521_vm10, %v4157_v40, %v4159_v18  ;;  %v3624_v9 = vsel %vm12522_vm7, %v3619_v37, %v3623_v49  ;;  %v4089_v4 = vsel %vm12523_vm6, %v4084_v12, %v4088_v48  ;;  %v4161_v15 = vrot.slane %v10352_v47, 1  ;;  %v10405_v49 = vpop.permute.xlu1 %2726  ;;  %v10408_v12 = vld [vmem:[#allocation2 + $0x6c] sm:$0xf]  ;;  %vm12529_vm4 = vmmov %vm12521_vm10 }
 0x19f   : > { %v2440_v54 = vfloor.f32 %v2431_v32  ;;  %vm12524_vm2 = vsmask.f32 3328  ;;  %v10391_v61 = vcombine.low %v4910_v39, %v4894_v5  ;;  %v4090_v13 = vshrl.u32 %v10304_v7, 16  ;;  %2584 = vst.msk [vmem:[#allocation2 + $0xa4] sm:$0xf] %vm12525_vm11, %v6882_v50  ;;  %v12528_v5 = vld [vmem:[#allocation11_spill] sm:$0xff]  ;;  %vm12531_vm10 = vmmov %vm12520_vm1 }
 0x1a0   : > { %4370 = vrot.lane.b32.xlu1 %v4353_v21, %s7764_s9  ;;  %v2394_v53 = vpop.f32.mrf.mxu0  ;;  %v4275_v40 = vsel %vm12524_vm2, %v4266_v43, %v10362_v34  ;;  %v2404_v46 = vadd.f32 %v10319_v26, %v2249_v22  ;;  %vm2780_vm5 = vcmask 261120   ;;  %v4094_v44 = vshll.u32 %v10352_v47, 16  ;;  %vm12532_vm7 = vmmov %vm12529_vm4 }
 0x1a1   : > { %v2449_v8 = vmul.f32 18.0, %v2440_v54  ;;  %vm2467_vm0 = vcmp.ge.f32.partialorder %v2440_v54, 1.0  ;;  %vm2476_vm13 = vcmp.le.f32.partialorder %v2440_v54, 16.0  ;;  %vm2800_vm9 = vcmask 523264   ;;  %vm12533_vm6 = vmmov %vm12529_vm4 }
 0x1a2   : > { %4330 = vrot.lane.b32.xlu0 %v4266_v43, %s7765_s10  ;;  %v7247_v10 = vpop.f32.mrf.mxu0  ;;  %v4354_v41 = vrot.slane %v6678_v0, 5  ;;  %v4356_v23 = vrot.slane %v10379_v57, 5  ;;  %v5049_v37 = vrot.slane %v10391_v61, 1  ;;  %v5050_v26 = vrot.slane %v10381_v25, 1  ;;  %vm10412_vm15 = vmand %vm2467_vm0, %vm2476_vm13  ;;  %v10437_v54 = vpop.permute.xlu1 %2766 }
 0x1a3   : > { %v5052_v55 = vrot.slane %v10399_v36, 1  ;;  %v2458_v21 = vsub.f32 %v10340_v52, %v2449_v8  ;;  %vm180_vm14 = vcmask 254976   ;;  %v2414_v39 = vadd.f32 256.0, %v12528_v5 }
 0x1a4   : > { %4175 = vrot.lane.b32.xlu1 %v4160_v63, %s7764_s9  ;;  %v4092_v22 = vor.u32 %v4090_v13, %v4088_v48  ;;  %v4277_v1 = vshrl.u32 %v6678_v0, 16  ;;  %v4280_v51 = vshll.u32 %v6678_v0, 16  ;;  %v2530_v32 = vmax.f32 %v2404_v46, 0.0  ;;  %v10418_v63 = vpop.permute.xlu0 %2764 }
 0x1a5   : > { %v10420_v50 = vrot.slane %v4094_v44, 1  ;;  %vm2494_vm12 = vcmp.ge.f32.partialorder %v2458_v21, 1.0  ;;  %vm2512_vm8 = vcmp.le.f32.partialorder %v2458_v21, 16.0  ;;  %v2423_v52 = vadd.f32 0.5, %v2414_v39 }
 0x1a6   : > { %3641 = vrot.lane.b32.xlu0 %v3624_v9, %s7765_s10  ;;  %v4162_v53 = vsel %vm12529_vm4, %v4159_v18, %v4161_v15  ;;  %v4355_v48 = vsel %vm12520_vm1, %v4352_v62, %v4354_v41  ;;  %v10431_v0 = vcombine.low %v4007_v20, %v10408_v12  ;;  %vm2503_vm3 = vmand %vm10412_vm15, %vm2494_vm12  ;;  %v2254_v9 = vadd.f32 %v10229_v59, %v10032_v11  ;;  %v10461_v5 = vpop.permute.xlu1 %2967 }
 0x1a7   : > { %v4357_v18 = vsel %vm12531_vm10, %v4354_v41, %v4356_v23  ;;  %v5051_v33 = vsel %vm12532_vm7, %v5049_v37, %v5050_v26  ;;  %v5053_v62 = vsel %vm12533_vm6, %v5050_v26, %v5052_v55  ;;  %vm2521_vm2 = vmand %vm2503_vm3, %vm2512_vm8  ;;  %v2432_v20 = vmul.f32 0.055555556, %v2423_v52  ;;  %v12538_v52 = vld [vmem:[#allocation25_spill] sm:$0xff] }
 0x1a8   : > { %4332 = vrot.lane.b32.xlu1 %v4275_v40, %s7765_s10  ;;  %12530 = vst [vmem:[#allocation18_spill] sm:$0xff] %v10431_v0  ;;  %v4279_v40 = vrot.slane %v4277_v1, 4  ;;  %v4282_v13 = vrot.slane %v4280_v51, 5  ;;  %v4959_v11 = vshrl.u32 %v10391_v61, 16  ;;  %v2539_v59 = vsel %vm2521_vm2, %v2530_v32, 0.0 }
 0x1a9   : > { %vm12534_vm11 = vsmask.f32 7424  ;;  %v4961_v10 = vshll.u32 %v10391_v61, 16  ;;  %v6883_v44 = vpack.c.bf16 %v2539_v59, %v2539_v59  ;;  %v2441_v8 = vfloor.f32 %v2432_v20 }
 0x1aa   : > { %4137 = vrot.lane.b32.xlu0 %v4089_v4, %s7765_s10  ;;  %v2925_v4 = vpop.permute.xlu0 %2924  ;;  %v4097_v46 = vsel %vm12534_vm11, %v4092_v22, %v10420_v50  ;;  %v4966_v37 = vshll.u32 %v10381_v25, 16  ;;  %v4286_v26 = vshrl.u32 %v10379_v57, 16  ;;  %v2405_v21 = vadd.f32 %v10347_v14, %v2254_v9  ;;  %vm12541_vm2 = vmmov %vm12534_vm11 }
 0x1ab   : > { %v2983_v41 = vsel %vm2780_vm5, %v6573_v45, %v2925_v4  ;;  %vm3033_vm0 = vsmask.f32 4352  ;;  %v4289_v61 = vshll.u32 %v10379_v57, 16  ;;  %vm12535_vm13 = vcmask 257024   ;;  %v10614_v57 = vld [vmem:[#allocation2 + $0x74] sm:$0xff]  }
 0x1ac   : > { %4177 = vrot.lane.b32.xlu1 %v4162_v53, %s7764_s9  ;;  %v3003_v43 = vsel %vm2800_vm9, %v2983_v41, %v10383_v6  ;;  %2585 = vst.msk [vmem:[#allocation2 + $0xa8] sm:$0xf] %vm12535_vm13, %v6883_v44  ;;  %v2450_v31 = vmul.f32 18.0, %v2441_v8  ;;  %vm2468_vm15 = vcmp.ge.f32.partialorder %v2441_v8, 1.0  ;;  %v10466_v22 = vor.u32 %v4282_v13, %v4279_v40  ;;  %v4009_v41 = vld [vmem:[#allocation2 + $0x70] sm:$0xf]  ;;  %vm12545_vm13 = vmmov %vm12541_vm2 }
 0x1ad   : > { %v3034_v19 = vshrl.u32 %v3003_v43, 16  ;;  %v3037_v45 = vshll.u32 %v3003_v43, 16  ;;  %vm2477_vm12 = vcmp.le.f32.partialorder %v2441_v8, 16.0  ;;  %v4963_v6 = vrot.slane %v4961_v10, 1  ;;  %v4010_v43 = vld [vmem:[#allocation2 + $0x74] sm:$0xf] }
 0x1ae   : > { %4372 = vrot.lane.b32.xlu0 %v4355_v48, %s7764_s9  ;;  %v2927_v14 = vpop.permute.xlu0 %2926  ;;  %vm3141_vm8 = vcmask 785408   ;;  %v4970_v1 = vshrl.u32 %v10381_v25, 16  ;;  %v2459_v51 = vsub.f32 %v2414_v39, %v2450_v31  ;;  %vm10470_vm4 = vmand %vm2468_vm15, %vm2477_vm12  ;;  %v4968_v48 = vrot.slane %v4966_v37, 1 }
 0x1af   : > { %v2985_v53 = vsel %vm2780_vm5, %v12538_v52, %v2927_v14  ;;  %v4288_v9 = vrot.slane %v4286_v26, 4  ;;  %v2531_v20 = vmax.f32 %v2405_v21, 0.0  ;;  %v4291_v13 = vrot.slane %v4289_v61, 5  ;;  %vm12546_vm15 = vmmov %vm12541_vm2 }
 0x1b0   : > { %4374 = vrot.lane.b32.xlu1 %v4357_v18, %s7764_s9  ;;  %v3005_v40 = vsel %vm2800_vm9, %v2985_v53, %v10397_v35  ;;  %v10478_v18 = vpop.permute.xlu1 %3667  ;;  %vm2495_vm1 = vcmp.ge.f32.partialorder %v2459_v51, 1.0  ;;  %vm2513_vm3 = vcmp.le.f32.partialorder %v2459_v51, 16.0  ;;  %v3036_v25 = vrot.slane %v3034_v19, 3 }
 0x1b1   : > { %v3039_v39 = vrot.slane %v3037_v45, 4  ;;  %v3041_v59 = vshrl.u32 %v3005_v40, 16  ;;  %v3044_v4 = vshll.u32 %v3005_v40, 16  ;;  %vm2504_vm10 = vmand %vm10470_vm4, %vm2495_vm1  ;;  %vm12539_vm7 = vsmask.f32 3328 }
 0x1b2   : > { %5066 = vrot.lane.b32.xlu0 %v5051_v33, %s7764_s9  ;;  %v10484_v10 = vpop.permute.xlu0 %2728  ;;  %v4284_v35 = vsel %vm12539_vm7, %v10362_v34, %v10466_v22  ;;  %v4964_v44 = vor.u32 %v4963_v6, %v4959_v11  ;;  %v4163_v33 = vrot.slane %v10431_v0, 1  ;;  %v4972_v8 = vor.u32 %v4970_v1, %v4968_v48  ;;  %vm2522_vm6 = vmand %vm2504_vm10, %vm2513_vm3  ;;  %v3492_v1 = vld [vmem:[#allocation2 + $0x14] sm:$0xf] }
 0x1b3   : > { %v3043_v37 = vrot.slane %v3041_v59, 3  ;;  %v3046_v26 = vrot.slane %v3044_v4, 4  ;;  %v4974_v21 = vshll.u32 %v10399_v36, 16  ;;  %v2540_v61 = vsel %vm2522_vm6, %v2531_v20, 0.0  ;;  %vm12549_vm1 = vmmov %vm12541_vm2 }
 0x1b4   : > { %5068 = vrot.lane.b32.xlu1 %v5053_v62, %s7764_s9  ;;  %v3628_v31 = vpop.permute.xlu1 %3627  ;;  %v10492_v62 = vor.u32 %v4291_v13, %v4288_v9  ;;  %v4098_v19 = vshrl.u32 %v10352_v47, 16  ;;  %v4102_v34 = vshll.u32 %v10431_v0, 16  ;;  %v6884_v11 = vpack.c.bf16 %v2540_v61, %v2540_v61  ;;  %vm12553_vm6 = vmmov %vm12539_vm7 }
 0x1b5   : > { %v2783_v45 = vsel %vm2780_vm5, %v6562_v17, %v10367_v42  ;;  %v3040_v14 = vor.u32 %v3039_v39, %v3036_v25  ;;  %v10501_v6 = vor.u32 %v3046_v26, %v3043_v37  ;;  %v10504_v51 = vcombine.low %v10408_v12, %v4009_v41 }
 0x1b6   : > { %4139 = vrot.lane.b32.xlu0 %v4097_v46, %s7765_s10  ;;  %v7719_v46 = vld [vmem:[#allocation2 + $0x18] sm:$0xf]  ;;  %v10507_v53 = vpop.permute.xlu0 %2969  ;;  %v10509_v9 = vcombine.low %v4009_v41, %v4010_v43  ;;  %2586 = vst.msk [vmem:[#allocation2 + $0xac] sm:$0x3] %vm180_vm14, %v6884_v11  ;;  %v4969_v2 = vsel %vm12541_vm2, %v4964_v44, %v4968_v48  ;;  %vm12542_vm11 = vcmask 1046528   ;;  %v10520_v42 = vrot.slane %v4974_v21, 1  ;;  %vm12543_vm14 = vmmov %vm12539_vm7 }
 0x1b7   : > { %v6625_v32 = vcombine.low %v3492_v1, %v7719_v46  ;;  %v3048_v30 = vsel %vm3033_vm0, %v3040_v14, %v10501_v6  ;;  %v4164_v17 = vsel %vm12542_vm11, %v4161_v15, %v4163_v33  ;;  %v10524_v12 = vsel %vm2800_vm9, %v2783_v45, %v10349_v28  ;;  %v12544_v15 = vld [vmem:[#allocation16_spill] sm:$0xff]  ;;  %v10547_v44 = vld [vmem:[#allocation2 + $0x78] sm:$0xf]  ;;  %v7720_v45 = vld [vmem:[#allocation2 + $0x1c] sm:$0xff]  }
 0x1b8   : > { %4334 = vrot.lane.b32.xlu1 %v4284_v35, %s7765_s10  ;;  %12540 = vst [vmem:[#allocation21_spill] sm:$0xff] %v10509_v9  ;;  %v2929_v20 = vpop.permute.xlu1 %2928  ;;  %7260 = vmatprep.mubr.msk.bf16.mxu1 %vm3141_vm8, %v3048_v30  ;;  %v4293_v48 = vsel %vm12543_vm14, %v10466_v22, %v10492_v62  ;;  %v4100_v40 = vor.u32 %v4098_v19, %v10420_v50  ;;  %v10532_v13 = vrot.slane %v4102_v34, 1  ;;  %v4295_v59 = vshrl.u32 %v10504_v51, 16  ;;  %v10568_v30 = vld [vmem:[#allocation2 + $0x6c] sm:$0xff]   ;;  %vm12547_vm12 = vmmov %vm12542_vm11 }
 0x1b9   : > { %v2785_v25 = vsel %vm2780_vm5, %v12544_v15, %v10405_v49  ;;  %v2987_v28 = vsel %vm2780_vm5, %v8968_v56, %v2929_v20  ;;  %v4977_v39 = vsel %vm12545_vm13, %v4972_v8, %v10520_v42  ;;  %v3685_v4 = vsel %vm2780_vm5, %v6625_v32, %v3628_v31  ;;  %vm12552_vm10 = vmmov %vm12542_vm11 }
 0x1ba   : > { %5028 = vrot.lane.b32.xlu0 %v4969_v2, %s7765_s10  ;;  %v3007_v22 = vsel %vm2800_vm9, %v2987_v28, %v10461_v5  ;;  %v3666_v50 = vpop.permute.xlu0 %3665  ;;  %v4165_v35 = vrot.slane %v10509_v9, 1  ;;  %v4298_v49 = vshll.u32 %v10504_v51, 16  ;;  %v10552_v26 = vcombine.low %v4010_v43, %v10547_v44  ;;  %vm12554_vm2 = vmmov %vm12552_vm10 }
 0x1bb   : > { %v3049_v41 = vshrl.u32 %v3007_v22, 16  ;;  %v3052_v37 = vshll.u32 %v3007_v22, 16  ;;  %v3703_v8 = vsel %vm2800_vm9, %v3685_v4, %v3666_v50  ;;  %v2804_v21 = vsel %vm2800_vm9, %v2785_v25, %v10418_v63  ;;  %v7663_v22 = vld [vmem:[%s11933_s2 + $0x20] sm:$0xff]   ;;  %vm12555_vm11 = vmmov %vm12549_vm1 }
 0x1bc   : > { %4179 = vrot.lane.b32.xlu1 %v4164_v17, %s7764_s9  ;;  %v3735_v5 = vshll.u32 %v3703_v8, 16  ;;  %v3630_v61 = vpop.permute.xlu1 %3629  ;;  %v4105_v31 = vsel %vm12546_vm15, %v4100_v40, %v10532_v13  ;;  %v4358_v19 = vrot.slane %v10504_v51, 5  ;;  %v4297_v1 = vrot.slane %v4295_v59, 4  ;;  %vm12556_vm14 = vmmov %vm12549_vm1 }
 0x1bd   : > { %v3051_v34 = vrot.slane %v3049_v41, 3  ;;  %v3054_v11 = vrot.slane %v3052_v37, 4  ;;  %v3687_v14 = vsel %vm2780_vm5, %v7720_v45, %v3630_v61  ;;  %v3733_v43 = vshrl.u32 %v3703_v8, 16  ;;  %v4012_v8 = vld [vmem:[#allocation2 + $0x7c] sm:$0xf]  ;;  %vm12557_vm13 = vmmov %vm12549_vm1 }
 0x1be   : > { %4336 = vrot.lane.b32.xlu0 %v4293_v48, %s7765_s10  ;;  %v3737_v46 = vrot.slane %v3735_v5, 1  ;;  %v10563_v63 = vsel %vm2800_vm9, %v3687_v14, %v10478_v18  ;;  %v10566_v32 = vpop.permute.xlu0 %2768  ;;  %v4300_v2 = vrot.slane %v4298_v49, 5  ;;  %v4304_v20 = vshrl.u32 %v10552_v26, 16  ;;  %vm12558_vm15 = vmmov %vm12549_vm1 }
 0x1bf   : > { %v10570_v51 = vor.u32 %v3054_v11, %v3051_v34  ;;  %v3739_v17 = vshll.u32 %v10563_v63, 16  ;;  %v4307_v48 = vshll.u32 %v10552_v26, 16  ;;  %v3264_v40 = vshrl.u32 %v10524_v12, 16 }
 0x1c0   : > { %5030 = vrot.lane.b32.xlu1 %v4977_v39, %s7765_s10  ;;  %v3267_v18 = vshll.u32 %v10524_v12, 16  ;;  %v3738_v15 = vor.u32 %v3737_v46, %v3733_v43  ;;  %v10577_v25 = vpop.permute.xlu1 %2770  ;;  %v4166_v28 = vsel %vm12547_vm12, %v4163_v33, %v4165_v35  ;;  %v3271_v39 = vshrl.u32 %v2804_v21, 16 }
 0x1c1   : > { %v10585_v59 = vrot.slane %v3739_v17, 1  ;;  %v3056_v4 = vsel %vm3033_vm0, %v10501_v6, %v10570_v51  ;;  %v4360_v12 = vrot.slane %v10552_v26, 5  ;;  %v3274_v50 = vshll.u32 %v2804_v21, 16 }
 0x1c2   : > { %4141 = vrot.lane.b32.xlu0 %v4105_v31, %s7765_s10  ;;  %v2787_v49 = vsel %vm2780_vm5, %v12538_v52, %v10484_v10  ;;  %7261 = vmatmul.mubr.msk.bf16.vlgmr.msra.gmra.mxu1 %vm3141_vm8, %v3056_v4  ;;  %v10599_v33 = vpop.permute.xlu0 %2730  ;;  %vm12548_vm4 = vcmask 1042432   ;;  %v5054_v41 = vrot.slane %v10568_v30, 1  ;;  %v4301_v21 = vor.u32 %v4300_v2, %v4297_v1 }
 0x1c3   : > { %v4359_v6 = vsel %vm12548_vm4, %v4356_v23, %v4358_v19  ;;  %v3742_v37 = vsel %vm12549_vm1, %v3738_v15, %v10585_v59  ;;  %v4306_v5 = vrot.slane %v4304_v20, 4  ;;  %v4309_v61 = vrot.slane %v4307_v48, 5  ;;  %7277 = vmatpush3.bf16.msra.mxu1 %v10177_v29  ;;  %v7664_v23 = vld [vmem:[%s11933_s2 + $0x18] sm:$0xff]   ;;  %vm12550_vm3 = vmmov %vm12548_vm4 }
 0x1c4   : > { %4181 = vrot.lane.b32.xlu1 %v4166_v28, %s7764_s9  ;;  %v10608_v52 = vrot.slane %v3264_v40, 2  ;;  %v10610_v10 = vpop.permute.xlu1 %2732  ;;  %7316 = vmatprep.mubr.msk.bf16.mxu0 %vm3141_vm8, %v3742_v37  ;;  %v10619_v31 = vrot.slane %v3267_v18, 3  ;;  %v2806_v34 = vsel %vm2800_vm9, %v2787_v49, %v10437_v54  ;;  %v4361_v29 = vsel %vm12550_vm3, %v4358_v19, %v4360_v12  ;;  %vm12559_vm12 = vmmov %vm12550_vm3 }
 0x1c5   : > { %v4982_v11 = vshll.u32 %v10568_v30, 16  ;;  %7278 = vmatprep.subr.bf16.mxu1 %v7663_v22  ;;  %v10627_v45 = vrot.slane %v3271_v39, 2  ;;  %v10629_v14 = vrot.slane %v3274_v50, 3  ;;  %v10632_v1 = vcombine.low %v10547_v44, %v4012_v8  ;;  %vm12560_vm4 = vmmov %vm12554_vm2 }
 0x1c6   : > { %4376 = vrot.lane.b32.xlu0 %v4359_v6, %s7764_s9  ;;  %v2931_v43 = vpop.permute.xlu0 %2930  ;;  %v5055_v54 = vsel %vm12552_vm10, %v5052_v55, %v5054_v41  ;;  %v4302_v19 = vsel %vm12539_vm7, %v10492_v62, %v4301_v21  ;;  %v10640_v46 = vor.u32 %v4309_v61, %v4306_v5  ;;  %v12007_v2 = vrot.slane %v10614_v57, 1  ;;  %v10651_v62 = vld [vmem:[#allocation2 + $0x80] sm:$0xf]  ;;  %vm12561_vm10 = vmmov %vm12554_vm2 }
 0x1c7   : > { %12551 = vst [vmem:[#allocation17_spill] sm:$0xff] %v10632_v1  ;;  %v4986_v17 = vshrl.u32 %v10568_v30, 16  ;;  %7279 = vmatpush3.bf16.msra.mxu1 %v7663_v22  ;;  %v3279_v20 = vshrl.u32 %v2806_v34, 16  ;;  %v2989_v44 = vsel %vm2780_vm5, %v9209_v27, %v2931_v43  ;;  %v4990_v55 = vshll.u32 %v10614_v57, 16  ;;  %v7666_v30 = vld [vmem:[%s11933_s2 + $0x10] sm:$0xff]   ;;  %vm12562_vm7 = vmmov %vm12553_vm6 }
 0x1c8   : > { %4378 = vrot.lane.b32.xlu1 %v4361_v29, %s7764_s9  ;;  %v10646_v48 = vpop.permute.xlu1 %2971  ;;  %v4110_v40 = vshll.u32 %v10509_v9, 16  ;;  %7280 = vmatprep.subr.bf16.mxu1 %v7664_v23  ;;  %v3282_v18 = vshll.u32 %v2806_v34, 16  ;;  %v3009_v15 = vsel %vm2800_vm9, %v2989_v44, %v10507_v53  ;;  %v4984_v28 = vrot.slane %v4982_v11, 1  ;;  %v4240_v44 = vld [vmem:[#allocation2 + $0x88] sm:$0xf] }
 0x1c9   : > { %v4106_v39 = vshrl.u32 %v10431_v0, 16  ;;  %v3057_v4 = vshrl.u32 %v3009_v15, 16  ;;  %v3060_v22 = vshll.u32 %v3009_v15, 16  ;;  %v4114_v49 = vshrl.u32 %v10509_v9, 16 }
 0x1ca   : > { %4338 = vrot.lane.b32.xlu0 %v4302_v19, %s7765_s10  ;;  %v10660_v50 = vpop.permute.xlu0 %2973  ;;  %v4978_v6 = vshrl.u32 %v10399_v36, 16  ;;  %v4311_v37 = vsel %vm12553_vm6, %v4301_v21, %v10640_v46  ;;  %v4988_v5 = vor.u32 %v4986_v17, %v4984_v28  ;;  %v4118_v61 = vshll.u32 %v10632_v1, 16  ;;  %v7667_v21 = vld [vmem:[%s11933_s2 + $0x8] sm:$0xff]  }
 0x1cb   : > { %v10668_v53 = vcombine.low %v4012_v8, %v10651_v62  ;;  %7281 = vmatpush3.bf16.msra.mxu1 %v7664_v23  ;;  %v3059_v34 = vrot.slane %v3057_v4, 3  ;;  %v3062_v29 = vrot.slane %v3060_v22, 4  ;;  %v5057_v43 = vsel %vm12554_vm2, %v5054_v41, %v12007_v2  ;;  %v10863_v22 = vld [vmem:[#allocation2 + $0x48] sm:$0xf]  ;;  %vm12563_vm2 = vmmov %vm12549_vm1 }
 0x1cc   : > { %5070 = vrot.lane.b32.xlu1 %v5055_v54, %s7764_s9  ;;  %v3670_v11 = vpop.permute.xlu1 %3669  ;;  %v4112_v36 = vrot.slane %v4110_v40, 1  ;;  %v4239_v54 = vld [vmem:[#allocation2 + $0x84] sm:$0xf]  ;;  %7282 = vmatprep.subr.bf16.mxu1 %v7666_v30  ;;  %v3281_v19 = vrot.slane %v3279_v20, 2  ;;  %v3284_v8 = vrot.slane %v3282_v18, 3  ;;  %v10677_v17 = vrot.slane %v4990_v55, 1 }
 0x1cd   : > { %v4108_v23 = vor.u32 %v4106_v39, %v10532_v13  ;;  %v10680_v15 = vor.u32 %v3062_v29, %v3059_v34  ;;  %v4980_v40 = vor.u32 %v4978_v6, %v10520_v42  ;;  %v10690_v55 = vrot.slane %v4118_v61, 1  ;;  %v10693_v18 = vld [vmem:[#allocation2 + $0x80] ss:$0 sps:$4 sm:$0x77]  }
 0x1ce   : > { %4340 = vrot.lane.b32.xlu0 %v4311_v37, %s7765_s10  ;;  %v10683_v4 = vpop.permute.xlu0 %2772  ;;  %v4116_v41 = vor.u32 %v4114_v49, %v4112_v36  ;;  %v4993_v20 = vsel %vm12555_vm11, %v4988_v5, %v10677_v17  ;;  %v4362_v13 = vrot.slane %v10668_v53, 5  ;;  %v2789_v39 = vsel %vm2780_vm5, %v8968_v56, %v10599_v33  ;;  %vm12564_vm11 = vmmov %vm12549_vm1 }
 0x1cf   : > { %7283 = vmatpush3.bf16.msra.mxu1 %v7666_v30  ;;  %v3064_v42 = vsel %vm3033_vm0, %v10570_v51, %v10680_v15  ;;  %v4167_v6 = vrot.slane %v10632_v1, 1  ;;  %v10705_v37 = vcombine.low %v4239_v54, %v4240_v44  ;;  %v7670_v30 = vld [vmem:[%s11933_s2] sm:$0xff]   ;;  %v10712_v56 = vor.u32 %v10629_v14, %v10627_v45 }
 0x1d0   : > { %5072 = vrot.lane.b32.xlu1 %v5057_v43, %s7764_s9  ;;  %v10698_v49 = vpop.permute.xlu1 %3671  ;;  %7284 = vmatprep.subr.bf16.mxu1 %v7667_v21  ;;  %v10714_v33 = vor.u32 %v3284_v8, %v3281_v19  ;;  %v4113_v5 = vsel %vm12556_vm14, %v4108_v23, %v4112_v36  ;;  %v6672_v51 = vcombine.low %v10651_v62, %v10651_v62  ;;  %v3743_v61 = vshrl.u32 %v10563_v63, 16  ;;  %v7721_v36 = vld [vmem:[#allocation2 + $0x24] sm:$0xff]  }
 0x1d1   : > { %7264 = vmatprep.mubr.msk.bf16.mxu1 %vm3141_vm8, %v3064_v42  ;;  %v2791_v34 = vsel %vm2780_vm5, %v9209_v27, %v10610_v10  ;;  %v4121_v45 = vsel %vm12557_vm13, %v4116_v41, %v10690_v55  ;;  %v4985_v14 = vsel %vm12558_vm15, %v4980_v40, %v4984_v28  ;;  %v2808_v43 = vsel %vm2800_vm9, %v2789_v39, %v10566_v32  ;;  %vm12565_vm13 = vmmov %vm12550_vm3 }
 0x1d2   : > { %5034 = vrot.lane.b32.xlu0 %v4993_v20, %s7765_s10  ;;  %v3632_v29 = vpop.permute.xlu0 %3631  ;;  %v4363_v27 = vsel %vm12559_vm12, %v4360_v12, %v4362_v13  ;;  %v4126_v63 = vshll.u32 %v10693_v18, 16  ;;  %v4168_v32 = vsel %vm12560_vm4, %v4165_v35, %v4167_v6  ;;  %v4364_v28 = vrot.slane %v10705_v37, 5  ;;  %v10751_v12 = vld [vmem:[%s11933_s2 + $0x58] sm:$0xff]   ;;  %vm12567_vm15 = vmmov %vm12550_vm3 }
 0x1d3   : > { %v3689_v62 = vsel %vm2780_vm5, %v7721_v36, %v3632_v29  ;;  %7285 = vmatpush3.bf16.msra.mxu1 %v7667_v21  ;;  %v4130_v26 = vshrl.u32 %v10693_v18, 16  ;;  %v4169_v8 = vrot.slane %v6672_v51, 1  ;;  %v3287_v35 = vshrl.u32 %v2808_v43, 16  ;;  %vm12568_vm12 = vmmov %vm12549_vm1 }
 0x1d4   : > { %4143 = vrot.lane.b32.xlu1 %v4113_v5, %s7765_s10  ;;  %v10738_v10 = vsel %vm2800_vm9, %v3689_v62, %v3670_v11  ;;  %v2933_v54 = vpop.permute.xlu1 %2932  ;;  %7286 = vmatprep.subr.bf16.mxu1 %v7670_v30  ;;  %v2810_v11 = vsel %vm2800_vm9, %v2791_v34, %v10577_v25  ;;  %v4313_v41 = vshrl.u32 %v10668_v53, 16  ;;  %v4316_v40 = vshll.u32 %v10668_v53, 16  ;;  %vm12569_vm4 = vmmov %vm12553_vm6 }
 0x1d5   : > { %v3746_v21 = vshll.u32 %v10738_v10, 16  ;;  %v2991_v19 = vsel %vm2780_vm5, %v9285_v16, %v2933_v54  ;;  %v3290_v20 = vshll.u32 %v2808_v43, 16  ;;  %v3745_v42 = vor.u32 %v3743_v61, %v10585_v59  ;;  %v7673_v59 = vld [vmem:[%s11933_s2 + $0x20] sm:$0xff]  }
 0x1d6   : > { %4145 = vrot.lane.b32.xlu0 %v4121_v45, %s7765_s10  ;;  %v3011_v23 = vsel %vm2800_vm9, %v2991_v19, %v10646_v48  ;;  %v3295_v5 = vshrl.u32 %v2810_v11, 16  ;;  %v4322_v48 = vshrl.u32 %v10705_v37, 16  ;;  %v4325_v34 = vshll.u32 %v10705_v37, 16 }
 0x1d7   : > { %v10765_v25 = vrot.slane %v3746_v21, 1  ;;  %v3065_v18 = vshrl.u32 %v3011_v23, 16  ;;  %v3068_v39 = vshll.u32 %v3011_v23, 16  ;;  %7287 = vmatpush3.bf16.msra.mxu1 %v7670_v30  ;;  %v3298_v29 = vshll.u32 %v2810_v11, 16  ;;  %v5400_v21 = vld [vmem:[#allocation2 + $0x8c] sm:$0xf] }
 0x1d8   : > { %5032 = vrot.lane.b32.xlu1 %v4985_v14, %s7765_s10  ;;  %v10761_v44 = vpop.permute.xlu0 %2734  ;;  %v10768_v51 = vpop.permute.xlu1 %2774  ;;  %7332 = vmatprep.subr.bf16.mxu1 %v10751_v12  ;;  %v10774_v43 = vrot.slane %v4126_v63, 1  ;;  %v4365_v36 = vsel %vm12550_vm3, %v4362_v13, %v4364_v28  ;;  %v4315_v62 = vrot.slane %v4313_v41, 4  ;;  %v3289_v63 = vrot.slane %v3287_v35, 2  ;;  %v10795_v41 = vld [vmem:[#allocation2 + $0x98] sm:$0xf]  ;;  %vm12572_vm3 = vmmov %vm12549_vm1 }
 0x1d9   : > { %v3067_v45 = vrot.slane %v3065_v18, 3  ;;  %v3070_v14 = vrot.slane %v3068_v39, 4  ;;  %v3749_v30 = vsel %vm12549_vm1, %v3745_v42, %v10765_v25  ;;  %v3292_v54 = vrot.slane %v3290_v20, 3  ;;  %v5401_v42 = vld [vmem:[#allocation2 + $0x90] sm:$0xf] }
 0x1da   : > { %4380 = vrot.lane.b32.xlu0 %v4363_v27, %s7764_s9  ;;  %v4318_v27 = vrot.slane %v4316_v40, 5  ;;  %7317 = vmatmul.mubr.msk.bf16.vlgmr.msra.gmra.mxu0 %vm3141_vm8, %v3749_v30  ;;  %v3297_v19 = vrot.slane %v3295_v5, 2  ;;  %v4324_v53 = vrot.slane %v4322_v48, 4  ;;  %v4327_v13 = vrot.slane %v4325_v34, 5  ;;  %v5402_v34 = vld [vmem:[#allocation2 + $0x94] sm:$0xf] }
 0x1db   : > { %v3071_v11 = vor.u32 %v3070_v14, %v3067_v45  ;;  %7361 = vmatpush3.bf16.msra.mxu0 %v10327_v24  ;;  %v3300_v35 = vrot.slane %v3298_v29, 3  ;;  %v4132_v48 = vor.u32 %v4130_v26, %v10774_v43  ;;  %v10806_v29 = vcombine.low %v5400_v21, %v5401_v42 }
 0x1dc   : > { %4183 = vrot.lane.b32.xlu1 %v4168_v32, %s7764_s9  ;;  %v2935_v61 = vpop.permute.xlu0 %2934  ;;  %7362 = vmatprep.subr.bf16.mxu0 %v7673_v59  ;;  %v4319_v24 = vor.u32 %v4318_v27, %v4315_v62  ;;  %v10812_v30 = vcombine.low %v5402_v34, %v10795_v41  ;;  %v4328_v26 = vor.u32 %v4327_v13, %v4324_v53  ;;  %v4122_v62 = vshrl.u32 %v10632_v1, 16  ;;  %v5399_v27 = vld [vmem:[#allocation2 + $0x88] sm:$0xf] }
 0x1dd   : > { %v2993_v32 = vsel %vm2780_vm5, %v9532_v38, %v2935_v61  ;;  %v3072_v39 = vsel %vm3033_vm0, %v10680_v15, %v3071_v11  ;;  %v4170_v15 = vsel %vm12561_vm10, %v4167_v6, %v4169_v8  ;;  %v10814_v61 = vor.u32 %v3292_v54, %v3289_v63  ;;  %vm12573_vm10 = vmmov %vm12549_vm1 }
 0x1de   : > { %v3013_v23 = vsel %vm2800_vm9, %v2993_v32, %v10660_v50  ;;  %v10792_v18 = vpop.permute.xlu1 %2736  ;;  %4382 = vrot.lane.b32.xlu0 %v4365_v36, %s7764_s9  ;;  %v7675_v50 = vld [vmem:[%s11933_s2 + $0x18] sm:$0xff]   ;;  %7265 = vmatmul.mubr.msk.bf16.gmra.mxu1 %vm3141_vm8, %v3072_v39  ;;  %v7722_v36 = vld [vmem:[#allocation2 + $0x2c] sm:$0xff]   ;;  %v10823_v6 = vor.u32 %v3300_v35, %v3297_v19  ;;  %v10831_v54 = vcombine.low %v5399_v27, %v5400_v21  ;;  %v3750_v53 = vshrl.u32 %v10738_v10, 16  ;;  %v10841_v35 = vld [vmem:[#allocation2 + $0x84] sm:$0xff]  }
 0x1df   : > { %v3073_v40 = vshrl.u32 %v3013_v23, 16  ;;  %v3076_v20 = vshll.u32 %v3013_v23, 16  ;;  %7363 = vmatpush3.bf16.msra.mxu0 %v7673_v59  ;;  %v4320_v59 = vsel %vm12562_vm7, %v10640_v46, %v4319_v24  ;;  %v5563_v19 = vshrl.u32 %v10806_v29, 16  ;;  %vm12575_vm7 = vmmov %vm12565_vm13 }
 0x1e0   : > { %4187 = vrot.lane.b32.xlu1 %v4169_v8, %s7764_s9  ;;  %v3634_v5 = vpop.permute.xlu0 %3633  ;;  %7364 = vmatprep.subr.bf16.mxu0 %v7675_v50  ;;  %v5566_v21 = vshll.u32 %v10806_v29, 16  ;;  %vm176_vm14 = vcmask 257026  }
 0x1e1   : > { %v3075_v45 = vrot.slane %v3073_v40, 3  ;;  %v3078_v14 = vrot.slane %v3076_v20, 4  ;;  %v3691_v32 = vsel %vm2780_vm5, %v7722_v36, %v3634_v5  ;;  %v10821_v40 = vld [vmem:[#allocation2 + $0x7c] sm:$0xff]   ;;  %v7654_v20 = vld [vmem:[#allocation2 + $0x8c] ss:$0 sps:$4 sm:$0x11]   ;;  %v4329_v36 = vsel %vm12553_vm6, %v4319_v24, %v4328_v26 }
 0x1e2   : > { %v10817_v23 = vpop.permute.xlu1 %2778  ;;  %4149 = vrot.lane.b32.xlu0 %v4132_v48, %s7765_s10  ;;  %v10829_v63 = vsel %vm2800_vm9, %v3691_v32, %v10698_v49  ;;  %v7677_v49 = vld [vmem:[%s11933_s2 + $0x10] sm:$0xff]   ;;  %v5571_v5 = vshrl.u32 %v10812_v30, 16  ;;  %v5574_v48 = vshll.u32 %v10812_v30, 16  ;;  %v10861_v32 = vcombine.low %v5401_v42, %v5402_v34 }
 0x1e3   : > { %v10825_v8 = vor.u32 %v3078_v14, %v3075_v45  ;;  %v3753_v13 = vshll.u32 %v10829_v63, 16  ;;  %v3752_v45 = vor.u32 %v3750_v53, %v10765_v25  ;;  %v4366_v27 = vrot.slane %v7654_v20, 5  ;;  %7365 = vmatpush3.bf16.msra.mxu0 %v7675_v50  ;;  %v10874_v24 = vld [vmem:[#allocation2 + $0x8c] sm:$0xff]   ;;  %v10888_v25 = vld [vmem:[#allocation2 + $0x44] sm:$0xf] }
 0x1e4   : > { %4185 = vrot.lane.b32.xlu1 %v4170_v15, %s7764_s9  ;;  %v10836_v39 = vpop.permute.xlu0 %2977  ;;  %v4124_v15 = vor.u32 %v4122_v62, %v10690_v55  ;;  %v5565_v55 = vrot.slane %v5563_v19, 4  ;;  %v5002_v62 = vshrl.u32 %v10821_v40, 16  ;;  %v5006_v42 = vshll.u32 %v10841_v35, 16  ;;  %7366 = vmatprep.subr.bf16.mxu0 %v7677_v49 }
 0x1e5   : > { %v3080_v10 = vsel %vm3033_vm0, %v3071_v11, %v10825_v8  ;;  %v10852_v46 = vrot.slane %v3753_v13, 1  ;;  %v4998_v11 = vshll.u32 %v10821_v40, 16  ;;  %v2793_v34 = vsel %vm2780_vm5, %v9285_v16, %v10761_v44 }
 0x1e6   : > { %v10854_v14 = vpop.permute.xlu1 %2975  ;;  %4342 = vrot.lane.b32.xlu0 %v4320_v59, %s7765_s10  ;;  %7268 = vmatprep.mubr.msk.bf16.mxu1 %vm3141_vm8, %v3080_v10  ;;  %v5568_v50 = vrot.slane %v5566_v21, 5  ;;  %v5576_v20 = vrot.slane %v5574_v48, 5  ;;  %v7681_v59 = vld [vmem:[%s11933_s2 + $0x8] sm:$0xff]   ;;  %v4129_v10 = vsel %vm12564_vm11, %v4124_v15, %v10774_v43  ;;  %v10894_v21 = vld [vmem:[#allocation2 + $0x94] ss:$0 sps:$4 sm:$0x11]   ;;  %v4367_v43 = vsel %vm12565_vm13, %v4364_v28, %v4366_v27  ;;  %vm12580_vm13 = vmmov %vm12575_vm7 }
 0x1e7   : > { %v3756_v53 = vsel %vm12563_vm2, %v3752_v45, %v10852_v46  ;;  %v10886_v45 = vld [vmem:[#allocation2 + $0x40] sm:$0xf]  ;;  %v10892_v44 = vrot.slane %v4998_v11, 1  ;;  %v5619_v48 = vrot.slane %v10806_v29, 5  ;;  %v12014_v15 = vrot.slane %v10812_v30, 5  ;;  %7367 = vmatpush3.bf16.msra.mxu0 %v7677_v49  ;;  %v7726_v29 = vld [vmem:[#allocation2 + $0x34] sm:$0xff]  }
 0x1e8   : > { %4346 = vrot.lane.b32.xlu1 %v4328_v26, %s7765_s10  ;;  %v10870_v13 = vpop.permute.xlu0 %2776  ;;  %7320 = vmatprep.mubr.msk.bf16.mxu0 %vm3141_vm8, %v3756_v53  ;;  %v5573_v26 = vrot.slane %v5571_v5, 4  ;;  %v2795_v5 = vsel %vm2780_vm5, %v9532_v38, %v10792_v18  ;;  %v12566_v53 = vmov 0   ;;  %v2812_v11 = vsel %vm2800_vm9, %v2793_v34, %v10683_v4  ;;  %v7684_v28 = vld [vmem:[%s11933_s2] sm:$0xff]   ;;  %v5404_v34 = vld [vmem:[#allocation2 + $0x9c] sm:$0xf] }
 0x1e9   : > { %177 = vst.msk [vmem:[#allocation2 + $0xac] sm:$0xc] %vm176_vm14, %v12566_v53  ;;  %v5004_v38 = vor.u32 %v5002_v62, %v10892_v44  ;;  %v10911_v18 = vrot.slane %v5006_v42, 1  ;;  %v5014_v37 = vshll.u32 %v10874_v24, 16  ;;  %v5569_v49 = vor.u32 %v5568_v50, %v5565_v55  ;;  %7368 = vmatprep.subr.bf16.mxu0 %v7681_v59 }
 0x1ea   : > { %v3674_v19 = vpop.permute.xlu1 %3673  ;;  %4344 = vrot.lane.b32.xlu0 %v4329_v36, %s7765_s10  ;;  %v10904_v36 = vld [vmem:[#allocation2 + $0xa0] sm:$0xf]  ;;  %v10918_v53 = vor.u32 %v5576_v20, %v5573_v26  ;;  %v5018_v4 = vshrl.u32 %v10874_v24, 16  ;;  %v2814_v62 = vsel %vm2800_vm9, %v2795_v5, %v10768_v51  ;;  %v5022_v16 = vshll.u32 %v10894_v21, 16 }
 0x1eb   : > { %v3303_v55 = vshrl.u32 %v2812_v11, 16  ;;  %v3306_v50 = vshll.u32 %v2812_v11, 16  ;;  %v4994_v20 = vshrl.u32 %v10614_v57, 16  ;;  %7369 = vmatpush3.bf16.msra.mxu0 %v7681_v59  ;;  %v3757_v51 = vshrl.u32 %v10829_v63, 16  ;;  %v10946_v11 = vld [vmem:[#allocation2 + $0xa4] sm:$0xf] }
 0x1ec   : > { %4147 = vrot.lane.b32.xlu1 %v4129_v10, %s7765_s10  ;;  %v3636_v2 = vpop.permute.xlu0 %3635  ;;  %v5621_v5 = vsel %vm12567_vm15, %v5619_v48, %v12014_v15  ;;  %7370 = vmatprep.subr.bf16.mxu0 %v7684_v28  ;;  %v3311_v1 = vshrl.u32 %v2814_v62, 16  ;;  %v3314_v59 = vshll.u32 %v2814_v62, 16  ;;  %v5578_v63 = vsel %vm12569_vm4, %v5569_v49, %v10918_v53  ;;  %vm12581_vm15 = vmmov %vm12549_vm1 }
 0x1ed   : > { %v3693_v27 = vsel %vm2780_vm5, %v7726_v29, %v3636_v2  ;;  %v10931_v2 = vcombine.low %v5404_v34, %v10904_v36  ;;  %v5009_v29 = vsel %vm12568_vm12, %v5004_v38, %v10911_v18  ;;  %v3759_v0 = vor.u32 %v3757_v51, %v10852_v46  ;;  %vm12582_vm12 = vmmov %vm12569_vm4 }
 0x1ee   : > { %v10924_v42 = vsel %vm2800_vm9, %v3693_v27, %v3674_v19  ;;  %v10926_v10 = vpop.permute.xlu1 %3675  ;;  %5628 = vrot.lane.b32.xlu0 %v5619_v48, %s7764_s9  ;;  %v10944_v27 = vrot.slane %v5014_v37, 1  ;;  %v3305_v62 = vrot.slane %v3303_v55, 2  ;;  %v5024_v47 = vrot.slane %v5022_v16, 1  ;;  %vm12584_vm4 = vmmov %vm12549_vm1 }
 0x1ef   : > { %v3760_v26 = vshll.u32 %v10924_v42, 16  ;;  %v5580_v37 = vshrl.u32 %v10931_v2, 16  ;;  %v5583_v15 = vshll.u32 %v10931_v2, 16  ;;  %v4996_v7 = vor.u32 %v4994_v20, %v10677_v17  ;;  %7371 = vmatpush3.bf16.msra.mxu0 %v7684_v28 }
 0x1f0   : > { %4384 = vrot.lane.b32.xlu1 %v4367_v43, %s7764_s9  ;;  %v10937_v19 = vpop.permute.xlu0 %2738  ;;  %v10952_v43 = vld [vmem:[#allocation2 + $0xa8] sm:$0xf]  ;;  %v5020_v38 = vor.u32 %v5018_v4, %v10944_v27  ;;  %v5058_v4 = vrot.slane %v10821_v40, 1  ;;  %v12570_v55 = vmov 0.0   ;;  %v3313_v16 = vrot.slane %v3311_v1, 2 }
 0x1f1   : > { %v10948_v9 = vrot.slane %v3760_v26, 1  ;;  %v3308_v26 = vrot.slane %v3306_v50, 3  ;;  %v10969_v58 = vcombine.low %v10946_v11, %v10952_v43  ;;  %7416 = vmatprep.subr.bf16.mxu0 %v12570_v55  ;;  %v3316_v50 = vrot.slane %v3314_v59, 3  ;;  %v10983_v1 = vld [vmem:[#allocation2 + $0x40] sm:$0xc] }
 0x1f2   : > { %v10955_v48 = vpop.permute.xlu1 %2940  ;;  %5606 = vrot.lane.b32.xlu0 %v5569_v49, %s7765_s10  ;;  %v5622_v49 = vrot.slane %v10931_v2, 5  ;;  %v12571_v17 = vcombine.low %v10886_v45, %v10888_v25  ;;  %v5060_v28 = vrot.slane %v10841_v35, 1  ;;  %v5582_v20 = vrot.slane %v5580_v37, 4 }
 0x1f3   : > { %v3763_v46 = vsel %vm12549_vm1, %v3759_v0, %v10948_v9  ;;  %v5010_v59 = vshrl.u32 %v10841_v35, 16  ;;  %v5025_v25 = vsel %vm12572_vm3, %v5020_v38, %v5024_v47  ;;  %v10990_v45 = vcombine.low %v10795_v41, %v5404_v34  ;;  %vm12586_vm1 = vmmov %vm12582_vm12 }
 0x1f4   : > { %5630 = vrot.lane.b32.xlu1 %v5621_v5, %s7764_s9  ;;  %v2939_v51 = vpop.permute.xlu0 %2938  ;;  %7321 = vmatmul.mubr.msk.bf16.gmra.mxu0 %vm3141_vm8, %v3763_v46  ;;  %v5585_v5 = vrot.slane %v5583_v15, 5  ;;  %v10986_v46 = vor.u32 %v3308_v26, %v3305_v62  ;;  %v12574_v15 = vrot.slane %v10812_v30, 5  ;;  %v12576_v35 = vrot.slane %v10614_v57, 1  ;;  %v7728_v30 = vld [vmem:[#allocation2 + $0x3c] sm:$0xff]  }
 0x1f5   : > { %v2998_v0 = vsel %vm2780_vm5, %v12571_v17, %v2939_v51  ;;  %v5062_v51 = vrot.slane %v10874_v24, 1  ;;  %vm12577_vm6 = vcmask 1046528   ;;  %v5624_v47 = vrot.slane %v10969_v58, 5 }
 0x1f6   : > { %v3017_v40 = vsel %vm2800_vm9, %v2998_v0, %v10836_v39  ;;  %v10980_v2 = vpop.permute.xlu1 %2740  ;;  %5038 = vrot.lane.b32.xlu0 %v5009_v29, %s7765_s10  ;;  %v5001_v29 = vsel %vm12573_vm10, %v4996_v7, %v10892_v44  ;;  %v5623_v37 = vsel %vm12575_vm7, %v12574_v15, %v5622_v49  ;;  %v5059_v62 = vsel %vm12577_vm6, %v12576_v35, %v5058_v4  ;;  %vm12578_vm2 = vmmov %vm12577_vm6 }
 0x1f7   : > { %v11003_v41 = vor.u32 %v3316_v50, %v3313_v16  ;;  %v3089_v34 = vshrl.u32 %v3017_v40, 16  ;;  %v5061_v38 = vsel %vm12578_vm2, %v5058_v4, %v5060_v28  ;;  %v3092_v44 = vshll.u32 %v3017_v40, 16  ;;  %v11015_v50 = vld [vmem:[#allocation2 + $0xac] sm:$0x3]  ;;  %vm12579_vm11 = vmmov %vm12578_vm2 }
 0x1f8   : > { %5608 = vrot.lane.b32.xlu1 %v5578_v63, %s7765_s10  ;;  %v3638_v39 = vpop.permute.xlu0 %3637  ;;  %v11006_v63 = vld [vmem:[#allocation2 + $0x44] sm:$0xf]  ;;  %v11012_v57 = vor.u32 %v5585_v5, %v5582_v20  ;;  %v5012_v16 = vor.u32 %v5010_v59, %v10911_v18  ;;  %v5589_v0 = vshrl.u32 %v10969_v58, 16  ;;  %v5592_v40 = vshll.u32 %v10969_v58, 16  ;;  %vm12587_vm3 = vmmov %vm12578_vm2 }
 0x1f9   : > { %v3695_v26 = vsel %vm2780_vm5, %v7728_v30, %v3638_v39  ;;  %v11026_v39 = vsel %vm12579_vm11, %v5060_v28, %v5062_v51  ;;  %vm3263_vm14 = vsmask.f32 5376  ;;  %v3764_v28 = vshrl.u32 %v10924_v42, 16  ;;  %vm12588_vm10 = vmmov %vm12575_vm7 }
 0x1fa   : > { %v2937_v17 = vpop.permute.xlu1 %2936  ;;  %5042 = vrot.lane.b32.xlu0 %v5025_v25, %s7765_s10  ;;  %v11019_v4 = vsel %vm2800_vm9, %v3695_v26, %v10926_v10  ;;  %v5625_v10 = vsel %vm12580_vm13, %v5622_v49, %v5624_v47  ;;  %v11039_v59 = vsel %vm12581_vm15, %v5012_v16, %v10944_v27  ;;  %v3091_v25 = vrot.slane %v3089_v34, 3  ;;  %v11055_v34 = vld [vmem:[#allocation2 + $0x94] ss:$0 sps:$4 sm:$0x33]   ;;  %vm12589_vm7 = vmmov %vm12586_vm1 }
 0x1fb   : > { %v3767_v20 = vshll.u32 %v11019_v4, 16  ;;  %v2995_v18 = vsel %vm2780_vm5, %v9586_v3, %v2937_v17  ;;  %v6776_v35 = vcombine.low %v11015_v50, %v11015_v50  ;;  %v3766_v27 = vor.u32 %v3764_v28, %v10948_v9  ;;  %vm12590_vm6 = vmmov %vm12584_vm4 }
 0x1fc   : > { %5036 = vrot.lane.b32.xlu1 %v5001_v29, %s7765_s10  ;;  %v11032_v5 = vpop.permute.xlu0 %3643  ;;  %v3015_v15 = vsel %vm2800_vm9, %v2995_v18, %v10854_v14  ;;  %v3094_v29 = vrot.slane %v3092_v44, 4  ;;  %v5587_v42 = vsel %vm12582_vm12, %v10918_v53, %v11012_v57  ;;  %v5591_v49 = vrot.slane %v5589_v0, 4  ;;  %vm12592_vm11 = vmmov %vm12584_vm4 }
 0x1fd   : > { %v11046_v30 = vrot.slane %v3767_v20, 1  ;;  %v3081_v26 = vshrl.u32 %v3015_v15, 16  ;;  %v3084_v17 = vshll.u32 %v3015_v15, 16  ;;  %v5594_v14 = vrot.slane %v5592_v40, 5  ;;  %vm12593_vm13 = vmmov %vm12584_vm4 }
 0x1fe   : > { %v11048_v7 = vpop.permute.xlu1 %3681  ;;  %5632 = vrot.lane.b32.xlu0 %v5623_v37, %s7764_s9  ;;  %v2797_v44 = vsel %vm2780_vm5, %v9586_v3, %v10937_v19  ;;  %v12583_v16 = vcombine.low %v10863_v22, %v10863_v22  ;;  %v5598_v40 = vshrl.u32 %v6776_v35, 16  ;;  %v5601_v28 = vshll.u32 %v6776_v35, 16  ;;  %vm12594_vm15 = vmmov %vm12578_vm2 }
 0x1ff   : > { %v3083_v20 = vrot.slane %v3081_v26, 3  ;;  %v3086_v9 = vrot.slane %v3084_v17, 4  ;;  %v3770_v53 = vsel %vm12584_vm4, %v3766_v27, %v11046_v30  ;;  %v11069_v15 = vor.u32 %v3094_v29, %v3091_v25  ;;  %v5398_v25 = vld [vmem:[#allocation2 + $0x84] sm:$0xf]  ;;  %v5407_v29 = vld [vmem:[#allocation2 + $0x80] sm:$0x8]  ;;  %vm12595_vm12 = vmmov %vm12578_vm2 }
 0x200   : > { %v3001_v37 = vsel %vm2780_vm5, %v12583_v16, %v10955_v48  ;;  %5074 = vrot.lane.b32.xlu1 %v5059_v62, %s7764_s9  ;;  %v2980_v18 = vpop.permute.xlu0 %2979  ;;  %7324 = vmatprep.mubr.msk.bf16.mxu0 %vm3141_vm8, %v3770_v53  ;;  %v2816_v62 = vsel %vm2800_vm9, %v2797_v44, %v10870_v13  ;;  %v11077_v26 = vor.u32 %v5594_v14, %v5591_v49  ;;  %v5064_v17 = vrot.slane %v11055_v34, 1  ;;  %v7668_v14 = vld [vmem:[#allocation2 + $0xac] ss:$0 sps:$4 sm:$0x77]   ;;  %vm12596_vm4 = vmmov %vm12578_vm2 }
 0x201   : > { %v3019_v0 = vsel %vm2800_vm9, %v3001_v37, %v2980_v18  ;;  %v3087_v3 = vor.u32 %v3086_v9, %v3083_v20  ;;  %v5445_v35 = vshll.u32 %v10831_v54, 16  ;;  %v5600_v44 = vrot.slane %v5598_v40, 4 }
 0x202   : > { %v3097_v22 = vshrl.u32 %v3019_v0, 16  ;;  %v3100_v19 = vshll.u32 %v3019_v0, 16  ;;  %v11072_v48 = vpop.permute.xlu1 %4171  ;;  %5610 = vrot.lane.b32.xlu0 %v5587_v42, %s7765_s10  ;;  %v7729_v42 = vld [vmem:[#allocation2 + $0x40] ss:$0 sps:$4 sm:$0x77]   ;;  %v5603_v9 = vrot.slane %v5601_v28, 5  ;;  %v12585_v0 = vor.u32 %v10619_v31, %v10608_v52 }
 0x203   : > { %v3088_v37 = vsel %vm3033_vm0, %v10825_v8, %v3087_v3  ;;  %v3096_v13 = vsel %vm3033_vm0, %v3087_v3, %v11069_v15  ;;  %v2799_v49 = vsel %vm2780_vm5, %v7729_v42, %v10980_v2  ;;  %v5453_v18 = vshll.u32 %v10861_v32, 16  ;;  %v11101_v3 = vld [vmem:[#allocation2 + $0x48] sm:$0x8] }
 0x204   : > { %v3099_v27 = vrot.slane %v3097_v22, 3  ;;  %v3102_v16 = vrot.slane %v3100_v19, 4  ;;  %5076 = vrot.lane.b32.xlu1 %v5061_v38, %s7764_s9  ;;  %v11084_v20 = vpop.permute.xlu0 %4368  ;;  %7269 = vmatmul.mubr.msk.bf16.gmra.mxu1 %vm3141_vm8, %v3088_v37  ;;  %v3319_v38 = vshrl.u32 %v2816_v62, 16  ;;  %v3322_v53 = vshll.u32 %v2816_v62, 16  ;;  %v11110_v22 = vld [vmem:[#allocation2 + $0x4c] sm:$0xf] }
 0x205   : > { %7272 = vmatprep.mubr.msk.bf16.mxu1 %vm3141_vm8, %v3096_v13  ;;  %v3278_v2 = vsel %vm3263_vm14, %v12585_v0, %v10712_v56  ;;  %v11103_v40 = vcombine.low %v5407_v29, %v5398_v25  ;;  %v11108_v28 = vsel %vm3263_vm14, %v10712_v56, %v10714_v33  ;;  %v11117_v52 = vsel %vm3263_vm14, %v10714_v33, %v10814_v61 }
 0x206   : > { %v11093_v8 = vpop.permute.xlu1 %4133  ;;  %5634 = vrot.lane.b32.xlu0 %v5625_v10, %s7764_s9  ;;  %v11119_v31 = vrot.slane %v5445_v35, 1  ;;  %v2818_v19 = vsel %vm2800_vm9, %v2799_v49, %v10817_v23  ;;  %v3103_v62 = vor.u32 %v3102_v16, %v3099_v27  ;;  %v5596_v25 = vsel %vm12586_vm1, %v11012_v57, %v11077_v26  ;;  %v5998_v35 = vld [vmem:[#allocation2 + $0x98] sm:$0xf]  ;;  %v6006_v16 = vld [vmem:[#allocation2 + $0x94] sm:$0xe]  ;;  %vm12599_vm1 = vmmov %vm12590_vm6 }
 0x207   : > { %v5065_v33 = vsel %vm12587_vm3, %v5062_v51, %v5064_v17  ;;  %v5626_v29 = vrot.slane %v7668_v14, 5  ;;  %v5604_v37 = vor.u32 %v5603_v9, %v5600_v44  ;;  %v5449_v23 = vshrl.u32 %v10831_v54, 16  ;;  %vm12600_vm3 = vmmov %vm12599_vm1 }
 0x208   : > { %5040 = vrot.lane.b32.xlu1 %v11039_v59, %s7765_s10  ;;  %v4174_v56 = vpop.permute.xlu0 %4173  ;;  %v11134_v27 = vrot.slane %v5453_v18, 1  ;;  %v3321_v59 = vrot.slane %v3319_v38, 2  ;;  %v3324_v13 = vrot.slane %v3322_v53, 3  ;;  %v5026_v57 = vshrl.u32 %v10894_v21, 16 }
 0x209   : > { %v5440_v49 = vshll.u32 %v11103_v40, 16  ;;  %v3327_v24 = vshrl.u32 %v2818_v19, 16  ;;  %v5451_v51 = vor.u32 %v5449_v23, %v11119_v31  ;;  %v5490_v14 = vrot.slane %v10831_v54, 1  ;;  %v7731_v18 = vld [vmem:[#allocation2 + $0x54] ss:$0 sps:$4 sm:$0x11]  }
 0x20a   : > { %v3678_v42 = vpop.permute.xlu1 %3677  ;;  %5612 = vrot.lane.b32.xlu0 %v5596_v25, %s7765_s10  ;;  %v5492_v44 = vrot.slane %v10861_v32, 1  ;;  %v3330_v9 = vshll.u32 %v2818_v19, 16  ;;  %v3701_v38 = vsel %vm2780_vm5, %v7731_v18, %v11032_v5  ;;  %v3104_v53 = vsel %vm3033_vm0, %v11069_v15, %v3103_v62  ;;  %v7732_v23 = vld [vmem:[#allocation2 + $0x44] sm:$0xff]  }
 0x20b   : > { %v11148_v25 = vcombine.low %v6006_v16, %v5998_v35  ;;  %v5627_v19 = vsel %vm12588_vm10, %v5624_v47, %v5626_v29  ;;  %v5605_v5 = vsel %vm12589_vm7, %v11077_v26, %v5604_v37  ;;  %v11159_v18 = vor.u32 %v3324_v13, %v3321_v59  ;;  %v11169_v35 = vld [vmem:[#allocation2 + $0x9c] sm:$0xff]   ;;  %vm12601_vm10 = vmmov %vm12599_vm1 }
 0x20c   : > { %5078 = vrot.lane.b32.xlu1 %v11026_v39, %s7764_s9  ;;  %v3640_v0 = vpop.permute.xlu0 %3639  ;;  %7273 = vmatmul.mubr.msk.bf16.gmra.mxu1 %vm3141_vm8, %v3104_v53  ;;  %v5456_v39 = vsel %vm12590_vm6, %v5451_v51, %v11134_v27  ;;  %v5438_v58 = vshrl.u32 %v11103_v40, 16  ;;  %v5442_v47 = vrot.slane %v5440_v49, 1  ;;  %v3771_v26 = vshrl.u32 %v11019_v4, 16  ;;  %vm12602_vm7 = vmmov %vm12599_vm1 }
 0x20d   : > { %v3697_v10 = vsel %vm2780_vm5, %v7732_v23, %v3640_v0  ;;  %7288 = vmatprep.mubr.msk.bf16.mxu1 %vm3141_vm8, %v3278_v2  ;;  %v3719_v29 = vsel %vm2800_vm9, %v3701_v38, %v11048_v7  ;;  %v11178_v2 = vsel %vm12578_vm2, %v5490_v14, %v5492_v44  ;;  %v11182_v16 = vrot.slane %v3327_v24, 2  ;;  %vm12603_vm6 = vmmov %vm12578_vm2 }
 0x20e   : > { %v11162_v15 = vsel %vm2800_vm9, %v3697_v10, %v3678_v42  ;;  %v11165_v62 = vpop.permute.xlu1 %3679  ;;  %5636 = vrot.lane.b32.xlu0 %v5627_v19, %s7764_s9  ;;  %v11180_v10 = vld [vmem:[#allocation2 + $0xa4] sm:$0xff]   ;;  %v11184_v59 = vrot.slane %v3330_v9, 3  ;;  %v11190_v7 = vsel %vm3263_vm14, %v10814_v61, %v10823_v6  ;;  %v6037_v4 = vshll.u32 %v11148_v25, 16  ;;  %vm12604_vm2 = vmmov %vm12599_vm1 }
 0x20f   : > { %v3774_v37 = vshll.u32 %v11162_v15, 16  ;;  %v3773_v42 = vor.u32 %v3771_v26, %v11046_v30  ;;  %v12591_v49 = vcombine.low %v10983_v1, %v11006_v63  ;;  %v3788_v9 = vshll.u32 %v3719_v29, 16 }
 0x210   : > { %5080 = vrot.lane.b32.xlu1 %v5065_v33, %s7764_s9  ;;  %v4136_v13 = vpop.permute.xlu0 %4135  ;;  %v5443_v61 = vor.u32 %v5442_v47, %v5438_v58  ;;  %v5489_v53 = vrot.slane %v11103_v40, 1  ;;  %v6087_v30 = vrot.slane %v11169_v35, 1  ;;  %v6086_v63 = vrot.slane %v11148_v25, 1 }
 0x211   : > { %v4191_v24 = vsel %vm2780_vm5, %v12591_v49, %v11093_v8  ;;  %v11199_v51 = vrot.slane %v3774_v37, 1  ;;  %v4193_v33 = vsel %vm2780_vm5, %v10128_v60, %v4136_v13  ;;  %v6089_v8 = vrot.slane %v11180_v10, 1 }
 0x212   : > { %v11203_v38 = vpop.permute.xlu1 %4370  ;;  %5614 = vrot.lane.b32.xlu0 %v5605_v5, %s7765_s10  ;;  %v4211_v0 = vsel %vm2800_vm9, %v4193_v33, %v4174_v56  ;;  %v4209_v60 = vsel %vm2800_vm9, %v4191_v24, %v11072_v48  ;;  %v7680_v56 = vld [vmem:[%s11933_s2 + $0x50] sm:$0xff]   ;;  %v6035_v23 = vshrl.u32 %v11148_v25, 16  ;;  %v6039_v19 = vrot.slane %v6037_v4, 1 }
 0x213   : > { %v3777_v1 = vsel %vm12592_vm11, %v3773_v42, %v11199_v51  ;;  %v6042_v5 = vshll.u32 %v11169_v35, 16  ;;  %v3333_v58 = vor.u32 %v11184_v59, %v11182_v16  ;;  %v5448_v34 = vsel %vm12593_vm13, %v5443_v61, %v11119_v31  ;;  %v7733_v4 = vld [vmem:[#allocation2 + $0x4c] sm:$0xff]   ;;  %vm12606_vm11 = vmmov %vm12596_vm4 }
 0x214   : > { %5082 = vrot.lane.b32.xlu1 %v5064_v17, %s7764_s9  ;;  %7325 = vmatmul.mubr.msk.bf16.gmra.mxu0 %vm3141_vm8, %v3777_v1  ;;  %v4331_v40 = vpop.permute.xlu0 %4330  ;;  %v3310_v48 = vsel %vm3263_vm14, %v10823_v6, %v10986_v46  ;;  %v5491_v17 = vsel %vm12594_vm15, %v5489_v53, %v5490_v14  ;;  %v11234_v47 = vrot.slane %v3788_v9, 1  ;;  %v4672_v25 = vshrl.u32 %v4211_v0, 16  ;;  %vm12607_vm13 = vmmov %vm12599_vm1 }
 0x215   : > { %7289 = vmatmul.mubr.msk.bf16.vlgmr.msra.gmra.mxu1 %vm3141_vm8, %v11108_v28  ;;  %v4675_v26 = vshll.u32 %v4211_v0, 16  ;;  %v6046_v28 = vshrl.u32 %v11169_v35, 16  ;;  %v4665_v31 = vshrl.u32 %v4209_v60, 16  ;;  %v4668_v37 = vshll.u32 %v4209_v60, 16  ;;  %v12597_v60 = vld [vmem:[#allocation4_spill] sm:$0xff]  ;;  %vm12608_vm15 = vmmov %vm12596_vm4 }
 0x216   : > { %7292 = vmatprep.mubr.msk.bf16.mxu1 %vm3141_vm8, %v11117_v52  ;;  %v4176_v29 = vpop.permute.xlu1 %4175  ;;  %5044 = vrot.lane.b32.xlu0 %v5026_v57, %s7765_s10  ;;  %v6088_v6 = vsel %vm12595_vm12, %v6086_v63, %v6087_v30  ;;  %v11247_v14 = vsel %vm12596_vm4, %v6087_v30, %v6089_v8  ;;  %v6040_v13 = vor.u32 %v6039_v19, %v6035_v23  ;;  %v6044_v21 = vrot.slane %v6042_v5, 1  ;;  %v7683_v57 = vld [vmem:[%s11933_s2 + $0x48] sm:$0xff]   ;;  %vm12609_vm12 = vmmov %vm12599_vm1 }
 0x217   : > { %7333 = vmatpush3.bf16.msra.mxu1 %v10751_v12  ;;  %v6770_v12 = vcombine.low %v10904_v36, %v10946_v11  ;;  %v6771_v35 = vcombine.low %v10952_v43, %v11015_v50  ;;  %v6050_v49 = vshll.u32 %v11180_v10, 16  ;;  %v5457_v24 = vshrl.u32 %v10861_v32, 16  ;;  %v7715_v43 = vld [vmem:[%s11933_s2] sm:$0xff]  }
 0x218   : > { %5478 = vrot.lane.b32.xlu1 %v5456_v39, %s7765_s10  ;;  %v3642_v52 = vpop.permute.xlu0 %3641  ;;  %7334 = vmatprep.subr.bf16.mxu1 %v7680_v56  ;;  %v11261_v39 = vsel %vm3263_vm14, %v10986_v46, %v11003_v41  ;;  %v4674_v33 = vrot.slane %v4672_v25, 2  ;;  %v4677_v9 = vrot.slane %v4675_v26, 3  ;;  %v6048_v30 = vor.u32 %v6046_v28, %v6044_v21  ;;  %v7685_v25 = vld [vmem:[%s11933_s2 + $0x40] sm:$0xff]  }
 0x219   : > { %v3699_v42 = vsel %vm2780_vm5, %v7733_v4, %v3642_v52  ;;  %v4667_v0 = vrot.slane %v4665_v31, 2  ;;  %v4670_v1 = vrot.slane %v4668_v37, 3  ;;  %v3778_v23 = vshrl.u32 %v11162_v15, 16 }
 0x21a   : > { %v3717_v61 = vsel %vm2800_vm9, %v3699_v42, %v11165_v62  ;;  %v4333_v53 = vpop.permute.xlu1 %4332  ;;  %5476 = vrot.lane.b32.xlu0 %v5448_v34, %s7765_s10  ;;  %v12598_v19 = vcombine.low %v11101_v3, %v11110_v22  ;;  %v6045_v34 = vsel %vm12599_vm1, %v6040_v13, %v6044_v21  ;;  %v11291_v28 = vor.u32 %v4677_v9, %v4674_v33 }
 0x21b   : > { %v3781_v63 = vshll.u32 %v3717_v61, 16  ;;  %v4390_v46 = vsel %vm2780_vm5, %v12597_v60, %v4333_v53  ;;  %7335 = vmatpush3.bf16.msra.mxu1 %v7680_v56  ;;  %v5461_v56 = vshll.u32 %v10990_v45, 16  ;;  %v3785_v15 = vshrl.u32 %v3717_v61, 16 }
 0x21c   : > { %v4388_v5 = vsel %vm2780_vm5, %v12598_v19, %v4331_v40  ;;  %5500 = vrot.lane.b32.xlu1 %v11178_v2, %s7764_s9  ;;  %v4138_v62 = vpop.permute.xlu0 %4137  ;;  %7336 = vmatprep.subr.bf16.mxu1 %v7683_v57  ;;  %v4410_v3 = vsel %vm2800_vm9, %v4390_v46, %v11203_v38  ;;  %v11288_v2 = vld [vmem:[#allocation2 + $0xac] sm:$0xff]   ;;  %v3780_v40 = vor.u32 %v3778_v23, %v11199_v51  ;;  %v6052_v38 = vrot.slane %v6050_v49, 1  ;;  %v5408_v23 = vld [vmem:[#allocation2 + $0xa4] sm:$0x3] }
 0x21d   : > { %v3783_v26 = vrot.slane %v3781_v63, 1  ;;  %7293 = vmatmul.mubr.msk.bf16.gmra.mxu1 %vm3141_vm8, %v11190_v7  ;;  %v4195_v22 = vsel %vm2780_vm5, %v12597_v60, %v4138_v62  ;;  %v4671_v52 = vor.u32 %v4670_v1, %v4667_v0  ;;  %v4408_v7 = vsel %vm2800_vm9, %v4388_v5, %v11084_v20 }
 0x21e   : > { %v4213_v31 = vsel %vm2800_vm9, %v4195_v22, %v4176_v29  ;;  %7296 = vmatprep.mubr.msk.bf16.mxu1 %vm3141_vm8, %v3310_v48  ;;  %v11295_v37 = vpop.permute.xlu1 %4177  ;;  %5498 = vrot.lane.b32.xlu0 %v5491_v17, %s7764_s9  ;;  %v4444_v4 = vshrl.u32 %v4410_v3, 16  ;;  %v4447_v51 = vshll.u32 %v4410_v3, 16  ;;  %v7687_v17 = vld [vmem:[%s11933_s2 + $0x38] sm:$0xff]   ;;  %v6058_v33 = vshll.u32 %v11288_v2, 16 }
 0x21f   : > { %v3787_v13 = vor.u32 %v3785_v15, %v3783_v26  ;;  %v4680_v21 = vshrl.u32 %v4213_v31, 16  ;;  %7337 = vmatpush3.bf16.msra.mxu1 %v7683_v57  ;;  %v4683_v42 = vshll.u32 %v4213_v31, 16  ;;  %v3784_v29 = vsel %vm12600_vm3, %v3780_v40, %v3783_v26  ;;  %v7691_v40 = vld [vmem:[%s11933_s2 + $0x58] sm:$0xff]  }
 0x220   : > { %6095 = vrot.lane.b32.xlu1 %v6088_v6, %s7764_s9  ;;  %v11302_v48 = vpop.permute.xlu0 %4372  ;;  %7338 = vmatprep.subr.bf16.mxu1 %v7685_v25  ;;  %v6054_v57 = vshrl.u32 %v11180_v10, 16  ;;  %v5406_v6 = vld [vmem:[#allocation2 + $0xa4] sm:$0x1]  ;;  %v4437_v9 = vshrl.u32 %v4408_v7, 16  ;;  %v4440_v61 = vshll.u32 %v4408_v7, 16  ;;  %v4679_v1 = vsel %vm3263_vm14, %v4671_v52, %v11291_v28 }
 0x221   : > { %v4682_v49 = vrot.slane %v4680_v21, 2  ;;  %7328 = vmatprep.mubr.msk.bf16.mxu0 %vm3141_vm8, %v3784_v29  ;;  %v3791_v20 = vsel %vm12601_vm10, %v3787_v13, %v11234_v47  ;;  %v4685_v53 = vrot.slane %v4683_v42, 3  ;;  %v3326_v47 = vsel %vm3263_vm14, %v11003_v41, %v11159_v18  ;;  %v7688_v41 = vld [vmem:[%s11933_s2 + $0x30] sm:$0xff]   ;;  %v11373_v21 = vld [vmem:[%s11933_s2 + $0x88] sm:$0xff]   ;;  %vm12615_vm10 = vmmov %vm12599_vm1 }
 0x222   : > { %v11312_v0 = vpop.permute.xlu1 %4374  ;;  %6073 = vrot.lane.b32.xlu0 %v6045_v34, %s7765_s10  ;;  %7329 = vmatmul.mubr.msk.bf16.gmra.mxu0 %vm3141_vm8, %v3791_v20  ;;  %v6053_v63 = vsel %vm12602_vm7, %v6048_v30, %v6052_v38  ;;  %v5494_v60 = vrot.slane %v10990_v45, 1  ;;  %v5459_v46 = vor.u32 %v5457_v24, %v11134_v27  ;;  %v4446_v19 = vrot.slane %v4444_v4, 3  ;;  %v11368_v13 = vld [vmem:[#allocation2 + $0xb4] ss:$0 sps:$4 sm:$0x77]   ;;  %v12605_v4 = vld [vmem:[#allocation13_spill] sm:$0xff]  ;;  %vm12616_vm7 = vmmov %vm12599_vm1 }
 0x223   : > { %7372 = vmatprep.mubr.msk.bf16.mxu0 %vm3141_vm8, %v4679_v1  ;;  %7339 = vmatpush3.bf16.msra.mxu1 %v7685_v25  ;;  %v4449_v5 = vrot.slane %v4447_v51, 4  ;;  %v5463_v34 = vrot.slane %v5461_v56, 1  ;;  %v11335_v30 = vcombine.low %v10904_v36, %v5406_v6  ;;  %v11337_v25 = vor.u32 %v4685_v53, %v4682_v49  ;;  %v11393_v49 = vld [vmem:[#allocation2 + $0xb4] ss:$0 sps:$4 sm:$0xff]  }
 0x224   : > { %6097 = vrot.lane.b32.xlu1 %v11247_v14, %s7764_s9  ;;  %v11329_v62 = vpop.permute.xlu0 %5066  ;;  %7340 = vmatprep.subr.bf16.mxu1 %v7687_v17  ;;  %v6091_v27 = vrot.slane %v11288_v2, 1  ;;  %v6056_v24 = vor.u32 %v6054_v57, %v6052_v38  ;;  %v11342_v14 = vrot.slane %v6058_v33, 1  ;;  %v4439_v26 = vrot.slane %v4437_v9, 3 }
 0x225   : > { %7297 = vmatmul.mubr.msk.bf16.gmra.mxu1 %vm3141_vm8, %v11261_v39  ;;  %v4442_v56 = vrot.slane %v4440_v61, 4  ;;  %v6768_v3 = vcombine.low %v10904_v36, %v5408_v23  ;;  %v5465_v22 = vshrl.u32 %v10990_v45, 16  ;;  %v5495_v39 = vsel %vm12603_vm6, %v5492_v44, %v5494_v60  ;;  %vm12617_vm6 = vmmov %vm12599_vm1  ;;  %v7711_v36 = vld [vmem:[%s11933_s2 + $0x10] sm:$0xff]  }
 0x226   : > { %7300 = vmatprep.mubr.msk.bf16.mxu1 %vm3141_vm8, %v3326_v47  ;;  %v11345_v15 = vpop.permute.xlu1 %5068  ;;  %6075 = vrot.lane.b32.xlu0 %v6053_v63, %s7765_s10  ;;  %v11358_v31 = vor.u32 %v4449_v5, %v4446_v19  ;;  %v5464_v52 = vsel %vm12604_vm2, %v5459_v46, %v5463_v34  ;;  %v3334_v7 = vsel %vm3263_vm14, %v11159_v18, %v3333_v58  ;;  %v5469_v44 = vshll.u32 %v11335_v30, 16  ;;  %vm12618_vm2 = vmmov %vm12599_vm1 }
 0x227   : > { %7341 = vmatpush3.bf16.msra.mxu1 %v7687_v17  ;;  %v4687_v16 = vsel %vm3263_vm14, %v11291_v28, %v11337_v25  ;;  %v6092_v18 = vsel %vm12606_vm11, %v6089_v8, %v6091_v27  ;;  %v6061_v59 = vsel %vm12607_vm13, %v6056_v24, %v11342_v14  ;;  %v4443_v58 = vor.u32 %v4442_v56, %v4439_v26  ;;  %v7696_v24 = vld [vmem:[%s11933_s2 + $0x48] sm:$0xff]   ;;  %vm12619_vm11 = vmmov %vm12599_vm1 }
 0x228   : > { %5502 = vrot.lane.b32.xlu1 %v5495_v39, %s7764_s9  ;;  %v4140_v38 = vpop.permute.xlu0 %4139  ;;  %7342 = vmatprep.subr.bf16.mxu1 %v7688_v41  ;;  %v11391_v17 = vrot.slane %v6768_v3, 1  ;;  %v5467_v28 = vor.u32 %v5465_v22, %v5463_v34  ;;  %v6062_v57 = vshrl.u32 %v11288_v2, 16  ;;  %v5471_v61 = vrot.slane %v5469_v44, 1  ;;  %v12610_v39 = vld [vmem:[#allocation14_spill] sm:$0xff]  ;;  %vm12620_vm13 = vmmov %vm12599_vm1 }
 0x229   : > { %v4197_v51 = vsel %vm2780_vm5, %v12605_v4, %v4140_v38  ;;  %v4451_v9 = vsel %vm3033_vm0, %v4443_v58, %v11358_v31  ;;  %v6066_v53 = vshll.u32 %v11368_v13, 16  ;;  %v6093_v23 = vrot.slane %v11393_v49, 1  ;;  %v7700_v49 = vld [vmem:[%s11933_s2 + $0x38] sm:$0xff]  }
 0x22a   : > { %v4215_v42 = vsel %vm2800_vm9, %v4197_v51, %v11295_v37  ;;  %v4335_v29 = vpop.permute.xlu1 %4334  ;;  %5480 = vrot.lane.b32.xlu0 %v5464_v52, %s7765_s10  ;;  %7373 = vmatmul.mubr.msk.bf16.vlgmr.msra.gmra.mxu0 %vm3141_vm8, %v4687_v16  ;;  %v7693_v37 = vld [vmem:[%s11933_s2 + $0x50] sm:$0xff]   ;;  %v5472_v56 = vsel %vm12609_vm12, %v5467_v28, %v5471_v61  ;;  %v6064_v3 = vor.u32 %v6062_v57, %v11342_v14  ;;  %vm12614_vm3 = vmmov 0   ;;  %vm12622_vm12 = vmmov %vm12599_vm1 }
 0x22b   : > { %v4688_v10 = vshrl.u32 %v4215_v42, 16  ;;  %v4691_v20 = vshll.u32 %v4215_v42, 16  ;;  %v4392_v8 = vsel %vm2780_vm5, %v12605_v4, %v4335_v29  ;;  %7343 = vmatpush3.bf16.msra.mxu1 %v7688_v41  ;;  %7417 = vmatpush3.bf16.msra.mxu0 %v7691_v40  ;;  %v5497_v41 = vsel %vm12608_vm15, %v5494_v60, %v11391_v17  ;;  %vm12621_vm15 = vmmov %vm12599_vm1 }
 0x22c   : > { %v4412_v33 = vsel %vm2800_vm9, %v4392_v8, %v11302_v48  ;;  %6099 = vrot.lane.b32.xlu1 %v6092_v18, %s7764_s9  ;;  %v11404_v6 = vpop.permute.xlu0 %5028  ;;  %7388 = vmatprep.subr.bf16.mxu1 %v11373_v21  ;;  %v6068_v38 = vrot.slane %v6066_v53, 1  ;;  %v6094_v4 = vsel %vm12596_vm4, %v6091_v27, %v6093_v23  ;;  %v5473_v18 = vshrl.u32 %v11335_v30, 16 }
 0x22d   : > { %v4690_v1 = vrot.slane %v4688_v10, 2  ;;  %v4693_v47 = vrot.slane %v4691_v20, 3  ;;  %v4452_v63 = vshrl.u32 %v4412_v33, 16  ;;  %v4455_v46 = vshll.u32 %v4412_v33, 16  ;;  %7301 = vmatmul.mubr.msk.bf16.gmra.mxu1 %vm3141_vm8, %v3334_v7  ;;  %7418 = vmatprep.subr.bf16.mxu0 %v12570_v55 }
 0x22e   : > { %7344 = vmatprep.mubr.msk.bf16.mxu1 %vm3141_vm8, %v4451_v9  ;;  %v4180_v48 = vpop.permute.xlu1 %4179  ;;  %6077 = vrot.lane.b32.xlu0 %v6061_v59, %s7765_s10  ;;  %v6070_v42 = vshrl.u32 %v11368_v13, 16  ;;  %v5475_v57 = vor.u32 %v5473_v18, %v5471_v61 }
 0x22f   : > { %v11415_v19 = vor.u32 %v4693_v47, %v4690_v1  ;;  %v4454_v5 = vrot.slane %v4452_v63, 3  ;;  %v4457_v34 = vrot.slane %v4455_v46, 4  ;;  %7419 = vmatpush3.bf16.msra.mxu0 %v7693_v37  ;;  %v7697_v47 = vld [vmem:[%s11933_s2 + $0x70] sm:$0xff]  }
 0x230   : > { %5504 = vrot.lane.b32.xlu1 %v5497_v41, %s7764_s9  ;;  %v4337_v26 = vpop.permute.xlu0 %4336  ;;  %7420 = vmatprep.subr.bf16.mxu0 %v12570_v55  ;;  %v6072_v1 = vor.u32 %v6070_v42, %v6068_v38  ;;  %v7702_v63 = vld [vmem:[%s11933_s2 + $0x30] sm:$0xff]  }
 0x231   : > { %v4458_v22 = vor.u32 %v4457_v34, %v4454_v5  ;;  %v4394_v40 = vsel %vm2780_vm5, %v12610_v39, %v4337_v26  ;;  %v4695_v60 = vsel %vm3263_vm14, %v11337_v25, %v11415_v19  ;;  %v7694_v25 = vld [vmem:[%s11933_s2 + $0x80] sm:$0xff]   ;;  %v12611_v46 = vld [vmem:[#allocation18_spill] sm:$0xff] }
 0x232   : > { %v4414_v52 = vsel %vm2800_vm9, %v4394_v40, %v11312_v0  ;;  %v11435_v7 = vpop.permute.xlu1 %5030  ;;  %5482 = vrot.lane.b32.xlu0 %v5472_v56, %s7765_s10  ;;  %7376 = vmatprep.mubr.msk.bf16.mxu0 %vm3141_vm8, %v4695_v60  ;;  %v7698_v0 = vld [vmem:[%s11933_s2 + $0x40] sm:$0xff]   ;;  %v7699_v56 = vld [vmem:[%s11933_s2 + $0x68] sm:$0xff]  }
 0x233   : > { %v4460_v14 = vshrl.u32 %v4414_v52, 16  ;;  %v4463_v44 = vshll.u32 %v4414_v52, 16  ;;  %v4459_v51 = vsel %vm3033_vm0, %v11358_v31, %v4458_v22  ;;  %7421 = vmatpush3.bf16.msra.mxu0 %v7696_v24  ;;  %v6069_v31 = vsel %vm12599_vm1, %v6064_v3, %v6068_v38 }
 0x234   : > { %6101 = vrot.lane.b32.xlu1 %v6094_v4, %s7764_s9  ;;  %v4142_v16 = vpop.permute.xlu0 %4141  ;;  %7422 = vmatprep.subr.bf16.mxu0 %v12570_v55  ;;  %v7701_v4 = vld [vmem:[%s11933_s2 + $0x60] sm:$0xff]  }
 0x235   : > { %v4462_v2 = vrot.slane %v4460_v14, 3  ;;  %v4465_v27 = vrot.slane %v4463_v44, 4  ;;  %7345 = vmatmul.mubr.msk.bf16.vlgmr.msra.gmra.mxu1 %vm3141_vm8, %v4459_v51  ;;  %v4199_v59 = vsel %vm2780_vm5, %v12610_v39, %v4142_v16  ;;  %v12612_v39 = vld [vmem:[#allocation21_spill] sm:$0xff] }
 0x236   : > { %v11457_v58 = vpop.permute.xlu1 %4181  ;;  %6079 = vrot.lane.b32.xlu0 %v6069_v31, %s7765_s10  ;;  %7389 = vmatpush3.bf16.msra.mxu1 %v11373_v21  ;;  %v4217_v28 = vsel %vm2800_vm9, %v4199_v59, %v4180_v48  ;;  %v7695_v21 = vld [vmem:[%s11933_s2 + $0x78] sm:$0xff]  }
 0x237   : > { %v4466_v29 = vor.u32 %v4465_v27, %v4462_v2  ;;  %7390 = vmatprep.subr.bf16.mxu1 %v7694_v25  ;;  %7423 = vmatpush3.bf16.msra.mxu0 %v7698_v0  ;;  %v4696_v10 = vshrl.u32 %v4217_v28, 16  ;;  %v4699_v20 = vshll.u32 %v4217_v28, 16 }
 0x238   : > { %5506 = vrot.lane.b32.xlu1 %v11391_v17, %s7764_s9  ;;  %v4377_v8 = vpop.permute.xlu0 %4376  ;;  %7424 = vmatprep.subr.bf16.mxu0 %v12570_v55 }
 0x239   : > { %v4467_v37 = vsel %vm3033_vm0, %v4458_v22, %v4466_v29  ;;  %v4698_v33 = vrot.slane %v4696_v10, 2  ;;  %v4701_v9 = vrot.slane %v4699_v20, 3 }
 0x23a   : > { %v4379_v53 = vpop.permute.xlu1 %4378  ;;  %5484 = vrot.lane.b32.xlu0 %v5475_v57, %s7765_s10  ;;  %7348 = vmatprep.mubr.msk.bf16.mxu1 %vm3141_vm8, %v4467_v37 }
 0x23b   : > { %7391 = vmatpush3.bf16.msra.mxu1 %v7694_v25  ;;  %7425 = vmatpush3.bf16.msra.mxu0 %v7700_v49  ;;  %v4702_v17 = vor.u32 %v4701_v9, %v4698_v33 }
 0x23c   : > { %v4339_v61 = vpop.permute.xlu0 %4338  ;;  %6103 = vrot.lane.b32.xlu1 %v6093_v23, %s7764_s9  ;;  %7392 = vmatprep.subr.bf16.mxu1 %v7695_v21 }
 0x23d   : > { %v4396_v48 = vsel %vm2780_vm5, %v12611_v46, %v4339_v61  ;;  %7426 = vmatprep.subr.bf16.mxu0 %v12570_v55  ;;  %v4703_v23 = vsel %vm3263_vm14, %v11415_v19, %v4702_v17 }
 0x23e   : > { %v4416_v5 = vsel %vm2800_vm9, %v4396_v48, %v4377_v8  ;;  %v11486_v34 = vpop.permute.xlu1 %5070  ;;  %6081 = vrot.lane.b32.xlu0 %v6072_v1, %s7765_s10  ;;  %7377 = vmatmul.mubr.msk.bf16.gmra.mxu0 %vm3141_vm8, %v4703_v23 }
 0x23f   : > { %v4468_v41 = vshrl.u32 %v4416_v5, 16  ;;  %v4471_v24 = vshll.u32 %v4416_v5, 16  ;;  %7393 = vmatpush3.bf16.msra.mxu1 %v7695_v21  ;;  %7427 = vmatpush3.bf16.msra.mxu0 %v7702_v63  ;;  %v4893_v63 = vld [vmem:[#allocation2 + $0x54] sm:$0xf]  ;;  %v7734_v5 = vld [vmem:[#allocation2 + $0x58] sm:$0xf] }
 0x240   : > { %v4341_v26 = vpop.permute.xlu0 %4340  ;;  %7394 = vmatprep.subr.bf16.mxu1 %v7697_v47  ;;  %7480 = vmatprep.subr.bf16.mxu0 %v12570_v55  ;;  %v6725_v23 = vcombine.low %v4893_v63, %v7734_v5 }
 0x241   : > { %v4470_v3 = vrot.slane %v4468_v41, 3  ;;  %v4473_v22 = vrot.slane %v4471_v24, 4  ;;  %v4398_v40 = vsel %vm2780_vm5, %v12612_v39, %v4341_v26  ;;  %v7735_v41 = vld [vmem:[#allocation2 + $0x80] ss:$0 sps:$4 sm:$0x77]  }
 0x242   : > { %v4418_v19 = vsel %vm2800_vm9, %v4398_v40, %v4379_v53  ;;  %v11499_v60 = vpop.permute.xlu1 %5072 }
 0x243   : > { %v4474_v38 = vor.u32 %v4473_v22, %v4470_v3  ;;  %v4476_v52 = vshrl.u32 %v4418_v19, 16  ;;  %v4479_v14 = vshll.u32 %v4418_v19, 16  ;;  %7395 = vmatpush3.bf16.msra.mxu1 %v7697_v47 }
 0x244   : > { %v11501_v44 = vpop.permute.xlu0 %5034  ;;  %7396 = vmatprep.subr.bf16.mxu1 %v7699_v56 }
 0x245   : > { %v4478_v51 = vrot.slane %v4476_v52, 3  ;;  %v4481_v25 = vrot.slane %v4479_v14, 4  ;;  %v4475_v0 = vsel %vm3033_vm0, %v4466_v29, %v4474_v38  ;;  %v7736_v52 = vld [vmem:[#allocation2 + $0x80] sm:$0xf]  ;;  %v7737_v14 = vld [vmem:[#allocation2 + $0x84] sm:$0xf] }
 0x246   : > { %v4144_v16 = vpop.permute.xlu1 %4143  ;;  %7349 = vmatmul.mubr.msk.bf16.gmra.mxu1 %vm3141_vm8, %v4475_v0 }
 0x247   : > { %v11508_v18 = vor.u32 %v4481_v25, %v4478_v51  ;;  %v4201_v2 = vsel %vm2780_vm5, %v12611_v46, %v4144_v16  ;;  %7397 = vmatpush3.bf16.msra.mxu1 %v7699_v56  ;;  %v5086_v56 = vsel %vm2780_vm5, %v6725_v23, %v11404_v6  ;;  %v7738_v25 = vld [vmem:[#allocation2 + $0x5c] sm:$0xff]  }
 0x248   : > { %v4219_v27 = vsel %vm2800_vm9, %v4201_v2, %v11457_v58  ;;  %v4146_v31 = vpop.permute.xlu0 %4145  ;;  %7398 = vmatprep.subr.bf16.mxu1 %v7701_v4  ;;  %v11539_v51 = vsel %vm2800_vm9, %v5086_v56, %v11329_v62  ;;  %v5088_v6 = vsel %vm2780_vm5, %v7738_v25, %v11435_v7 }
 0x249   : > { %v4704_v59 = vshrl.u32 %v4219_v27, 16  ;;  %v4707_v42 = vshll.u32 %v4219_v27, 16  ;;  %v4483_v29 = vsel %vm3033_vm0, %v4474_v38, %v11508_v18  ;;  %v4203_v58 = vsel %vm2780_vm5, %v12612_v39, %v4146_v31  ;;  %v12613_v39 = vld [vmem:[#allocation17_spill] sm:$0xff] }
 0x24a   : > { %v11514_v28 = vpop.permute.xlu1 %5032  ;;  %7352 = vmatprep.mubr.msk.bf16.mxu1 %vm3141_vm8, %v4483_v29  ;;  %v7739_v29 = vld [vmem:[#allocation2 + $0x88] sm:$0xf]  ;;  %v11547_v62 = vsel %vm2800_vm9, %v5088_v6, %v11345_v15 }
 0x24b   : > { %v4706_v49 = vrot.slane %v4704_v59, 2  ;;  %v4709_v10 = vrot.slane %v4707_v42, 3  ;;  %7399 = vmatpush3.bf16.msra.mxu1 %v7701_v4  ;;  %v6674_v4 = vcombine.low %v7736_v52, %v7737_v14  ;;  %v5139_v56 = vshll.u32 %v11547_v62, 16 }
 0x24c   : > { %v4381_v20 = vpop.permute.xlu0 %4380  ;;  %7448 = vmatprep.subr.bf16.mxu1 %v12570_v55 }
 0x24d   : > { %v4710_v8 = vor.u32 %v4709_v10, %v4706_v49  ;;  %v6675_v49 = vcombine.low %v7739_v29, %v7739_v29 }
 0x24e   : > { %v4184_v57 = vpop.permute.xlu1 %4183 }
 0x24f   : > { %v4221_v21 = vsel %vm2800_vm9, %v4203_v58, %v4184_v57  ;;  %v4711_v37 = vsel %vm3263_vm14, %v4702_v17, %v4710_v8  ;;  %v7740_v57 = vld [vmem:[#allocation2 + $0x8c] sm:$0xf] }
 0x250   : > { %v4712_v33 = vshrl.u32 %v4221_v21, 16  ;;  %v4715_v9 = vshll.u32 %v4221_v21, 16  ;;  %7380 = vmatprep.mubr.msk.bf16.mxu0 %vm3141_vm8, %v4711_v37  ;;  %v4383_v53 = vpop.permute.xlu0 %4382 }
 0x252   : > { %v4714_v1 = vrot.slane %v4712_v33, 2  ;;  %v4717_v61 = vrot.slane %v4715_v9, 3  ;;  %v4188_v47 = vpop.permute.xlu1 %4187 }
 0x254   : > { %v11525_v46 = vor.u32 %v4717_v61, %v4714_v1  ;;  %v4150_v48 = vpop.permute.xlu0 %4149  ;;  %v7741_v61 = vld [vmem:[#allocation2 + $0x64] sm:$0xff]  }
 0x255   : > { %v4207_v24 = vsel %vm2780_vm5, %v7735_v41, %v4150_v48 }
 0x256   : > { %v4186_v26 = vpop.permute.xlu1 %4185  ;;  %v4719_v17 = vsel %vm3263_vm14, %v4710_v8, %v11525_v46  ;;  %v4225_v22 = vsel %vm2800_vm9, %v4207_v24, %v4188_v47  ;;  %v5135_v8 = vshll.u32 %v11539_v51, 16  ;;  %v5090_v47 = vsel %vm2780_vm5, %v7741_v61, %v11514_v28 }
 0x257   : > { %7381 = vmatmul.mubr.msk.bf16.gmra.mxu0 %vm3141_vm8, %v4719_v17  ;;  %v4728_v2 = vshrl.u32 %v4225_v22, 16  ;;  %v4731_v27 = vshll.u32 %v4225_v22, 16  ;;  %v5133_v17 = vshrl.u32 %v11539_v51, 16  ;;  %v5108_v14 = vsel %vm2800_vm9, %v5090_v47, %v11486_v34 }
 0x258   : > { %v4343_v3 = vpop.permute.xlu0 %4342  ;;  %v5137_v52 = vrot.slane %v5135_v8, 1  ;;  %v5141_v34 = vrot.slane %v5139_v56, 1  ;;  %v5146_v29 = vshll.u32 %v5108_v14, 16 }
 0x259   : > { %v4400_v40 = vsel %vm2780_vm5, %v12613_v39, %v4343_v3  ;;  %v4730_v63 = vrot.slane %v4728_v2, 2  ;;  %v4733_v48 = vrot.slane %v4731_v27, 3 }
 0x25a   : > { %v4420_v19 = vsel %vm2800_vm9, %v4400_v40, %v4381_v20  ;;  %v4347_v38 = vpop.permute.xlu1 %4346  ;;  %v5541_v20 = vld [vmem:[#allocation2 + $0x88] sm:$0x8] }
 0x25b   : > { %v4484_v0 = vshrl.u32 %v4420_v19, 16  ;;  %v4487_v16 = vshll.u32 %v4420_v19, 16  ;;  %v6769_v21 = vcombine.low %v5541_v20, %v7740_v57  ;;  %v4406_v3 = vsel %vm2780_vm5, %v6675_v49, %v4347_v38 }
 0x25c   : > { %v4345_v31 = vpop.permute.xlu0 %4344  ;;  %v4734_v6 = vor.u32 %v4733_v48, %v4730_v63 }
 0x25d   : > { %v4486_v59 = vrot.slane %v4484_v0, 3  ;;  %v4489_v42 = vrot.slane %v4487_v16, 4  ;;  %v4403_v10 = vsel %vm2780_vm5, %v6674_v4, %v4345_v31  ;;  %v7742_v16 = vld [vmem:[#allocation2 + $0x6c] sm:$0xff]  }
 0x25e   : > { %v4422_v7 = vsel %vm2800_vm9, %v4403_v10, %v4383_v53  ;;  %v4148_v58 = vpop.permute.xlu1 %4147  ;;  %v5092_v2 = vsel %vm2780_vm5, %v7742_v16, %v11501_v44 }
 0x25f   : > { %v4490_v37 = vor.u32 %v4489_v42, %v4486_v59  ;;  %v4492_v33 = vshrl.u32 %v4422_v7, 16  ;;  %v4495_v9 = vshll.u32 %v4422_v7, 16  ;;  %v4205_v1 = vsel %vm2780_vm5, %v12613_v39, %v4148_v58 }
 0x260   : > { %v4223_v15 = vsel %vm2800_vm9, %v4205_v1, %v4186_v26  ;;  %v5629_v5 = vpop.permute.xlu0 %5628  ;;  %v5138_v7 = vor.u32 %v5137_v52, %v5133_v17  ;;  %v5110_v44 = vsel %vm2800_vm9, %v5092_v2, %v11499_v60  ;;  %v5150_v60 = vshrl.u32 %v5108_v14, 16  ;;  %v7744_v2 = vld [vmem:[#allocation2 + $0x7c] sm:$0xff]  }
 0x261   : > { %v4494_v23 = vrot.slane %v4492_v33, 3  ;;  %v4497_v53 = vrot.slane %v4495_v9, 4  ;;  %v4720_v41 = vshrl.u32 %v4223_v15, 16  ;;  %v4723_v24 = vshll.u32 %v4223_v15, 16 }
 0x262   : > { %v4385_v22 = vpop.permute.xlu1 %4384  ;;  %v4491_v39 = vsel %vm3033_vm0, %v11508_v18, %v4490_v37  ;;  %v5142_v9 = vsel %vm12615_vm10, %v5138_v7, %v5141_v34  ;;  %v5153_v1 = vshll.u32 %v5110_v44, 16  ;;  %v5157_v16 = vshrl.u32 %v5110_v44, 16 }
 0x263   : > { %v4498_v28 = vor.u32 %v4497_v53, %v4494_v23  ;;  %v4722_v40 = vrot.slane %v4720_v41, 2  ;;  %v4725_v19 = vrot.slane %v4723_v24, 3  ;;  %v4424_v26 = vsel %vm2800_vm9, %v4406_v3, %v4385_v22  ;;  %7353 = vmatmul.mubr.msk.bf16.gmra.mxu1 %vm3141_vm8, %v4491_v39 }
 0x264   : > { %v4500_v4 = vshrl.u32 %v4424_v26, 16  ;;  %v4503_v51 = vshll.u32 %v4424_v26, 16  ;;  %v5607_v25 = vpop.permute.xlu0 %5606  ;;  %v5143_v23 = vshrl.u32 %v11547_v62, 16  ;;  %v5155_v22 = vrot.slane %v5153_v1, 1  ;;  %v7743_v26 = vld [vmem:[#allocation2 + $0x74] sm:$0xff]   ;;  %v7704_v62 = vld [vmem:[%s11933_s2 + $0x28] sm:$0xff]  }
 0x265   : > { %v4726_v38 = vor.u32 %v4725_v19, %v4722_v40  ;;  %v5640_v0 = vsel %vm2780_vm5, %v6769_v21, %v5607_v25  ;;  %v4499_v18 = vsel %vm3033_vm0, %v4490_v37, %v4498_v28  ;;  %v7703_v40 = vld [vmem:[%s11933_s2 + $0x88] sm:$0xff]   ;;  %v7708_v1 = vld [vmem:[%s11933_s2 + $0x18] sm:$0xff]  }
 0x266   : > { %v4502_v27 = vrot.slane %v4500_v4, 3  ;;  %v4505_v31 = vrot.slane %v4503_v51, 4  ;;  %v5652_v59 = vsel %vm2800_vm9, %v5640_v0, %v5629_v5  ;;  %v5631_v42 = vpop.permute.xlu1 %5630  ;;  %7356 = vmatprep.mubr.msk.bf16.mxu1 %vm3141_vm8, %v4499_v18  ;;  %v5145_v56 = vor.u32 %v5143_v23, %v5141_v34  ;;  %v7705_v18 = vld [vmem:[%s11933_s2 + $0x80] sm:$0xff]  }
 0x267   : > { %v4727_v49 = vsel %vm3263_vm14, %v11525_v46, %v4726_v38  ;;  %v4735_v10 = vsel %vm3263_vm14, %v4726_v38, %v4734_v6  ;;  %v5673_v58 = vshrl.u32 %v5652_v59, 16  ;;  %v5676_v57 = vshll.u32 %v5652_v59, 16  ;;  %v7706_v34 = vld [vmem:[%s11933_s2 + $0x20] sm:$0xff]  }
 0x268   : > { %v4506_v20 = vor.u32 %v4505_v31, %v4502_v27  ;;  %7384 = vmatprep.mubr.msk.bf16.mxu0 %vm3141_vm8, %v4727_v49  ;;  %v5039_v8 = vpop.permute.xlu0 %5038  ;;  %v5148_v46 = vrot.slane %v5146_v29, 1  ;;  %v7745_v23 = vld [vmem:[#allocation2 + $0x84] sm:$0xff]  }
 0x269   : > { %7385 = vmatmul.mubr.msk.bf16.gmra.mxu0 %vm3141_vm8, %v4735_v10  ;;  %v5675_v63 = vrot.slane %v5673_v58, 3  ;;  %v5678_v48 = vrot.slane %v5676_v57, 4  ;;  %v5096_v27 = vsel %vm2780_vm5, %v7744_v2, %v5039_v8  ;;  %v7716_v2 = vld [vmem:[%s11933_s2 + $0x60] sm:$0xff]  }
 0x26a   : > { %v5609_v21 = vpop.permute.xlu1 %5608  ;;  %v4507_v37 = vsel %vm3033_vm0, %v4498_v28, %v4506_v20  ;;  %7428 = vmatprep.mubr.msk.bf16.mxu0 %vm12614_vm3, %v12570_v55  ;;  %v5152_v41 = vor.u32 %v5150_v60, %v5148_v46  ;;  %v5149_v19 = vsel %vm12616_vm7, %v5145_v56, %v5148_v46  ;;  %v5159_v20 = vor.u32 %v5157_v16, %v5155_v22 }
 0x26b   : > { %v5642_v33 = vsel %vm2780_vm5, %v10861_v32, %v5609_v21  ;;  %7357 = vmatmul.mubr.msk.bf16.gmra.mxu1 %vm3141_vm8, %v4507_v37  ;;  %v5679_v39 = vor.u32 %v5678_v48, %v5675_v63  ;;  %v7707_v21 = vld [vmem:[%s11933_s2 + $0x78] sm:$0xff]  }
 0x26c   : > { %v5654_v61 = vsel %vm2800_vm9, %v5642_v33, %v5631_v42  ;;  %7400 = vmatprep.mubr.msk.bf16.mxu1 %vm3141_vm8, %v5142_v9  ;;  %v11586_v47 = vpop.permute.xlu0 %5042  ;;  %v5156_v51 = vsel %vm12617_vm6, %v5152_v41, %v5155_v22 }
 0x26d   : > { %v5680_v15 = vshrl.u32 %v5654_v61, 16  ;;  %v5683_v5 = vshll.u32 %v5654_v61, 16 }
 0x26e   : > { %v5037_v53 = vpop.permute.xlu1 %5036 }
 0x26f   : > { %v5682_v24 = vrot.slane %v5680_v15, 3  ;;  %v5685_v17 = vrot.slane %v5683_v5, 4  ;;  %v5094_v52 = vsel %vm2780_vm5, %v7743_v26, %v5037_v53  ;;  %v7709_v5 = vld [vmem:[%s11933_s2 + $0x70] sm:$0xff]  }
 0x270   : > { %v5633_v3 = vpop.permute.xlu0 %5632 }
 0x271   : > { %v5686_v28 = vor.u32 %v5685_v17, %v5682_v24 }
 0x272   : > { %v5075_v14 = vpop.permute.xlu1 %5074 }
 0x273   : > { %v5112_v4 = vsel %vm2800_vm9, %v5094_v52, %v5075_v14  ;;  %7401 = vmatmul.mubr.msk.bf16.vlgmr.msra.gmra.mxu1 %vm3141_vm8, %v5149_v19  ;;  %v5687_v25 = vsel %vm3033_vm0, %v5679_v39, %v5686_v28  ;;  %v7746_v19 = vld [vmem:[#allocation2 + $0x8c] sm:$0xff]  }
 0x274   : > { %v5160_v6 = vshll.u32 %v5112_v4, 16  ;;  %7404 = vmatprep.mubr.msk.bf16.mxu1 %vm3141_vm8, %v5156_v51  ;;  %7429 = vmatmul.mubr.msk.bf16.vlgmr.msra.gmra.mxu0 %vm3141_vm8, %v5687_v25  ;;  %v5611_v38 = vpop.permute.xlu0 %5610  ;;  %v5164_v7 = vshrl.u32 %v5112_v4, 16  ;;  %v5100_v26 = vsel %vm2780_vm5, %v7746_v19, %v11586_v47  ;;  %v7712_v4 = vld [vmem:[%s11933_s2 + $0x8] sm:$0xff]  }
 0x275   : > { %v5644_v0 = vsel %vm2780_vm5, %v10990_v45, %v5611_v38  ;;  %7481 = vmatpush3.bf16.msra.mxu0 %v7703_v40  ;;  %7432 = vmatprep.mubr.msk.bf16.mxu0 %vm12614_vm3, %v12570_v55  ;;  %v7713_v40 = vld [vmem:[%s11933_s2 + $0x68] sm:$0xff]  }
 0x276   : > { %v5162_v31 = vrot.slane %v5160_v6, 1  ;;  %v5656_v59 = vsel %vm2800_vm9, %v5644_v0, %v5633_v3  ;;  %v5077_v42 = vpop.permute.xlu1 %5076  ;;  %7482 = vmatprep.subr.bf16.mxu0 %v12570_v55  ;;  %7449 = vmatpush3.bf16.msra.mxu1 %v7704_v62 }
 0x277   : > { %v5688_v29 = vshrl.u32 %v5656_v59, 16  ;;  %v5691_v49 = vshll.u32 %v5656_v59, 16  ;;  %v5114_v10 = vsel %vm2800_vm9, %v5096_v27, %v5077_v42  ;;  %7450 = vmatprep.subr.bf16.mxu1 %v12570_v55 }
 0x278   : > { %v5167_v8 = vshll.u32 %v5114_v10, 16  ;;  %v5635_v44 = vpop.permute.xlu0 %5634  ;;  %v5166_v37 = vor.u32 %v5164_v7, %v5162_v31  ;;  %v5163_v9 = vsel %vm12618_vm2, %v5159_v20, %v5162_v31  ;;  %v5171_v56 = vshrl.u32 %v5114_v10, 16  ;;  %v7747_v20 = vld [vmem:[#allocation2 + $0x94] ss:$0 sps:$4 sm:$0x11]  }
 0x279   : > { %v5690_v58 = vrot.slane %v5688_v29, 3  ;;  %v5693_v57 = vrot.slane %v5691_v49, 4  ;;  %7483 = vmatpush3.bf16.msra.mxu0 %v7705_v18 }
 0x27a   : > { %v5169_v46 = vrot.slane %v5167_v8, 1  ;;  %v5041_v33 = vpop.permute.xlu1 %5040  ;;  %7451 = vmatpush3.bf16.msra.mxu1 %v7706_v34  ;;  %7484 = vmatprep.subr.bf16.mxu0 %v12570_v55 }
 0x27b   : > { %v5694_v60 = vor.u32 %v5693_v57, %v5690_v58  ;;  %7405 = vmatmul.mubr.msk.bf16.gmra.mxu1 %vm3141_vm8, %v5163_v9  ;;  %7452 = vmatprep.subr.bf16.mxu1 %v12570_v55  ;;  %v5098_v53 = vsel %vm2780_vm5, %v7745_v23, %v5041_v33 }
 0x27c   : > { %v5613_v61 = vpop.permute.xlu0 %5612  ;;  %v5170_v63 = vsel %vm12619_vm11, %v5166_v37, %v5169_v46  ;;  %v5173_v52 = vor.u32 %v5171_v56, %v5169_v46  ;;  %v5397_v37 = vld [vmem:[#allocation2 + $0x80] sm:$0xc] }
 0x27d   : > { %v5647_v48 = vsel %vm2780_vm5, %v6770_v12, %v5613_v61  ;;  %7408 = vmatprep.mubr.msk.bf16.mxu1 %vm3141_vm8, %v5170_v63  ;;  %v5695_v15 = vsel %vm3033_vm0, %v5686_v28, %v5694_v60  ;;  %7485 = vmatpush3.bf16.msra.mxu0 %v7707_v21  ;;  %v7748_v61 = vld [vmem:[#allocation2 + $0x84] sm:$0xf] }
 0x27e   : > { %v5658_v41 = vsel %vm2800_vm9, %v5647_v48, %v5635_v44  ;;  %v5079_v24 = vpop.permute.xlu1 %5078  ;;  %7433 = vmatmul.mubr.msk.bf16.gmra.mxu0 %vm3141_vm8, %v5695_v15  ;;  %7453 = vmatpush3.bf16.msra.mxu1 %v7708_v1  ;;  %v6762_v63 = vcombine.low %v5397_v37, %v7748_v61 }
 0x27f   : > { %v5696_v11 = vshrl.u32 %v5658_v41, 16  ;;  %v5699_v12 = vshll.u32 %v5658_v41, 16  ;;  %v5116_v17 = vsel %vm2800_vm9, %v5098_v53, %v5079_v24  ;;  %7436 = vmatprep.mubr.msk.bf16.mxu0 %vm12614_vm3, %v12570_v55  ;;  %7486 = vmatprep.subr.bf16.mxu0 %v12570_v55 }
 0x280   : > { %v5174_v3 = vshll.u32 %v5116_v17, 16  ;;  %v5637_v22 = vpop.permute.xlu0 %5636  ;;  %7454 = vmatprep.subr.bf16.mxu1 %v12570_v55  ;;  %v5178_v6 = vshrl.u32 %v5116_v17, 16 }
 0x281   : > { %v5698_v39 = vrot.slane %v5696_v11, 3  ;;  %v5701_v28 = vrot.slane %v5699_v12, 4  ;;  %7487 = vmatpush3.bf16.msra.mxu0 %v7709_v5 }
 0x282   : > { %v5176_v14 = vrot.slane %v5174_v3, 1  ;;  %v5081_v62 = vpop.permute.xlu1 %5080  ;;  %7455 = vmatpush3.bf16.msra.mxu1 %v7711_v36  ;;  %7488 = vmatprep.subr.bf16.mxu0 %v12570_v55 }
 0x283   : > { %v5702_v51 = vor.u32 %v5701_v28, %v5698_v39  ;;  %v5118_v25 = vsel %vm2800_vm9, %v5100_v26, %v5081_v62  ;;  %7456 = vmatprep.subr.bf16.mxu1 %v12570_v55 }
 0x284   : > { %v5181_v38 = vshll.u32 %v5118_v25, 16  ;;  %v5615_v0 = vpop.permute.xlu0 %5614  ;;  %v5177_v47 = vsel %vm12620_vm13, %v5173_v52, %v5176_v14  ;;  %v5180_v27 = vor.u32 %v5178_v6, %v5176_v14  ;;  %v5185_v58 = vshrl.u32 %v5118_v25, 16 }
 0x285   : > { %v5650_v18 = vsel %vm2780_vm5, %v6771_v35, %v5615_v0  ;;  %7409 = vmatmul.mubr.msk.bf16.gmra.mxu1 %vm3141_vm8, %v5177_v47  ;;  %v5703_v16 = vsel %vm3033_vm0, %v5694_v60, %v5702_v51  ;;  %7489 = vmatpush3.bf16.msra.mxu0 %v7713_v40  ;;  %v7750_v0 = vld [vmem:[#allocation2 + $0x9c] sm:$0xff]  }
 0x286   : > { %v5183_v31 = vrot.slane %v5181_v38, 1  ;;  %v5660_v59 = vsel %vm2800_vm9, %v5650_v18, %v5637_v22  ;;  %v5083_v42 = vpop.permute.xlu1 %5082  ;;  %7437 = vmatmul.mubr.msk.bf16.gmra.mxu0 %vm3141_vm8, %v5703_v16  ;;  %7457 = vmatpush3.bf16.msra.mxu1 %v7712_v4  ;;  %v7749_v22 = vld [vmem:[#allocation2 + $0x98] sm:$0xf] }
 0x287   : > { %v5704_v50 = vshrl.u32 %v5660_v59, 16  ;;  %v5707_v35 = vshll.u32 %v5660_v59, 16  ;;  %7440 = vmatprep.mubr.msk.bf16.mxu0 %vm12614_vm3, %v12570_v55  ;;  %7458 = vmatprep.subr.bf16.mxu1 %v12570_v55 }
 0x288   : > { %v5045_v34 = vpop.permute.xlu0 %5044  ;;  %v5184_v29 = vsel %vm12621_vm15, %v5180_v27, %v5183_v31  ;;  %7490 = vmatprep.subr.bf16.mxu0 %v12570_v55  ;;  %v5187_v33 = vor.u32 %v5185_v58, %v5183_v31 }
 0x289   : > { %v5706_v49 = vrot.slane %v5704_v50, 3  ;;  %v5709_v10 = vrot.slane %v5707_v35, 4  ;;  %v5102_v7 = vsel %vm2780_vm5, %v7747_v20, %v5045_v34  ;;  %7412 = vmatprep.mubr.msk.bf16.mxu1 %vm3141_vm8, %v5184_v29  ;;  %7491 = vmatpush3.bf16.msra.mxu0 %v7716_v2 }
 0x28a   : > { %v5120_v8 = vsel %vm2800_vm9, %v5102_v7, %v5083_v42  ;;  %v5479_v44 = vpop.permute.xlu1 %5478  ;;  %7459 = vmatpush3.bf16.msra.mxu1 %v7715_v43 }
 0x28b   : > { %v5710_v57 = vor.u32 %v5709_v10, %v5706_v49  ;;  %v5188_v21 = vshll.u32 %v5120_v8, 16  ;;  %v5512_v60 = vsel %vm2780_vm5, %v10831_v54, %v5479_v44  ;;  %v5997_v54 = vld [vmem:[#allocation2 + $0x94] sm:$0xf]  ;;  %v7751_v8 = vld [vmem:[#allocation2 + $0xa4] sm:$0xff]  }
 0x28c   : > { %v5477_v46 = vpop.permute.xlu0 %5476  ;;  %v6812_v39 = vcombine.low %v5997_v54, %v7749_v22 }
 0x28d   : > { %v5190_v9 = vrot.slane %v5188_v21, 1  ;;  %v5711_v1 = vsel %vm3033_vm0, %v5702_v51, %v5710_v57  ;;  %v5510_v23 = vsel %vm2780_vm5, %v6762_v63, %v5477_v46  ;;  %vm12623_vm0 = vmmov %vm12599_vm1 }
 0x28e   : > { %v5501_v48 = vpop.permute.xlu1 %5500  ;;  %7441 = vmatmul.mubr.msk.bf16.gmra.mxu0 %vm3141_vm8, %v5711_v1  ;;  %vm12624_vm4 = vmmov %vm12623_vm0 }
 0x28f   : > { %v5522_v15 = vsel %vm2800_vm9, %v5512_v60, %v5501_v48  ;;  %v5191_v5 = vsel %vm12622_vm12, %v5187_v33, %v5190_v9  ;;  %7444 = vmatprep.mubr.msk.bf16.mxu0 %vm12614_vm3, %v12570_v55  ;;  %vm12625_vm1 = vmmov %vm12623_vm0 }
 0x290   : > { %v5842_v53 = vshrl.u32 %v5522_v15, 16  ;;  %v5845_v41 = vshll.u32 %v5522_v15, 16  ;;  %7413 = vmatmul.mubr.msk.bf16.gmra.mxu1 %vm3141_vm8, %v5191_v5  ;;  %v5499_v24 = vpop.permute.xlu0 %5498  ;;  %vm12626_vm10 = vmmov %vm12623_vm0 }
 0x291   : > { %v5520_v36 = vsel %vm2800_vm9, %v5510_v23, %v5499_v24  ;;  %7460 = vmatprep.mubr.msk.bf16.mxu1 %vm12614_vm3, %v12570_v55  ;;  %v7752_v24 = vld [vmem:[#allocation2 + $0xac] sm:$0xff]  }
 0x292   : > { %v5844_v11 = vrot.slane %v5842_v53, 2  ;;  %v5847_v12 = vrot.slane %v5845_v41, 3  ;;  %v5835_v17 = vshrl.u32 %v5520_v36, 16  ;;  %v5838_v56 = vshll.u32 %v5520_v36, 16  ;;  %v6096_v3 = vpop.permute.xlu1 %6095  ;;  %v11725_v53 = vpop.f32.mrf.mxu1 }
 0x294   : > { %v5837_v28 = vrot.slane %v5835_v17, 2  ;;  %v5840_v40 = vrot.slane %v5838_v56, 3  ;;  %v6074_v19 = vpop.permute.xlu0 %6073  ;;  %v5848_v52 = vor.u32 %v5847_v12, %v5844_v11  ;;  %v3200_v22 = vpop.f32.mrf.mxu1 }
 0x295   : > { %v6107_v26 = vsel %vm2780_vm5, %v6812_v39, %v6074_v19 }
 0x296   : > { %v5841_v14 = vor.u32 %v5840_v40, %v5837_v28  ;;  %v6117_v62 = vsel %vm2800_vm9, %v6107_v26, %v6096_v3  ;;  %v6098_v4 = vpop.permute.xlu1 %6097  ;;  %7445 = vmatmul.mubr.msk.bf16.gmra.mxu0 %vm3141_vm8, %v5710_v57 }
 0x297   : > { %v6140_v51 = vshll.u32 %v6117_v62, 16  ;;  %7492 = vmatprep.mubr.msk.bf16.mxu0 %vm12614_vm3, %v12570_v55  ;;  %v6138_v2 = vshrl.u32 %v6117_v62, 16 }
 0x298   : > { %v5849_v25 = vsel %vm3263_vm14, %v5841_v14, %v5848_v52  ;;  %v6076_v6 = vpop.permute.xlu0 %6075 }
 0x299   : > { %v6142_v38 = vrot.slane %v6140_v51, 1  ;;  %v6109_v47 = vsel %vm2780_vm5, %v7750_v0, %v6076_v6  ;;  %7461 = vmatmul.mubr.msk.bf16.vlgmr.msra.gmra.mxu1 %vm3141_vm8, %v5849_v25  ;;  %v7263_v25 = vpop.f32.mrf.mxu1 }
 0x29a   : > { %v6119_v18 = vsel %vm2800_vm9, %v6109_v47, %v6098_v4  ;;  %v5503_v16 = vpop.permute.xlu1 %5502  ;;  %7464 = vmatprep.mubr.msk.bf16.mxu1 %vm12614_vm3, %v12570_v55 }
 0x29b   : > { %v6144_v27 = vshll.u32 %v6119_v18, 16  ;;  %v6143_v59 = vor.u32 %v6142_v38, %v6138_v2  ;;  %v6148_v57 = vshrl.u32 %v6119_v18, 16  ;;  %v3203_v2 = vpop.f32.mrf.mxu1 }
 0x29c   : > { %v5481_v31 = vpop.permute.xlu0 %5480 }
 0x29d   : > { %v6146_v42 = vrot.slane %v6144_v27, 1  ;;  %v5514_v43 = vsel %vm2780_vm5, %v10861_v32, %v5481_v31 }
 0x29e   : > { %v5524_v50 = vsel %vm2800_vm9, %v5514_v43, %v5503_v16  ;;  %v6100_v35 = vpop.permute.xlu1 %6099 }
 0x29f   : > { %v6147_v34 = vsel %vm12623_vm0, %v6143_v59, %v6146_v42  ;;  %v5850_v29 = vshrl.u32 %v5524_v50, 16  ;;  %v5853_v49 = vshll.u32 %v5524_v50, 16  ;;  %v6150_v33 = vor.u32 %v6148_v57, %v6146_v42  ;;  %v7266_v42 = vpop.f32.mrf.mxu1 }
 0x2a0   : > { %7493 = vmatmul.mubr.msk.bf16.vlgmr.msra.gmra.mxu0 %vm3141_vm8, %v6147_v34  ;;  %v6078_v10 = vpop.permute.xlu0 %6077  ;;  %v7318_v34 = vpop.f32.mrf.mxu0 }
 0x2a1   : > { %v5852_v20 = vrot.slane %v5850_v29, 2  ;;  %v5855_v7 = vrot.slane %v5853_v49, 3  ;;  %v6111_v44 = vsel %vm2780_vm5, %v7751_v8, %v6078_v10  ;;  %7496 = vmatprep.mubr.msk.bf16.mxu0 %vm12614_vm3, %v12570_v55 }
 0x2a2   : > { %v6121_v32 = vsel %vm2800_vm9, %v6111_v44, %v6100_v35  ;;  %v5505_v58 = vpop.permute.xlu1 %5504  ;;  %v3886_v49 = vpop.f32.mrf.mxu0 }
 0x2a3   : > { %v5856_v21 = vor.u32 %v5855_v7, %v5852_v20  ;;  %v6151_v37 = vshll.u32 %v6121_v32, 16  ;;  %v6155_v11 = vshrl.u32 %v6121_v32, 16 }
 0x2a4   : > { %v5483_v46 = vpop.permute.xlu0 %5482  ;;  %v7319_v7 = vpop.f32.mrf.mxu0 }
 0x2a5   : > { %v6153_v9 = vrot.slane %v6151_v37, 1  ;;  %v5516_v1 = vsel %vm2780_vm5, %v10990_v45, %v5483_v46  ;;  %v5857_v60 = vsel %vm3263_vm14, %v5848_v52, %v5856_v21 }
 0x2a6   : > { %v5526_v61 = vsel %vm2800_vm9, %v5516_v1, %v5505_v58  ;;  %v6102_v63 = vpop.permute.xlu1 %6101  ;;  %7465 = vmatmul.mubr.msk.bf16.gmra.mxu1 %vm3141_vm8, %v5857_v60  ;;  %v3889_v32 = vpop.f32.mrf.mxu0 }
 0x2a7   : > { %v5858_v48 = vshrl.u32 %v5526_v61, 16  ;;  %v5861_v15 = vshll.u32 %v5526_v61, 16  ;;  %v6154_v5 = vsel %vm12624_vm4, %v6150_v33, %v6153_v9  ;;  %7468 = vmatprep.mubr.msk.bf16.mxu1 %vm12614_vm3, %v12570_v55  ;;  %v6157_v39 = vor.u32 %v6155_v11, %v6153_v9 }
 0x2a8   : > { %7497 = vmatmul.mubr.msk.bf16.gmra.mxu0 %vm3141_vm8, %v6154_v5  ;;  %v6080_v23 = vpop.permute.xlu0 %6079 }
 0x2a9   : > { %v5860_v45 = vrot.slane %v5858_v48, 2  ;;  %v5863_v41 = vrot.slane %v5861_v15, 3  ;;  %v6113_v54 = vsel %vm2780_vm5, %v7752_v24, %v6080_v23  ;;  %7500 = vmatprep.mubr.msk.bf16.mxu0 %vm12614_vm3, %v12570_v55 }
 0x2aa   : > { %v6123_v36 = vsel %vm2800_vm9, %v6113_v54, %v6102_v63  ;;  %v5507_v56 = vpop.permute.xlu1 %5506 }
 0x2ab   : > { %v5864_v12 = vor.u32 %v5863_v41, %v5860_v45  ;;  %v6158_v17 = vshll.u32 %v6123_v36, 16  ;;  %v6162_v47 = vshrl.u32 %v6123_v36, 16 }
 0x2ac   : > { %v5485_v3 = vpop.permute.xlu0 %5484 }
 0x2ad   : > { %v6160_v28 = vrot.slane %v6158_v17, 1  ;;  %v5518_v40 = vsel %vm2780_vm5, %v11335_v30, %v5485_v3  ;;  %v5865_v19 = vsel %vm3263_vm14, %v5856_v21, %v5864_v12 }
 0x2ae   : > { %v5528_v26 = vsel %vm2800_vm9, %v5518_v40, %v5507_v56  ;;  %7469 = vmatmul.mubr.msk.bf16.gmra.mxu1 %vm3141_vm8, %v5865_v19  ;;  %v6104_v4 = vpop.permute.xlu1 %6103 }
 0x2af   : > { %v5866_v52 = vshrl.u32 %v5528_v26, 16  ;;  %v5869_v14 = vshll.u32 %v5528_v26, 16  ;;  %v6161_v62 = vsel %vm12625_vm1, %v6157_v39, %v6160_v28  ;;  %7472 = vmatprep.mubr.msk.bf16.mxu1 %vm12614_vm3, %v12570_v55  ;;  %v6164_v27 = vor.u32 %v6162_v47, %v6160_v28 }
 0x2b0   : > { %7501 = vmatmul.mubr.msk.bf16.gmra.mxu0 %vm3141_vm8, %v6161_v62  ;;  %v6082_v51 = vpop.permute.xlu0 %6081 }
 0x2b1   : > { %v5868_v6 = vrot.slane %v5866_v52, 2  ;;  %v5871_v30 = vrot.slane %v5869_v14, 3  ;;  %v6115_v38 = vsel %vm2780_vm5, %v11368_v13, %v6082_v51  ;;  %7504 = vmatprep.mubr.msk.bf16.mxu0 %vm12614_vm3, %v12570_v55  ;;  %v3216_v13 = vpop.f32.mrf.mxu1 }
 0x2b2   : > { %v6125_v0 = vsel %vm2800_vm9, %v6115_v38, %v6104_v4  ;;  %vm12627_vm9 = vcmask 257024  }
 0x2b3   : > { %v5872_v18 = vor.u32 %v5871_v30, %v5868_v6  ;;  %v6165_v16 = vshll.u32 %v6125_v0, 16  ;;  %v6169_v50 = vshrl.u32 %v6125_v0, 16  ;;  %v7267_v29 = vpop.f32.mrf.mxu1 }
 0x2b5   : > { %v6167_v31 = vrot.slane %v6165_v16, 1  ;;  %v5873_v59 = vsel %vm3263_vm14, %v5864_v12, %v5872_v18  ;;  %v3219_v10 = vpop.f32.mrf.mxu1 }
 0x2b6   : > { %7473 = vmatmul.mubr.msk.bf16.gmra.mxu1 %vm3141_vm8, %v5873_v59 }
 0x2b7   : > { %v6168_v43 = vsel %vm12626_vm10, %v6164_v27, %v6167_v31  ;;  %7476 = vmatprep.mubr.msk.bf16.mxu1 %vm12614_vm3, %v12570_v55  ;;  %v6171_v35 = vor.u32 %v6169_v50, %v6167_v31 }
 0x2b8   : > { %7505 = vmatmul.mubr.msk.bf16.gmra.mxu0 %vm3141_vm8, %v6168_v43 }
 0x2b9   : > { %7508 = vmatprep.mubr.msk.bf16.mxu0 %vm12614_vm3, %v12570_v55  ;;  %v7322_v55 = vpop.f32.mrf.mxu0 }
 0x2bb   : > { %v3902_v37 = vpop.f32.mrf.mxu0 }
 0x2bd   : > { %v7323_v9 = vpop.f32.mrf.mxu0 }
 0x2be   : > { %7477 = vmatmul.mubr.msk.bf16.gmra.mxu1 %vm3141_vm8, %v5872_v18 }
 0x2bf   : > { %v3905_v15 = vpop.f32.mrf.mxu0 }
 0x2c0   : > { %7509 = vmatmul.mubr.msk.bf16.gmra.mxu0 %vm3141_vm8, %v6171_v35 }
 0x2c4   : > { %v7270_v20 = vpop.f32.mrf.mxu1 }
 0x2c6   : > { %v3232_v8 = vpop.f32.mrf.mxu1 }
 0x2c8   : > { %v11755_v44 = vpop.f32.mrf.mxu1 }
 0x2ca   : > { %v11757_v58 = vpop.f32.mrf.mxu1 }
 0x2cc   : > { %v11759_v57 = vpop.f32.mrf.mxu1 }
 0x2ce   : > { %v11761_v21 = vpop.f32.mrf.mxu1 }
 0x2d0   : > { %v11763_v46 = vpop.f32.mrf.mxu1 }
 0x2d2   : > { %v11765_v33 = vpop.f32.mrf.mxu1 }
 0x2d4   : > { %v7326_v24 = vpop.f32.mrf.mxu0 }
 0x2d5   : > { %v7290_v1 = vpop.f32.mrf.mxu1 }
 0x2d6   : > { %v3438_v60 = vadd.f32 %v7290_v1, %v11725_v53 }
 0x2d7   : > { %v3429_v61 = vpop.f32.mrf.mxu1 }
 0x2d8   : > { %v3951_v63 = vadd.f32 %v7318_v34, %v3438_v60  ;;  %v3430_v48 = vadd.f32 %v3429_v61, %v3200_v22  ;;  %v3918_v22 = vpop.f32.mrf.mxu0 }
 0x2d9   : > { %v7291_v5 = vpop.f32.mrf.mxu1 }
 0x2da   : > { %v3967_v23 = vmax.f32 %v3951_v63, 0.0  ;;  %v3949_v45 = vadd.f32 %v3886_v49, %v3430_v48  ;;  %v3441_v41 = vadd.f32 %v7291_v5, %v7263_v25  ;;  %v7327_v4 = vpop.f32.mrf.mxu0 }
 0x2db   : > { %v3432_v54 = vpop.f32.mrf.mxu1 }
 0x2dc   : > { %3983 = vst.msk [vmem:[%s11772_s28 + $0x10] sm:$0xff] %vm2780_vm5, %v3967_v23  ;;  %v3965_v53 = vmax.f32 %v3949_v45, 0.0  ;;  %v3952_v36 = vadd.f32 %v7319_v7, %v3441_v41  ;;  %v3433_v11 = vadd.f32 %v3432_v54, %v3203_v2  ;;  %v3921_v16 = vpop.f32.mrf.mxu0 }
 0x2dd   : > { %v7294_v12 = vpop.f32.mrf.mxu1 }
 0x2de   : > { %3981 = vst.msk [vmem:[%s11772_s28] sm:$0xff] %vm2780_vm5, %v3965_v53  ;;  %v3968_v17 = vmax.f32 %v3952_v36, 0.0  ;;  %v3950_v56 = vadd.f32 %v3889_v32, %v3433_v11  ;;  %v3454_v3 = vadd.f32 %v7294_v12, %v7266_v42 }
 0x2df   : > { %v3445_v39 = vpop.f32.mrf.mxu1 }
 0x2e0   : > { %3984 = vst.msk [vmem:[%s11772_s28 + $0x18] sm:$0xff] %vm2780_vm5, %v3968_v17  ;;  %v3966_v28 = vmax.f32 %v3950_v56, 0.0  ;;  %v3955_v40 = vadd.f32 %v7322_v55, %v3454_v3  ;;  %v3446_v19 = vadd.f32 %v3445_v39, %v3216_v13 }
 0x2e1   : > { %v7295_v26 = vpop.f32.mrf.mxu1 }
 0x2e2   : > { %3982 = vst.msk [vmem:[%s11772_s28 + $0x8] sm:$0xff] %vm2780_vm5, %v3966_v28  ;;  %v3971_v52 = vmax.f32 %v3955_v40, 0.0  ;;  %v3953_v14 = vadd.f32 %v3902_v37, %v3446_v19  ;;  %v3457_v62 = vadd.f32 %v7295_v26, %v7267_v29  ;;  %v7330_v42 = vpop.f32.mrf.mxu0 }
 0x2e3   : > { %v3448_v51 = vpop.f32.mrf.mxu1 }
 0x2e4   : > { %3987 = vst.msk [vmem:[%s11772_s28 + $0x30] sm:$0xff] %vm2780_vm5, %v3971_v52  ;;  %v3969_v25 = vmax.f32 %v3953_v14, 0.0  ;;  %v3956_v6 = vadd.f32 %v7323_v9, %v3457_v62  ;;  %v3449_v30 = vadd.f32 %v3448_v51, %v3219_v10 }
 0x2e5   : > { %v7298_v38 = vpop.f32.mrf.mxu1 }
 0x2e6   : > { %3985 = vst.msk [vmem:[%s11772_s28 + $0x20] sm:$0xff] %vm2780_vm5, %v3969_v25  ;;  %v3972_v0 = vmax.f32 %v3956_v6, 0.0  ;;  %v3954_v47 = vadd.f32 %v3905_v15, %v3449_v30  ;;  %v3470_v18 = vadd.f32 %v7298_v38, %v7270_v20  ;;  %v3934_v20 = vpop.f32.mrf.mxu0 }
 0x2e7   : > { %v3461_v2 = vpop.f32.mrf.mxu1 }
 0x2e8   : > { %3988 = vst.msk [vmem:[%s11772_s28 + $0x38] sm:$0xff] %vm2780_vm5, %v3972_v0  ;;  %v3970_v27 = vmax.f32 %v3954_v47, 0.0  ;;  %v3959_v31 = vadd.f32 %v7326_v24, %v3470_v18  ;;  %v3462_v59 = vadd.f32 %v3461_v2, %v3232_v8  ;;  %v7331_v60 = vpop.f32.mrf.mxu0 }
 0x2e9   : > { %v7299_v43 = vpop.f32.mrf.mxu1 }
 0x2ea   : > { %3986 = vst.msk [vmem:[%s11772_s28 + $0x28] sm:$0xff] %vm2780_vm5, %v3970_v27  ;;  %v3975_v13 = vmax.f32 %v3959_v31, 0.0  ;;  %v3957_v50 = vadd.f32 %v3918_v22, %v3462_v59  ;;  %v3473_v35 = vadd.f32 %v7299_v43, %v11755_v44  ;;  %v3937_v45 = vpop.f32.mrf.mxu0 }
 0x2eb   : > { %v3464_v34 = vpop.f32.mrf.mxu1 }
 0x2ec   : > { %3991 = vst.msk [vmem:[%s11772_s28 + $0x50] sm:$0xff] %vm2780_vm5, %v3975_v13  ;;  %v3973_v29 = vmax.f32 %v3957_v50, 0.0  ;;  %v3960_v49 = vadd.f32 %v7327_v4, %v3473_v35  ;;  %v3465_v10 = vadd.f32 %v3464_v34, %v11757_v58  ;;  %v7374_v54 = vpop.f32.mrf.mxu0 }
 0x2ed   : > { %v7302_v7 = vpop.f32.mrf.mxu1 }
 0x2ee   : > { %3989 = vst.msk [vmem:[%s11772_s28 + $0x40] sm:$0xff] %vm2780_vm5, %v3973_v29  ;;  %v3976_v8 = vmax.f32 %v3960_v49, 0.0  ;;  %v3958_v32 = vadd.f32 %v3921_v16, %v3465_v10  ;;  %v3486_v55 = vadd.f32 %v7302_v7, %v11759_v57  ;;  %v4830_v53 = vpop.f32.mrf.mxu0 }
 0x2ef   : > { %v3477_v37 = vpop.f32.mrf.mxu1 }
 0x2f0   : > { %3992 = vst.msk [vmem:[%s11772_s28 + $0x58] sm:$0xff] %vm2780_vm5, %v3976_v8  ;;  %v3974_v44 = vmax.f32 %v3958_v32, 0.0  ;;  %v3963_v9 = vadd.f32 %v7330_v42, %v3486_v55  ;;  %v3478_v1 = vadd.f32 %v3477_v37, %v11761_v21 }
 0x2f1   : > { %v7303_v58 = vpop.f32.mrf.mxu1 }
 0x2f2   : > { %3990 = vst.msk [vmem:[%s11772_s28 + $0x48] sm:$0xff] %vm2780_vm5, %v3974_v44  ;;  %v3979_v61 = vmax.f32 %v3963_v9, 0.0  ;;  %v3961_v63 = vadd.f32 %v3934_v20, %v3478_v1  ;;  %v3489_v48 = vadd.f32 %v7303_v58, %v11763_v46  ;;  %v7375_v46 = vpop.f32.mrf.mxu0 }
 0x2f3   : > { %v3480_v15 = vpop.f32.mrf.mxu1 }
 0x2f4   : > { %3995 = vst.msk [vmem:[%s11772_s28 + $0x70] sm:$0xff] %vm2780_vm5, %v3979_v61  ;;  %v3977_v57 = vmax.f32 %v3961_v63, 0.0  ;;  %v3964_v5 = vadd.f32 %v7331_v60, %v3489_v48  ;;  %v3481_v23 = vadd.f32 %v3480_v15, %v11765_v33  ;;  %v4833_v11 = vpop.f32.mrf.mxu0 }
 0x2f5   : > { %v7346_v36 = vpop.f32.mrf.mxu1 }
 0x2f6   : > { %3993 = vst.msk [vmem:[%s11772_s28 + $0x60] sm:$0xff] %vm2780_vm5, %v3977_v57  ;;  %v3980_v21 = vmax.f32 %v3964_v5, 0.0  ;;  %v3962_v41 = vadd.f32 %v3937_v45, %v3481_v23  ;;  %v4839_v31 = vadd.f32 %v7374_v54, %v7346_v36 }
 0x2f7   : > { %v4602_v12 = vpop.f32.mrf.mxu1 }
 0x2f8   : > { %3996 = vst.msk [vmem:[%s11772_s28 + $0x78] sm:$0xff] %vm2780_vm5, %v3980_v21  ;;  %v3978_v24 = vmax.f32 %v3962_v41, 0.0  ;;  %v4831_v43 = vadd.f32 %v4830_v53, %v4602_v12 }
 0x2f9   : > { %v7347_v56 = vpop.f32.mrf.mxu1 }
 0x2fa   : > { %3994 = vst.msk [vmem:[%s11772_s28 + $0x68] sm:$0xff] %vm2780_vm5, %v3978_v24  ;;  %v4842_v34 = vadd.f32 %v7375_v46, %v7347_v56 }
 0x2fb   : > { %v4605_v33 = vpop.f32.mrf.mxu1 }
 0x2fc   : > { %v4834_v7 = vadd.f32 %v4833_v11, %v4605_v33 }
 0x2fe   : > { %v7378_v17 = vpop.f32.mrf.mxu0 }
 0x300   : > { %v4846_v3 = vpop.f32.mrf.mxu0 }
 0x302   : > { %v7379_v22 = vpop.f32.mrf.mxu0 }
 0x304   : > { %v4849_v28 = vpop.f32.mrf.mxu0 }
 0x306   : > { %v7350_v39 = vpop.f32.mrf.mxu1 }
 0x307   : > { %v4855_v44 = vadd.f32 %v7378_v17, %v7350_v39 }
 0x308   : > { %v4618_v40 = vpop.f32.mrf.mxu1 }
 0x309   : > { %v4847_v61 = vadd.f32 %v4846_v3, %v4618_v40 }
 0x30a   : > { %v7351_v26 = vpop.f32.mrf.mxu1 }
 0x30b   : > { %v4858_v57 = vadd.f32 %v7379_v22, %v7351_v26 }
 0x30c   : > { %v4621_v14 = vpop.f32.mrf.mxu1 }
 0x30d   : > { %v4850_v41 = vadd.f32 %v4849_v28, %v4621_v14 }
 0x317   : > { %v7382_v19 = vpop.f32.mrf.mxu0 }
 0x319   : > { %v11812_v52 = vpop.f32.mrf.mxu0 }
 0x31b   : > { %v11814_v62 = vpop.f32.mrf.mxu0 }
 0x31d   : > { %v11816_v25 = vpop.f32.mrf.mxu0 }
 0x323   : > { %v7354_v4 = vpop.f32.mrf.mxu1 }
 0x324   : > { %v4871_v17 = vadd.f32 %v7382_v19, %v7354_v4 }
 0x325   : > { %v4634_v51 = vpop.f32.mrf.mxu1 }
 0x326   : > { %v4863_v22 = vadd.f32 %v11812_v52, %v4634_v51 }
 0x327   : > { %v11818_v6 = vpop.f32.mrf.mxu1 }
 0x328   : > { %v4874_v26 = vadd.f32 %v11814_v62, %v11818_v6 }
 0x329   : > { %v11820_v30 = vpop.f32.mrf.mxu1  ;;  %v11822_v38 = vpop.f32.mrf.mxu0 }
 0x32b   : > { %v11824_v0 = vpop.f32.mrf.mxu1  ;;  %v11826_v47 = vpop.f32.mrf.mxu0 }
 0x32d   : > { %v11828_v18 = vpop.f32.mrf.mxu1  ;;  %v11830_v16 = vpop.f32.mrf.mxu0 }
 0x32f   : > { %v11832_v2 = vpop.f32.mrf.mxu1  ;;  %v11836_v59 = vpop.f32.mrf.mxu0 }
 0x331   : > { %v11834_v27 = vpop.f32.mrf.mxu1 }
 0x333   : > { %v7402_v42 = vpop.f32.mrf.mxu1 }
 0x334   : > { %v5351_v13 = vadd.f32 %v7402_v42, %v4839_v31  ;;  %v11838_v50 = vpop.f32.mrf.mxu0  ;;  %v4866_v42 = vadd.f32 %v11816_v25, %v11820_v30  ;;  %v4887_v25 = vadd.f32 %v11822_v38, %v11824_v0  ;;  %v4882_v0 = vadd.f32 %v11836_v59, %v11834_v27 }
 0x335   : > { %v5286_v35 = vpop.f32.mrf.mxu1 }
 0x336   : > { %v5367_v29 = vmax.f32 %v5351_v13, 0.0  ;;  %v5349_v49 = vadd.f32 %v5286_v35, %v4831_v43  ;;  %v7430_v10 = vpop.f32.mrf.mxu0 }
 0x337   : > { %v7403_v20 = vpop.f32.mrf.mxu1  ;;  %v4879_v10 = vadd.f32 %v11826_v47, %v11828_v18 }
 0x338   : > { %5383 = vst.msk [vmem:[%s11772_s28 + $0x90] sm:$0xff] %vm2780_vm5, %v5367_v29  ;;  %v5365_v8 = vmax.f32 %v5349_v49, 0.0  ;;  %v5352_v32 = vadd.f32 %v7403_v20, %v4842_v34  ;;  %v11842_v55 = vpop.f32.mrf.mxu0 }
 0x339   : > { %v5289_v37 = vpop.f32.mrf.mxu1 }
 0x33a   : > { %5381 = vst.msk [vmem:[%s11772_s28 + $0x80] sm:$0xff] %vm2780_vm5, %v5365_v8  ;;  %v5368_v9 = vmax.f32 %v5352_v32, 0.0  ;;  %v5350_v1 = vadd.f32 %v5289_v37, %v4834_v7  ;;  %v7431_v60 = vpop.f32.mrf.mxu0  ;;  %v4890_v32 = vadd.f32 %v11830_v16, %v11832_v2 }
 0x33b   : > { %v7406_v58 = vpop.f32.mrf.mxu1 }
 0x33c   : > { %5384 = vst.msk [vmem:[%s11772_s28 + $0x98] sm:$0xff] %vm2780_vm5, %v5368_v9  ;;  %v5366_v63 = vmax.f32 %v5350_v1, 0.0  ;;  %v5355_v48 = vadd.f32 %v7406_v58, %v4855_v44 }
 0x33d   : > { %v5302_v15 = vpop.f32.mrf.mxu1 }
 0x33e   : > { %5382 = vst.msk [vmem:[%s11772_s28 + $0x88] sm:$0xff] %vm2780_vm5, %v5366_v63  ;;  %v5371_v5 = vmax.f32 %v5355_v48, 0.0  ;;  %v5353_v23 = vadd.f32 %v5302_v15, %v4847_v61  ;;  %v11850_v45 = vpop.f32.mrf.mxu0 }
 0x33f   : > { %v7407_v21 = vpop.f32.mrf.mxu1 }
 0x340   : > { %5387 = vst.msk [vmem:[%s11772_s28 + $0xb0] sm:$0xff] %vm2780_vm5, %v5371_v5  ;;  %v5369_v24 = vmax.f32 %v5353_v23, 0.0  ;;  %v5356_v54 = vadd.f32 %v7407_v21, %v4858_v57  ;;  %v7434_v53 = vpop.f32.mrf.mxu0 }
 0x341   : > { %v5305_v46 = vpop.f32.mrf.mxu1 }
 0x342   : > { %5385 = vst.msk [vmem:[%s11772_s28 + $0xa0] sm:$0xff] %vm2780_vm5, %v5369_v24  ;;  %v5372_v36 = vmax.f32 %v5356_v54, 0.0  ;;  %v5354_v11 = vadd.f32 %v5305_v46, %v4850_v41  ;;  %v11856_v12 = vpop.f32.mrf.mxu0 }
 0x344   : > { %5388 = vst.msk [vmem:[%s11772_s28 + $0xb8] sm:$0xff] %vm2780_vm5, %v5372_v36  ;;  %v5370_v56 = vmax.f32 %v5354_v11, 0.0  ;;  %v7435_v3 = vpop.f32.mrf.mxu0 }
 0x345   : > { %v7410_v33 = vpop.f32.mrf.mxu1 }
 0x346   : > { %5386 = vst.msk [vmem:[%s11772_s28 + $0xa8] sm:$0xff] %vm2780_vm5, %v5370_v56  ;;  %v5359_v39 = vadd.f32 %v7410_v33, %v4871_v17  ;;  %v11863_v28 = vpop.f32.mrf.mxu0 }
 0x347   : > { %v5318_v40 = vpop.f32.mrf.mxu1 }
 0x348   : > { %v5375_v19 = vmax.f32 %v5359_v39, 0.0  ;;  %v5357_v14 = vadd.f32 %v5318_v40, %v4863_v22  ;;  %v7438_v4 = vpop.f32.mrf.mxu0 }
 0x349   : > { %v7411_v31 = vpop.f32.mrf.mxu1 }
 0x34a   : > { %5391 = vst.msk [vmem:[%s11772_s28 + $0xd0] sm:$0xff] %vm2780_vm5, %v5375_v19  ;;  %v5373_v52 = vmax.f32 %v5357_v14, 0.0  ;;  %v5360_v51 = vadd.f32 %v7411_v31, %v4874_v26  ;;  %v11871_v43 = vpop.f32.mrf.mxu0 }
 0x34b   : > { %v5321_v13 = vpop.f32.mrf.mxu1 }
 0x34c   : > { %5389 = vst.msk [vmem:[%s11772_s28 + $0xc0] sm:$0xff] %vm2780_vm5, %v5373_v52  ;;  %v5376_v35 = vmax.f32 %v5360_v51, 0.0  ;;  %v5358_v34 = vadd.f32 %v5321_v13, %v4866_v42  ;;  %v7439_v62 = vpop.f32.mrf.mxu0 }
 0x34e   : > { %5392 = vst.msk [vmem:[%s11772_s28 + $0xd8] sm:$0xff] %vm2780_vm5, %v5376_v35  ;;  %v5374_v6 = vmax.f32 %v5358_v34, 0.0  ;;  %v11877_v29 = vpop.f32.mrf.mxu0 }
 0x350   : > { %5390 = vst.msk [vmem:[%s11772_s28 + $0xc8] sm:$0xff] %vm2780_vm5, %v5374_v6  ;;  %v7414_v30 = vpop.f32.mrf.mxu1  ;;  %v7442_v49 = vpop.f32.mrf.mxu0 }
 0x351   : > { %v5363_v20 = vadd.f32 %v7414_v30, %v4887_v25 }
 0x352   : > { %v5334_v7 = vpop.f32.mrf.mxu1  ;;  %v11885_v8 = vpop.f32.mrf.mxu0 }
 0x353   : > { %v5379_v37 = vmax.f32 %v5363_v20, 0.0  ;;  %v5361_v44 = vadd.f32 %v5334_v7, %v4879_v10 }
 0x354   : > { %v7415_v9 = vpop.f32.mrf.mxu1  ;;  %v7443_v38 = vpop.f32.mrf.mxu0 }
 0x355   : > { %5395 = vst.msk [vmem:[%s11772_s28 + $0xf0] sm:$0xff] %vm2780_vm5, %v5379_v37  ;;  %v5377_v1 = vmax.f32 %v5361_v44, 0.0  ;;  %v5364_v47 = vadd.f32 %v7415_v9, %v4890_v32 }
 0x356   : > { %v5337_v18 = vpop.f32.mrf.mxu1  ;;  %v11893_v60 = vpop.f32.mrf.mxu0 }
 0x357   : > { %5393 = vst.msk [vmem:[%s11772_s28 + $0xe0] sm:$0xff] %vm2780_vm5, %v5377_v1  ;;  %v5380_v58 = vmax.f32 %v5364_v47, 0.0  ;;  %v5362_v61 = vadd.f32 %v5337_v18, %v4882_v0 }
 0x358   : > { %v7446_v16 = vpop.f32.mrf.mxu0 }
 0x359   : > { %5396 = vst.msk [vmem:[%s11772_s28 + $0xf8] sm:$0xff] %vm2780_vm5, %v5380_v58  ;;  %v5378_v2 = vmax.f32 %v5362_v61, 0.0  ;;  %v5959_v63 = vpop.f32.mrf.mxu1 }
 0x35a   : > { %v5832_v48 = vpop.f32.mrf.mxu0  ;;  %v5960_v57 = vadd.f32 %v5959_v63, %v11838_v50 }
 0x35b   : > { %5394 = vst.msk [vmem:[%s11772_s28 + $0xe8] sm:$0xff] %vm2780_vm5, %v5378_v2  ;;  %v7462_v27 = vpop.f32.mrf.mxu1 }
 0x35c   : > { %v7447_v59 = vpop.f32.mrf.mxu0 }
 0x35d   : > { %v5962_v15 = vpop.f32.mrf.mxu1 }
 0x35e   : > { %v5963_v24 = vadd.f32 %v5962_v15, %v11842_v55 }
 0x35f   : > { %v7463_v5 = vpop.f32.mrf.mxu1 }
 0x360   : > { %v6257_v23 = vpop.f32.mrf.mxu0 }
 0x361   : > { %v6295_v21 = vadd.f32 %v6257_v23, %v5960_v57 }
 0x362   : > { %v7494_v41 = vpop.f32.mrf.mxu0 }
 0x363   : > { %v6304_v54 = vmax.f32 %v6295_v21, 0.0 }
 0x364   : > { %v6260_v53 = vpop.f32.mrf.mxu0 }
 0x365   : > { %6313 = vst.msk [vmem:[%s11772_s28 + $0x100] sm:$0xff] %vm2780_vm5, %v6304_v54  ;;  %v6296_v46 = vadd.f32 %v6260_v53, %v5963_v24 }
 0x366   : > { %v5967_v36 = vpop.f32.mrf.mxu1  ;;  %v7495_v11 = vpop.f32.mrf.mxu0 }
 0x367   : > { %v6305_v17 = vmax.f32 %v6296_v46, 0.0  ;;  %v5968_v56 = vadd.f32 %v5967_v36, %v11850_v45 }
 0x368   : > { %v7466_v3 = vpop.f32.mrf.mxu1  ;;  %v6265_v50 = vpop.f32.mrf.mxu0 }
 0x369   : > { %6314 = vst.msk [vmem:[%s11772_s28 + $0x108] sm:$0xff] %vm2780_vm5, %v6305_v17  ;;  %v6297_v33 = vadd.f32 %v6265_v50, %v5968_v56 }
 0x36a   : > { %v5970_v22 = vpop.f32.mrf.mxu1  ;;  %v7498_v39 = vpop.f32.mrf.mxu0 }
 0x36b   : > { %v6306_v55 = vmax.f32 %v6297_v33, 0.0  ;;  %v5971_v40 = vadd.f32 %v5970_v22, %v11856_v12 }
 0x36c   : > { %v7467_v26 = vpop.f32.mrf.mxu1  ;;  %v6268_v19 = vpop.f32.mrf.mxu0 }
 0x36d   : > { %6315 = vst.msk [vmem:[%s11772_s28 + $0x110] sm:$0xff] %vm2780_vm5, %v6306_v55  ;;  %v6298_v14 = vadd.f32 %v6268_v19, %v5971_v40 }
 0x36e   : > { %v5975_v4 = vpop.f32.mrf.mxu1  ;;  %v7499_v31 = vpop.f32.mrf.mxu0 }
 0x36f   : > { %v6307_v45 = vmax.f32 %v6298_v14, 0.0  ;;  %v5976_v42 = vadd.f32 %v5975_v4, %v11863_v28 }
 0x370   : > { %v7470_v52 = vpop.f32.mrf.mxu1  ;;  %v6273_v51 = vpop.f32.mrf.mxu0 }
 0x371   : > { %6316 = vst.msk [vmem:[%s11772_s28 + $0x118] sm:$0xff] %vm2780_vm5, %v6307_v45  ;;  %v6299_v13 = vadd.f32 %v6273_v51, %v5976_v42 }
 0x372   : > { %v5978_v35 = vpop.f32.mrf.mxu1  ;;  %v7502_v34 = vpop.f32.mrf.mxu0 }
 0x373   : > { %v6308_v12 = vmax.f32 %v6299_v13, 0.0  ;;  %v5979_v62 = vadd.f32 %v5978_v35, %v11871_v43 }
 0x374   : > { %v7471_v6 = vpop.f32.mrf.mxu1  ;;  %v6276_v25 = vpop.f32.mrf.mxu0 }
 0x375   : > { %6317 = vst.msk [vmem:[%s11772_s28 + $0x120] sm:$0xff] %vm2780_vm5, %v6308_v12  ;;  %v6300_v30 = vadd.f32 %v6276_v25, %v5979_v62 }
 0x376   : > { %v5983_v49 = vpop.f32.mrf.mxu1  ;;  %v7503_v10 = vpop.f32.mrf.mxu0 }
 0x377   : > { %v6309_v28 = vmax.f32 %v6300_v30, 0.0  ;;  %v5984_v20 = vadd.f32 %v5983_v49, %v11877_v29 }
 0x378   : > { %v7474_v7 = vpop.f32.mrf.mxu1  ;;  %v6281_v32 = vpop.f32.mrf.mxu0 }
 0x379   : > { %6318 = vst.msk [vmem:[%s11772_s28 + $0x128] sm:$0xff] %vm2780_vm5, %v6309_v28  ;;  %v6301_v37 = vadd.f32 %v6281_v32, %v5984_v20 }
 0x37a   : > { %v5986_v44 = vpop.f32.mrf.mxu1  ;;  %v7506_v9 = vpop.f32.mrf.mxu0 }
 0x37b   : > { %v6310_v43 = vmax.f32 %v6301_v37, 0.0  ;;  %v5987_v38 = vadd.f32 %v5986_v44, %v11885_v8 }
 0x37c   : > { %v7475_v0 = vpop.f32.mrf.mxu1  ;;  %v6284_v1 = vpop.f32.mrf.mxu0 }
 0x37d   : > { %6319 = vst.msk [vmem:[%s11772_s28 + $0x130] sm:$0xff] %vm2780_vm5, %v6310_v43  ;;  %v6302_v47 = vadd.f32 %v6284_v1, %v5987_v38 }
 0x37e   : > { %v5991_v18 = vpop.f32.mrf.mxu1  ;;  %v7507_v58 = vpop.f32.mrf.mxu0 }
 0x37f   : > { %v6311_v29 = vmax.f32 %v6302_v47, 0.0  ;;  %v5992_v61 = vadd.f32 %v5991_v18, %v11893_v60 }
 0x380   : > { %v7478_v16 = vpop.f32.mrf.mxu1  ;;  %v6289_v2 = vpop.f32.mrf.mxu0 }
 0x381   : > { %6320 = vst.msk [vmem:[%s11772_s28 + $0x138] sm:$0xff] %vm2780_vm5, %v6311_v29  ;;  %v6303_v63 = vadd.f32 %v6289_v2, %v5992_v61 }
 0x382   : > { %v5994_v48 = vpop.f32.mrf.mxu1  ;;  %v7510_v27 = vpop.f32.mrf.mxu0 }
 0x383   : > { %v6312_v59 = vmax.f32 %v6303_v63, 0.0 }
 0x384   : > { %v7479_v8 = vpop.f32.mrf.mxu1  ;;  %v6292_v15 = vpop.f32.mrf.mxu0 }
 0x385   : > { %6321 = vst.msk [vmem:[%s11772_s28 + $0x140] sm:$0xf] %vm12627_vm9, %v6312_v59 }
 0x386   : > { %v7511_v57 = vpop.f32.mrf.mxu0 }
 0x387 PF: > { %s13_s12 = sadd.s32 1, %s7759_s12  }
 0x388   : > { %p10_p4 = scmp.ge.s32.totalorder %s13_s12, 4  }
 0x38a   :  { %12 = sbr.rel (!%p10_p4) target bundleno = 1 (0x1), region = 66 }

</bundles_post_ra>
